<compile_context>
chip_gen: v6e
topology: v6e:2x2x1
jax: 0.10.0
libtpu: 0.0.40
codegen_flags: <defaults>
</compile_context>

<pallas_src>
import functools

import jax
import jax.numpy as jnp
from jax import lax
from jax.experimental import pallas as pl
from jax.experimental.pallas import tpu as pltpu


_TILE_M = 512        # lane tile for conv matmul (multiple of 128)
_TILE_B_POOL = 256   # batch tile for the max-pool kernel
_TILE_B_FC = 512     # lane (batch) tile for the fused fc head


# ---------------------------------------------------------------------------
# Pallas kernels
# ---------------------------------------------------------------------------

def _matmul_bias_relu_kernel(w_ref, b_ref, p_ref, o_ref, *, relu):
    """o(CO, Mt) = act(W(CO,K) @ P(K,Mt) + b(CO,1)). bf16 in, f32 accumulate."""
    acc = jnp.dot(w_ref[...], p_ref[...], preferred_element_type=jnp.float32)
    acc = acc + b_ref[...]                       # (CO, 1) broadcasts over lanes
    if relu:
        acc = jnp.maximum(acc, 0.0)
    o_ref[...] = acc.astype(o_ref.dtype)


def _maxpool_2x2_s1_kernel(x_ref, o_ref):
    """F.max_pool2d(x, 2, 1) on a (C, Bt, H, W) tile held in VMEM."""
    x = x_ref[...]
    a = x[:, :, :-1, :-1]
    b = x[:, :, :-1, 1:]
    c = x[:, :, 1:, :-1]
    d = x[:, :, 1:, 1:]
    o_ref[...] = jnp.maximum(jnp.maximum(a, b), jnp.maximum(c, d))


def _fc_head_kernel(w1_ref, b1_ref, w2_ref, b2_ref, x_ref, o_ref):
    """Fused fc1(+relu)+fc2, lane-dense: logits(10, Bt) = W2 @ relu(W1 @ Xt + b1) + b2."""
    h = jnp.dot(w1_ref[...], x_ref[...], preferred_element_type=jnp.float32)
    h = jnp.maximum(h + b1_ref[...], 0.0)
    out = jnp.dot(w2_ref[...], h.astype(w2_ref.dtype),
                  preferred_element_type=jnp.float32)
    o_ref[...] = (out + b2_ref[...]).astype(o_ref.dtype)


# ---------------------------------------------------------------------------
# Wrappers (pallas_call plumbing)
# ---------------------------------------------------------------------------

def _matmul_lane_dense(w_mat, b_col, patches, *, relu, out_dtype):
    """w_mat: (CO, K) bf16, b_col: (CO, 1) f32, patches: (K, M) bf16 -> (CO, M)."""
    CO, K = w_mat.shape
    K2, M = patches.shape
    assert K == K2
    tile_m = M if M <= _TILE_M else _TILE_M
    grid = (pl.cdiv(M, tile_m),)
    kernel = functools.partial(_matmul_bias_relu_kernel, relu=relu)
    flops = 2 * CO * K * M
    bytes_accessed = (CO * K + K * M) * 2 + CO * M * jnp.dtype(out_dtype).itemsize + CO * 4
    return pl.pallas_call(
        kernel,
        out_shape=jax.ShapeDtypeStruct((CO, M), out_dtype),
        grid=grid,
        in_specs=[
            pl.BlockSpec((CO, K), lambda i: (0, 0)),        # weights resident
            pl.BlockSpec((CO, 1), lambda i: (0, 0)),        # bias resident
            pl.BlockSpec((K, tile_m), lambda i: (0, i)),    # patch tile (lanes)
        ],
        out_specs=pl.BlockSpec((CO, tile_m), lambda i: (0, i)),
        compiler_params=pltpu.CompilerParams(dimension_semantics=("parallel",)),
        cost_estimate=pl.CostEstimate(flops=flops, transcendentals=0,
                                      bytes_accessed=bytes_accessed),
    )(w_mat, b_col, patches)


def pallas_maxpool_2x2_s1(x_cbhw):
    """(C, B, H, W) max pool, kernel 2, stride 1, tiled over batch."""
    C, B, H, W = x_cbhw.shape
    tile_b = B if B <= _TILE_B_POOL else _TILE_B_POOL
    grid = (pl.cdiv(B, tile_b),)
    return pl.pallas_call(
        _maxpool_2x2_s1_kernel,
        out_shape=jax.ShapeDtypeStruct((C, B, H - 1, W - 1), x_cbhw.dtype),
        grid=grid,
        in_specs=[pl.BlockSpec((C, tile_b, H, W), lambda i: (0, i, 0, 0))],
        out_specs=pl.BlockSpec((C, tile_b, H - 1, W - 1), lambda i: (0, i, 0, 0)),
        compiler_params=pltpu.CompilerParams(dimension_semantics=("parallel",)),
    )(x_cbhw)


def pallas_fc_head(xt, w1, b1, w2, b2):
    """xt: (512, B) bf16-castable. Returns lane-dense logits (10, B) f32."""
    K1, B = xt.shape
    N1, K1b = w1.shape
    assert K1 == K1b
    N2, N1b = w2.shape
    assert N1 == N1b
    tile_b = B if B <= _TILE_B_FC else _TILE_B_FC
    grid = (pl.cdiv(B, tile_b),)
    return pl.pallas_call(
        _fc_head_kernel,
        out_shape=jax.ShapeDtypeStruct((N2, B), jnp.float32),
        grid=grid,
        in_specs=[
            pl.BlockSpec((N1, K1), lambda i: (0, 0)),
            pl.BlockSpec((N1, 1), lambda i: (0, 0)),
            pl.BlockSpec((N2, N1), lambda i: (0, 0)),
            pl.BlockSpec((N2, 1), lambda i: (0, 0)),
            pl.BlockSpec((K1, tile_b), lambda i: (0, i)),
        ],
        out_specs=pl.BlockSpec((N2, tile_b), lambda i: (0, i)),
        compiler_params=pltpu.CompilerParams(dimension_semantics=("parallel",)),
    )(w1.astype(jnp.bfloat16), b1.reshape(N1, 1).astype(jnp.float32),
      w2.astype(jnp.bfloat16), b2.reshape(N2, 1).astype(jnp.float32),
      xt.astype(jnp.bfloat16))


# ---------------------------------------------------------------------------
# Glue: im2col in (C, B, H, W) layout (plain JAX slicing/reshape only)
# ---------------------------------------------------------------------------

def _im2col_cbhw(x_cbhw, kh, kw, stride, padding):
    """(C, B, H, W) -> patches (C*kh*kw, B*OH*OW); K flattened in (C, kh, kw)
    order to exactly match PyTorch Conv2d weight layout."""
    if padding:
        x_cbhw = jnp.pad(x_cbhw,
                         ((0, 0), (0, 0), (padding, padding), (padding, padding)))
    C, B, H, W = x_cbhw.shape
    oh = (H - kh) // stride + 1
    ow = (W - kw) // stride + 1
    cols = []
    for i in range(kh):
        for j in range(kw):
            cols.append(x_cbhw[:, :, i:i + stride * oh:stride,
                               j:j + stride * ow:stride])
    p = jnp.stack(cols, axis=1)                   # (C, kh*kw, B, OH, OW)
    p = p.reshape(C * kh * kw, B * oh * ow)       # (K, M) — no transpose needed
    return p, oh, ow


def conv2d_lane_dense(x_cbhw, w, b, *, stride, padding, relu):
    """PyTorch-semantics Conv2d on channels-major input (CI, B, H, W),
    weight (CO, CI, KH, KW) -> output (CO, B, OH, OW) bf16."""
    CO, CI, KH, KW = w.shape
    assert x_cbhw.shape[0] == CI
    B = x_cbhw.shape[1]
    patches, oh, ow = _im2col_cbhw(x_cbhw, KH, KW, stride, padding)  # (K, B*OH*OW)
    w_mat = w.reshape(CO, CI * KH * KW).astype(jnp.bfloat16)
    b_col = b.reshape(CO, 1).astype(jnp.float32)
    out = _matmul_lane_dense(w_mat, b_col, patches.astype(jnp.bfloat16),
                             relu=relu, out_dtype=jnp.bfloat16)       # (CO, M)
    return out.reshape(CO, B, oh, ow)


# ---------------------------------------------------------------------------
# Model: deterministic parameter init + forward
# ---------------------------------------------------------------------------

def init_params(key):
    ks = jax.random.split(key, 8)
    scale = 0.05
    return {
        "conv1_w": scale * jax.random.normal(ks[0], (16, 1, 8, 8), jnp.float32),
        "conv1_b": scale * jax.random.normal(ks[1], (16,), jnp.float32),
        "conv2_w": scale * jax.random.normal(ks[2], (32, 16, 4, 4), jnp.float32),
        "conv2_b": scale * jax.random.normal(ks[3], (32,), jnp.float32),
        "fc1_w": scale * jax.random.normal(ks[4], (32, 32 * 4 * 4), jnp.float32),
        "fc1_b": scale * jax.random.normal(ks[5], (32,), jnp.float32),
        "fc2_w": scale * jax.random.normal(ks[6], (10, 32), jnp.float32),
        "fc2_b": scale * jax.random.normal(ks[7], (10,), jnp.float32),
    }


def sample_convnet_forward(params, x):
    # x: (B, 1, 28, 28) NCHW float32 (PyTorch convention at the boundary).
    B = x.shape[0]
    # Internal channels-major bf16 layout: (C, B, H, W).
    y = x.astype(jnp.bfloat16).transpose(1, 0, 2, 3)                     # (1, B, 28, 28)
    y = conv2d_lane_dense(y, params["conv1_w"], params["conv1_b"],
                          stride=2, padding=3, relu=True)                # (16, B, 14, 14)
    y = pallas_maxpool_2x2_s1(y)                                         # (16, B, 13, 13)
    y = conv2d_lane_dense(y, params["conv2_w"], params["conv2_b"],
                          stride=2, padding=0, relu=True)                # (32, B, 5, 5)
    y = pallas_maxpool_2x2_s1(y)                                         # (32, B, 4, 4)
    # Flatten per-sample in (c, h, w) order — matches x.view(-1, 32*4*4).
    xt = y.transpose(0, 2, 3, 1).reshape(32 * 4 * 4, B)                  # (512, B)
    logits_t = pallas_fc_head(xt, params["fc1_w"], params["fc1_b"],
                              params["fc2_w"], params["fc2_b"])          # (10, B)
    return logits_t.T.astype(jnp.float32)                                # (B, 10)


# Pure-JAX/XLA reference (f32) for a sanity check of the Pallas path.
def reference_forward(params, x):
    dn = ("NCHW", "OIHW", "NCHW")
    y = lax.conv_general_dilated(x, params["conv1_w"], (2, 2),
                                 ((3, 3), (3, 3)), dimension_numbers=dn)
    y = jax.nn.relu(y + params["conv1_b"][None, :, None, None])
    y = lax.reduce_window(y, -jnp.inf, lax.max, (1, 1, 2, 2), (1, 1, 1, 1), "VALID")
    y = lax.conv_general_dilated(y, params["conv2_w"], (2, 2),
                                 "VALID", dimension_numbers=dn)
    y = jax.nn.relu(y + params["conv2_b"][None, :, None, None])
    y = lax.reduce_window(y, -jnp.inf, lax.max, (1, 1, 2, 2), (1, 1, 1, 1), "VALID")
    y = y.reshape(y.shape[0], -1)
    y = jax.nn.relu(y @ params["fc1_w"].T + params["fc1_b"])
    return y @ params["fc2_w"].T + params["fc2_b"]


if __name__ == "__main__":
    key = jax.random.PRNGKey(0)
    pkey, xkey = jax.random.split(key)
    params = init_params(pkey)
    # Spatial size 28x28 is required by the hard-coded 32*4*4 flatten.
    x = jax.random.normal(xkey, (2, 1, 28, 28), jnp.float32)

    out = jax.jit(sample_convnet_forward)(params, x)
    out = jax.block_until_ready(out)
    assert out.shape == (2, 10)

    ref = jax.jit(reference_forward)(params, x)
    ref = jax.block_until_ready(ref)
    max_err = float(jnp.max(jnp.abs(out - ref)))
    # bf16 activations/weights -> loose tolerance vs. f32 reference.
    assert max_err < 5e-2, f"mismatch vs reference: {max_err}"

    print("KERNEL_OK")
</pallas_src>

<mosaic_0001>
module attributes {stable_mosaic.version = 11 : i64} {
  func.func @_matmul_bias_relu_kernel(%arg0: i32, %arg1: memref<16x64xbf16, #tpu.memory_space<vmem>>, %arg2: memref<16x1xf32, #tpu.memory_space<vmem>>, %arg3: memref<64x392xbf16, #tpu.memory_space<vmem>>, %arg4: memref<16x392xbf16, #tpu.memory_space<vmem>>) attributes {dimension_semantics = [#tpu.dimension_semantics<parallel>], iteration_bounds = array<i64: 1>, scalar_prefetch = 0 : i64, scratch_operands = 0 : i64, tpu.core_type = #tpu.core_type<tc>, window_params = [{pipeline_mode = #tpu.pipeline_mode<synchronous>, transform_indices = @transform_0, window_bounds = array<i64: 16, 64>}, {pipeline_mode = #tpu.pipeline_mode<synchronous>, transform_indices = @transform_1, window_bounds = array<i64: 16, 1>}, {transform_indices = @transform_2, window_bounds = array<i64: 64, 392>}, {transform_indices = @transform_3, window_bounds = array<i64: 16, 392>}]} {
    %c0 = arith.constant 0 : index
    %c0_0 = arith.constant 0 : index
    %0 = vector.load %arg1[%c0, %c0_0] : memref<16x64xbf16, #tpu.memory_space<vmem>>, vector<16x64xbf16>
    %c0_1 = arith.constant 0 : index
    %c0_2 = arith.constant 0 : index
    %1 = vector.load %arg3[%c0_1, %c0_2] : memref<64x392xbf16, #tpu.memory_space<vmem>>, vector<64x392xbf16>
    %cst = arith.constant dense<0.000000e+00> : vector<16x392xf32>
    %2 = tpu.matmul %0, %1, %cst {dimension_numbers = #tpu.dot_dimension_numbers<[1], [0], [0], [1], [0, 0, 1, 1], [], []>} : vector<16x64xbf16>, vector<64x392xbf16>, vector<16x392xf32> -> vector<16x392xf32>
    %c0_3 = arith.constant 0 : index
    %c0_4 = arith.constant 0 : index
    %3 = vector.load %arg2[%c0_3, %c0_4] : memref<16x1xf32, #tpu.memory_space<vmem>>, vector<16x1xf32>
    %4 = vector.broadcast %3 : vector<16x1xf32> to vector<16x392xf32>
    %5 = arith.addf %2, %4 : vector<16x392xf32>
    %cst_5 = arith.constant 0.000000e+00 : f32
    %6 = vector.broadcast %cst_5 : f32 to vector<16x392xf32>
    %7 = arith.maximumf %5, %6 : vector<16x392xf32>
    %8 = arith.truncf %7 : vector<16x392xf32> to vector<16x392xbf16>
    %c0_6 = arith.constant 0 : index
    %c0_7 = arith.constant 0 : index
    %9 = vector.load %arg4[%c0_6, %c0_7] : memref<16x392xbf16, #tpu.memory_space<vmem>>, vector<16x392xbf16>
    tpu.vector_store %arg4[%c0_6, %c0_7], %8 {strides = array<i32>} : memref<16x392xbf16, #tpu.memory_space<vmem>>, vector<16x392xbf16>,
    return
  }
  func.func @transform_0(%arg0: i32) -> (i32, i32) {
    %c0_i32 = arith.constant 0 : i32
    %c0_i32_0 = arith.constant 0 : i32
    %c0_i32_1 = arith.constant 0 : i32
    return %c0_i32, %c0_i32_0 : i32, i32
  }
  func.func @transform_1(%arg0: i32) -> (i32, i32) {
    %c0_i32 = arith.constant 0 : i32
    %c0_i32_0 = arith.constant 0 : i32
    %c0_i32_1 = arith.constant 0 : i32
    return %c0_i32, %c0_i32_0 : i32, i32
  }
  func.func @transform_2(%arg0: i32) -> (i32, i32) {
    %c0_i32 = arith.constant 0 : i32
    %c0_i32_0 = arith.constant 0 : i32
    return %c0_i32, %arg0 : i32, i32
  }
  func.func @transform_3(%arg0: i32) -> (i32, i32) {
    %c0_i32 = arith.constant 0 : i32
    %c0_i32_0 = arith.constant 0 : i32
    return %c0_i32, %arg0 : i32, i32
  }
}

module attributes {stable_mosaic.version = 11 : i64} {
  func.func @_maxpool_2x2_s1_kernel(%arg0: i32, %arg1: memref<16x2x14x14xbf16, #tpu.memory_space<vmem>>, %arg2: memref<16x2x13x13xbf16, #tpu.memory_space<vmem>>) attributes {dimension_semantics = [#tpu.dimension_semantics<parallel>], iteration_bounds = array<i64: 1>, scalar_prefetch = 0 : i64, scratch_operands = 0 : i64, tpu.core_type = #tpu.core_type<tc>, window_params = [{transform_indices = @transform_0, window_bounds = array<i64: 16, 2, 14, 14>}, {transform_indices = @transform_1, window_bounds = array<i64: 16, 2, 13, 13>}]} {
    %c0 = arith.constant 0 : index
    %c0_0 = arith.constant 0 : index
    %c0_1 = arith.constant 0 : index
    %c0_2 = arith.constant 0 : index
    %0 = vector.load %arg1[%c0, %c0_0, %c0_1, %c0_2] : memref<16x2x14x14xbf16, #tpu.memory_space<vmem>>, vector<16x2x14x14xbf16>
    %1 = vector.extract_strided_slice %0 {offsets = [0, 0, 0, 0], sizes = [16, 2, 13, 13], strides = [1, 1, 1, 1]} : vector<16x2x14x14xbf16> to vector<16x2x13x13xbf16>
    %2 = vector.extract_strided_slice %0 {offsets = [0, 0, 0, 1], sizes = [16, 2, 13, 13], strides = [1, 1, 1, 1]} : vector<16x2x14x14xbf16> to vector<16x2x13x13xbf16>
    %3 = vector.extract_strided_slice %0 {offsets = [0, 0, 1, 0], sizes = [16, 2, 13, 13], strides = [1, 1, 1, 1]} : vector<16x2x14x14xbf16> to vector<16x2x13x13xbf16>
    %4 = vector.extract_strided_slice %0 {offsets = [0, 0, 1, 1], sizes = [16, 2, 13, 13], strides = [1, 1, 1, 1]} : vector<16x2x14x14xbf16> to vector<16x2x13x13xbf16>
    %5 = arith.maximumf %1, %2 : vector<16x2x13x13xbf16>
    %6 = arith.maximumf %3, %4 : vector<16x2x13x13xbf16>
    %7 = arith.maximumf %5, %6 : vector<16x2x13x13xbf16>
    %c0_3 = arith.constant 0 : index
    %c0_4 = arith.constant 0 : index
    %c0_5 = arith.constant 0 : index
    %c0_6 = arith.constant 0 : index
    %8 = vector.load %arg2[%c0_3, %c0_4, %c0_5, %c0_6] : memref<16x2x13x13xbf16, #tpu.memory_space<vmem>>, vector<16x2x13x13xbf16>
    tpu.vector_store %arg2[%c0_3, %c0_4, %c0_5, %c0_6], %7 {strides = array<i32>} : memref<16x2x13x13xbf16, #tpu.memory_space<vmem>>, vector<16x2x13x13xbf16>,
    return
  }
  func.func @transform_0(%arg0: i32) -> (i32, i32, i32, i32) {
    %c0_i32 = arith.constant 0 : i32
    %c0_i32_0 = arith.constant 0 : i32
    %c0_i32_1 = arith.constant 0 : i32
    %c0_i32_2 = arith.constant 0 : i32
    return %c0_i32, %arg0, %c0_i32_0, %c0_i32_1 : i32, i32, i32, i32
  }
  func.func @transform_1(%arg0: i32) -> (i32, i32, i32, i32) {
    %c0_i32 = arith.constant 0 : i32
    %c0_i32_0 = arith.constant 0 : i32
    %c0_i32_1 = arith.constant 0 : i32
    %c0_i32_2 = arith.constant 0 : i32
    return %c0_i32, %arg0, %c0_i32_0, %c0_i32_1 : i32, i32, i32, i32
  }
}

module attributes {stable_mosaic.version = 11 : i64} {
  func.func @_matmul_bias_relu_kernel(%arg0: i32, %arg1: memref<32x256xbf16, #tpu.memory_space<vmem>>, %arg2: memref<32x1xf32, #tpu.memory_space<vmem>>, %arg3: memref<256x50xbf16, #tpu.memory_space<vmem>>, %arg4: memref<32x50xbf16, #tpu.memory_space<vmem>>) attributes {dimension_semantics = [#tpu.dimension_semantics<parallel>], iteration_bounds = array<i64: 1>, scalar_prefetch = 0 : i64, scratch_operands = 0 : i64, tpu.core_type = #tpu.core_type<tc>, window_params = [{pipeline_mode = #tpu.pipeline_mode<synchronous>, transform_indices = @transform_0, window_bounds = array<i64: 32, 256>}, {pipeline_mode = #tpu.pipeline_mode<synchronous>, transform_indices = @transform_1, window_bounds = array<i64: 32, 1>}, {transform_indices = @transform_2, window_bounds = array<i64: 256, 50>}, {transform_indices = @transform_3, window_bounds = array<i64: 32, 50>}]} {
    %c0 = arith.constant 0 : index
    %c0_0 = arith.constant 0 : index
    %0 = vector.load %arg1[%c0, %c0_0] : memref<32x256xbf16, #tpu.memory_space<vmem>>, vector<32x256xbf16>
    %c0_1 = arith.constant 0 : index
    %c0_2 = arith.constant 0 : index
    %1 = vector.load %arg3[%c0_1, %c0_2] : memref<256x50xbf16, #tpu.memory_space<vmem>>, vector<256x50xbf16>
    %cst = arith.constant dense<0.000000e+00> : vector<32x50xf32>
    %2 = tpu.matmul %0, %1, %cst {dimension_numbers = #tpu.dot_dimension_numbers<[1], [0], [0], [1], [0, 0, 1, 1], [], []>} : vector<32x256xbf16>, vector<256x50xbf16>, vector<32x50xf32> -> vector<32x50xf32>
    %c0_3 = arith.constant 0 : index
    %c0_4 = arith.constant 0 : index
    %3 = vector.load %arg2[%c0_3, %c0_4] : memref<32x1xf32, #tpu.memory_space<vmem>>, vector<32x1xf32>
    %4 = vector.broadcast %3 : vector<32x1xf32> to vector<32x50xf32>
    %5 = arith.addf %2, %4 : vector<32x50xf32>
    %cst_5 = arith.constant 0.000000e+00 : f32
    %6 = vector.broadcast %cst_5 : f32 to vector<32x50xf32>
    %7 = arith.maximumf %5, %6 : vector<32x50xf32>
    %8 = arith.truncf %7 : vector<32x50xf32> to vector<32x50xbf16>
    %c0_6 = arith.constant 0 : index
    %c0_7 = arith.constant 0 : index
    %9 = vector.load %arg4[%c0_6, %c0_7] : memref<32x50xbf16, #tpu.memory_space<vmem>>, vector<32x50xbf16>
    tpu.vector_store %arg4[%c0_6, %c0_7], %8 {strides = array<i32>} : memref<32x50xbf16, #tpu.memory_space<vmem>>, vector<32x50xbf16>,
    return
  }
  func.func @transform_0(%arg0: i32) -> (i32, i32) {
    %c0_i32 = arith.constant 0 : i32
    %c0_i32_0 = arith.constant 0 : i32
    %c0_i32_1 = arith.constant 0 : i32
    return %c0_i32, %c0_i32_0 : i32, i32
  }
  func.func @transform_1(%arg0: i32) -> (i32, i32) {
    %c0_i32 = arith.constant 0 : i32
    %c0_i32_0 = arith.constant 0 : i32
    %c0_i32_1 = arith.constant 0 : i32
    return %c0_i32, %c0_i32_0 : i32, i32
  }
  func.func @transform_2(%arg0: i32) -> (i32, i32) {
    %c0_i32 = arith.constant 0 : i32
    %c0_i32_0 = arith.constant 0 : i32
    return %c0_i32, %arg0 : i32, i32
  }
  func.func @transform_3(%arg0: i32) -> (i32, i32) {
    %c0_i32 = arith.constant 0 : i32
    %c0_i32_0 = arith.constant 0 : i32
    return %c0_i32, %arg0 : i32, i32
  }
}

module attributes {stable_mosaic.version = 11 : i64} {
  func.func @_maxpool_2x2_s1_kernel(%arg0: i32, %arg1: memref<32x2x5x5xbf16, #tpu.memory_space<vmem>>, %arg2: memref<32x2x4x4xbf16, #tpu.memory_space<vmem>>) attributes {dimension_semantics = [#tpu.dimension_semantics<parallel>], iteration_bounds = array<i64: 1>, scalar_prefetch = 0 : i64, scratch_operands = 0 : i64, tpu.core_type = #tpu.core_type<tc>, window_params = [{transform_indices = @transform_0, window_bounds = array<i64: 32, 2, 5, 5>}, {transform_indices = @transform_1, window_bounds = array<i64: 32, 2, 4, 4>}]} {
    %c0 = arith.constant 0 : index
    %c0_0 = arith.constant 0 : index
    %c0_1 = arith.constant 0 : index
    %c0_2 = arith.constant 0 : index
    %0 = vector.load %arg1[%c0, %c0_0, %c0_1, %c0_2] : memref<32x2x5x5xbf16, #tpu.memory_space<vmem>>, vector<32x2x5x5xbf16>
    %1 = vector.extract_strided_slice %0 {offsets = [0, 0, 0, 0], sizes = [32, 2, 4, 4], strides = [1, 1, 1, 1]} : vector<32x2x5x5xbf16> to vector<32x2x4x4xbf16>
    %2 = vector.extract_strided_slice %0 {offsets = [0, 0, 0, 1], sizes = [32, 2, 4, 4], strides = [1, 1, 1, 1]} : vector<32x2x5x5xbf16> to vector<32x2x4x4xbf16>
    %3 = vector.extract_strided_slice %0 {offsets = [0, 0, 1, 0], sizes = [32, 2, 4, 4], strides = [1, 1, 1, 1]} : vector<32x2x5x5xbf16> to vector<32x2x4x4xbf16>
    %4 = vector.extract_strided_slice %0 {offsets = [0, 0, 1, 1], sizes = [32, 2, 4, 4], strides = [1, 1, 1, 1]} : vector<32x2x5x5xbf16> to vector<32x2x4x4xbf16>
    %5 = arith.maximumf %1, %2 : vector<32x2x4x4xbf16>
    %6 = arith.maximumf %3, %4 : vector<32x2x4x4xbf16>
    %7 = arith.maximumf %5, %6 : vector<32x2x4x4xbf16>
    %c0_3 = arith.constant 0 : index
    %c0_4 = arith.constant 0 : index
    %c0_5 = arith.constant 0 : index
    %c0_6 = arith.constant 0 : index
    %8 = vector.load %arg2[%c0_3, %c0_4, %c0_5, %c0_6] : memref<32x2x4x4xbf16, #tpu.memory_space<vmem>>, vector<32x2x4x4xbf16>
    tpu.vector_store %arg2[%c0_3, %c0_4, %c0_5, %c0_6], %7 {strides = array<i32>} : memref<32x2x4x4xbf16, #tpu.memory_space<vmem>>, vector<32x2x4x4xbf16>,
    return
  }
  func.func @transform_0(%arg0: i32) -> (i32, i32, i32, i32) {
    %c0_i32 = arith.constant 0 : i32
    %c0_i32_0 = arith.constant 0 : i32
    %c0_i32_1 = arith.constant 0 : i32
    %c0_i32_2 = arith.constant 0 : i32
    return %c0_i32, %arg0, %c0_i32_0, %c0_i32_1 : i32, i32, i32, i32
  }
  func.func @transform_1(%arg0: i32) -> (i32, i32, i32, i32) {
    %c0_i32 = arith.constant 0 : i32
    %c0_i32_0 = arith.constant 0 : i32
    %c0_i32_1 = arith.constant 0 : i32
    %c0_i32_2 = arith.constant 0 : i32
    return %c0_i32, %arg0, %c0_i32_0, %c0_i32_1 : i32, i32, i32, i32
  }
}

module attributes {stable_mosaic.version = 11 : i64} {
  func.func @_fc_head_kernel(%arg0: i32, %arg1: memref<32x512xbf16, #tpu.memory_space<vmem>>, %arg2: memref<32x1xf32, #tpu.memory_space<vmem>>, %arg3: memref<10x32xbf16, #tpu.memory_space<vmem>>, %arg4: memref<10x1xf32, #tpu.memory_space<vmem>>, %arg5: memref<512x2xbf16, #tpu.memory_space<vmem>>, %arg6: memref<10x2xf32, #tpu.memory_space<vmem>>) attributes {dimension_semantics = [#tpu.dimension_semantics<parallel>], iteration_bounds = array<i64: 1>, scalar_prefetch = 0 : i64, scratch_operands = 0 : i64, tpu.core_type = #tpu.core_type<tc>, window_params = [{pipeline_mode = #tpu.pipeline_mode<synchronous>, transform_indices = @transform_0, window_bounds = array<i64: 32, 512>}, {pipeline_mode = #tpu.pipeline_mode<synchronous>, transform_indices = @transform_1, window_bounds = array<i64: 32, 1>}, {pipeline_mode = #tpu.pipeline_mode<synchronous>, transform_indices = @transform_2, window_bounds = array<i64: 10, 32>}, {pipeline_mode = #tpu.pipeline_mode<synchronous>, transform_indices = @transform_3, window_bounds = array<i64: 10, 1>}, {transform_indices = @transform_4, window_bounds = array<i64: 512, 2>}, {transform_indices = @transform_5, window_bounds = array<i64: 10, 2>}]} {
    %c0 = arith.constant 0 : index
    %c0_0 = arith.constant 0 : index
    %0 = vector.load %arg1[%c0, %c0_0] : memref<32x512xbf16, #tpu.memory_space<vmem>>, vector<32x512xbf16>
    %c0_1 = arith.constant 0 : index
    %c0_2 = arith.constant 0 : index
    %1 = vector.load %arg5[%c0_1, %c0_2] : memref<512x2xbf16, #tpu.memory_space<vmem>>, vector<512x2xbf16>
    %cst = arith.constant dense<0.000000e+00> : vector<32x2xf32>
    %2 = tpu.matmul %0, %1, %cst {dimension_numbers = #tpu.dot_dimension_numbers<[1], [0], [0], [1], [0, 0, 1, 1], [], []>} : vector<32x512xbf16>, vector<512x2xbf16>, vector<32x2xf32> -> vector<32x2xf32>
    %c0_3 = arith.constant 0 : index
    %c0_4 = arith.constant 0 : index
    %3 = vector.load %arg2[%c0_3, %c0_4] : memref<32x1xf32, #tpu.memory_space<vmem>>, vector<32x1xf32>
    %4 = vector.broadcast %3 : vector<32x1xf32> to vector<32x2xf32>
    %5 = arith.addf %2, %4 : vector<32x2xf32>
    %cst_5 = arith.constant 0.000000e+00 : f32
    %6 = vector.broadcast %cst_5 : f32 to vector<32x2xf32>
    %7 = arith.maximumf %5, %6 : vector<32x2xf32>
    %c0_6 = arith.constant 0 : index
    %c0_7 = arith.constant 0 : index
    %8 = vector.load %arg3[%c0_6, %c0_7] : memref<10x32xbf16, #tpu.memory_space<vmem>>, vector<10x32xbf16>
    %9 = arith.truncf %7 : vector<32x2xf32> to vector<32x2xbf16>
    %cst_8 = arith.constant dense<0.000000e+00> : vector<10x2xf32>
    %10 = tpu.matmul %8, %9, %cst_8 {dimension_numbers = #tpu.dot_dimension_numbers<[1], [0], [0], [1], [0, 0, 1, 1], [], []>} : vector<10x32xbf16>, vector<32x2xbf16>, vector<10x2xf32> -> vector<10x2xf32>
    %c0_9 = arith.constant 0 : index
    %c0_10 = arith.constant 0 : index
    %11 = vector.load %arg4[%c0_9, %c0_10] : memref<10x1xf32, #tpu.memory_space<vmem>>, vector<10x1xf32>
    %12 = vector.broadcast %11 : vector<10x1xf32> to vector<10x2xf32>
    %13 = arith.addf %10, %12 : vector<10x2xf32>
    %c0_11 = arith.constant 0 : index
    %c0_12 = arith.constant 0 : index
    %14 = vector.load %arg6[%c0_11, %c0_12] : memref<10x2xf32, #tpu.memory_space<vmem>>, vector<10x2xf32>
    tpu.vector_store %arg6[%c0_11, %c0_12], %13 {strides = array<i32>} : memref<10x2xf32, #tpu.memory_space<vmem>>, vector<10x2xf32>,
    return
  }
  func.func @transform_0(%arg0: i32) -> (i32, i32) {
    %c0_i32 = arith.constant 0 : i32
    %c0_i32_0 = arith.constant 0 : i32
    %c0_i32_1 = arith.constant 0 : i32
    return %c0_i32, %c0_i32_0 : i32, i32
  }
  func.func @transform_1(%arg0: i32) -> (i32, i32) {
    %c0_i32 = arith.constant 0 : i32
    %c0_i32_0 = arith.constant 0 : i32
    %c0_i32_1 = arith.constant 0 : i32
    return %c0_i32, %c0_i32_0 : i32, i32
  }
  func.func @transform_2(%arg0: i32) -> (i32, i32) {
    %c0_i32 = arith.constant 0 : i32
    %c0_i32_0 = arith.constant 0 : i32
    %c0_i32_1 = arith.constant 0 : i32
    return %c0_i32, %c0_i32_0 : i32, i32
  }
  func.func @transform_3(%arg0: i32) -> (i32, i32) {
    %c0_i32 = arith.constant 0 : i32
    %c0_i32_0 = arith.constant 0 : i32
    %c0_i32_1 = arith.constant 0 : i32
    return %c0_i32, %c0_i32_0 : i32, i32
  }
  func.func @transform_4(%arg0: i32) -> (i32, i32) {
    %c0_i32 = arith.constant 0 : i32
    %c0_i32_0 = arith.constant 0 : i32
    return %c0_i32, %arg0 : i32, i32
  }
  func.func @transform_5(%arg0: i32) -> (i32, i32) {
    %c0_i32 = arith.constant 0 : i32
    %c0_i32_0 = arith.constant 0 : i32
    return %c0_i32, %arg0 : i32, i32
  }
}

</mosaic_0001>

<bundles_post_ra>
// kernel: sample_convnet_forward.5
= control target key start
LH: loop header
LB: loop body
LE: loop exit
PB: predicated region body
PF: predicated region fallthrough
CT: control target
= control target key end

     0   :  { %v317_v1 = vmov 0   ;;  %vm130_vm0 = vcmask 523264   ;;  %vm253_vm1 = vcmask 1043456   ;;  %vm254_vm2 = vcmask 64516   ;;  %s415_s2 = inlined_call_operand.vmem [shape: bf16[64,392], index: 2, kind: input, shape index: {}]   ;;  %s416_s1 = inlined_call_operand.vmem [shape: f32[16,1], index: 1, kind: input, shape index: {}]   ;;  %s417_s0 = inlined_call_operand.vmem [shape: bf16[16,64], index: 0, kind: input, shape index: {}]   ;;  %s418_s3 = inlined_call_operand.vmem [shape: bf16[16,392], index: 3, kind: output, shape index: {}]  }
   0x1   :  { %v292_v0 = vld [vmem:[%s415_s2 + $0x64] ss:$16 sps:$4 sm:$0xff]   ;;  %166 = vmatprep.mubr.bf16.mxu0 %v317_v1  ;;  %209 = vmatprep.mubr.bf16.mxu1 %v317_v1  ;;  %v294_v2 = vld [vmem:[%s415_s2 + $0x6c] ss:$16 sps:$4 sm:$0xff]   ;;  %v296_v3 = vld [vmem:[%s415_s2 + $0x60] ss:$16 sps:$4 sm:$0xff]  }
   0x2   :  { %291 = vset.pattern.permute.xlu0 %v317_v1  ;;  %142 = vmatprep.subr.bf16.mxu0 %v292_v0  ;;  %v297_v4 = vld [vmem:[%s415_s2 + $0x68] ss:$16 sps:$4 sm:$0xff]   ;;  %v298_v5 = vld [vmem:[%s415_s2 + $0x44] ss:$16 sps:$4 sm:$0xff]   ;;  %v300_v6 = vld [vmem:[%s415_s2 + $0x4c] ss:$16 sps:$4 sm:$0xff]  }
   0x3   :  { %185 = vmatprep.subr.bf16.mxu1 %v294_v2  ;;  %143 = vmatpush1.bf16.msra.mxu0 %v296_v3  ;;  %v302_v7 = vld [vmem:[%s415_s2 + $0x40] ss:$16 sps:$4 sm:$0xff]   ;;  %v303_v8 = vld [vmem:[%s415_s2 + $0x48] ss:$16 sps:$4 sm:$0xff]   ;;  %v304_v9 = vld [vmem:[%s415_s2 + $0x24] ss:$16 sps:$4 sm:$0xff]  }
   0x4   :  { %186 = vmatpush1.bf16.msra.mxu1 %v297_v4  ;;  %144 = vmatprep.subr.bf16.mxu0 %v298_v5  ;;  %v306_v10 = vld [vmem:[%s415_s2 + $0x2c] ss:$16 sps:$4 sm:$0xff]   ;;  %v308_v11 = vld [vmem:[%s415_s2 + $0x20] ss:$16 sps:$4 sm:$0xff]   ;;  %v309_v12 = vld [vmem:[%s415_s2 + $0x28] ss:$16 sps:$4 sm:$0xff]  }
   0x5   :  { %187 = vmatprep.subr.bf16.mxu1 %v300_v6  ;;  %v310_v13 = vld [vmem:[%s415_s2 + $0x4] ss:$16 sps:$4 sm:$0xff]   ;;  %v312_v14 = vld [vmem:[%s415_s2 + $0xc] ss:$16 sps:$4 sm:$0xff]   ;;  %v314_v16 = vld [vmem:[%s415_s2] ss:$16 sps:$4 sm:$0xff]  }
   0x6   :  { %v33_v15 = vld [vmem:[%s416_s1] sm:$0xff]  ;;  %v315_v17 = vld [vmem:[%s415_s2 + $0x8] ss:$16 sps:$4 sm:$0xff]   ;;  %vm395_vm3 = vmor %vm254_vm2, %vm253_vm1 }
   0x7   :  { %145 = vmatpush1.bf16.msra.mxu0 %v302_v7  ;;  %37 = vperm.xlu0 %291, %v33_v15   ;;  %v316_v18 = vld [vmem:[%s417_s0] sm:$0xff]   ;;  %v34_v19 = vld [vmem:[%s416_s1 + $0x8] sm:$0xff] }
   0x8   :  { %188 = vmatpush1.bf16.msra.mxu1 %v303_v8  ;;  %146 = vmatprep.subr.bf16.mxu0 %v304_v9 }
   0x9   :  { %189 = vmatprep.subr.bf16.mxu1 %v306_v10 }
   0xb   :  { %147 = vmatpush1.bf16.msra.mxu0 %v308_v11  ;;  %42 = vperm.xlu0 %291, %v34_v19  }
   0xc   :  { %190 = vmatpush1.bf16.msra.mxu1 %v309_v12  ;;  %148 = vmatprep.subr.bf16.mxu0 %v310_v13 }
   0xd   :  { %191 = vmatprep.subr.bf16.mxu1 %v312_v14 }
   0xf   :  { %149 = vmatpush1.bf16.msra.mxu0 %v314_v16 }
  0x10   :  { %192 = vmatpush1.bf16.msra.mxu1 %v315_v17 }
  0x12   :  { %280 = vmatmul.mubr.msk.bf16.vlgmr.msra.gmra.mxu0 %vm130_vm0, %v316_v18 }
  0x13   :  { %281 = vmatmul.mubr.msk.bf16.vlgmr.msra.gmra.mxu1 %vm130_vm0, %v316_v18 }
  0x82   :  { %v38_v20 = vpop.permute.xlu0 %37 }
  0x86   :  { %v43_v33 = vpop.permute.xlu0 %42 }
  0xd2   :  { %v168_v21 = vpop.f32.mrf.mxu0 }
  0xd3   :  { %v211_v22 = vpop.f32.mrf.mxu1  ;;  %v169_v23 = vadd.f32 %v168_v21, %v38_v20 }
  0xd4   :  { %v212_v24 = vadd.f32 %v211_v22, %v38_v20  ;;  %v170_v25 = vpop.f32.mrf.mxu0 }
  0xd5   :  { %v213_v26 = vpop.f32.mrf.mxu1  ;;  %v171_v27 = vadd.f32 %v170_v25, %v38_v20  ;;  %v220_v31 = vmax.f32 %v169_v23, 0.0 }
  0xd6   :  { %v214_v28 = vadd.f32 %v213_v26, %v38_v20  ;;  %v172_v29 = vpop.f32.mrf.mxu0  ;;  %v222_v32 = vmax.f32 %v212_v24, 0.0 }
  0xd7   :  { %v215_v30 = vpop.f32.mrf.mxu1  ;;  %v221_v34 = vmax.f32 %v171_v27, 0.0  ;;  %v173_v37 = vadd.f32 %v172_v29, %v43_v33 }
  0xd8   :  { %v223_v35 = vmax.f32 %v214_v28, 0.0  ;;  %v216_v38 = vadd.f32 %v215_v30, %v43_v33  ;;  %v174_v39 = vpop.f32.mrf.mxu0 }
  0xd9   :  { %v217_v40 = vpop.f32.mrf.mxu1  ;;  %v286_v41 = vpack.c.bf16 %v221_v34, %v220_v31  ;;  %v175_v43 = vadd.f32 %v174_v39, %v43_v33  ;;  %v224_v45 = vmax.f32 %v173_v37, 0.0 }
  0xda   :  { %v287_v42 = vpack.c.bf16 %v223_v35, %v222_v32  ;;  %v218_v44 = vadd.f32 %v217_v40, %v43_v33  ;;  %v226_v46 = vmax.f32 %v216_v38, 0.0 }
  0xdb   :  { %252 = vst [vmem:[%s418_s3] sm:$0xff] %v286_v41  ;;  %v225_v47 = vmax.f32 %v175_v43, 0.0 }
  0xdc   :  { %256 = vst.msk [vmem:[%s418_s3 + $0x8] sm:$0xff] %vm395_vm3, %v287_v42  ;;  %v227_v48 = vmax.f32 %v218_v44, 0.0 }
  0xdd   :  { %v288_v49 = vpack.c.bf16 %v225_v47, %v224_v45 }
  0xde   :  { %v289_v50 = vpack.c.bf16 %v227_v48, %v226_v46 }
  0xdf   :  { %257 = vst [vmem:[%s418_s3 + $0x10] sm:$0xff] %v288_v49 }
  0xe0   :  { %258 = vst.msk [vmem:[%s418_s3 + $0x18] sm:$0xff] %vm395_vm3, %v289_v50 }

// kernel: sample_convnet_forward.6
= control target key start
LH: loop header
LB: loop body
LE: loop exit
PB: predicated region body
PF: predicated region fallthrough
CT: control target
= control target key end

     0   :  { %s1290_s10 = smov 127   ;;  %vm392_vm0 = vsmask.f32 3328  ;;  %vm393_vm1 = vsmask.f32 7440  ;;  %vm1131_vm2 = vcmask 101376   ;;  %s2468_s0 = inlined_call_operand.vmem [shape: bf16[16,2,14,14], index: 0, kind: input, shape index: {}]   ;;  %s2469_s1 = inlined_call_operand.vmem [shape: bf16[16,2,13,13], index: 1, kind: output, shape index: {}]  }
   0x1   :  { %v1304_v0 = vld [vmem:[%s2468_s0 + $0x8] sm:$0xf]  ;;  %v1309_v1 = vld [vmem:[%s2468_s0] sm:$0xf]  ;;  %v1318_v2 = vld [vmem:[%s2468_s0 + $0xc] sm:$0x7] }
   0x2   :  { %140 = vrot.lane.b32.xlu1 %v1304_v0, %s1290_s10  ;;  %136 = vrot.lane.b32.xlu0 %v1309_v1, %s1290_s10  ;;  %v1323_v3 = vld [vmem:[%s2468_s0 + $0x4] sm:$0x7]  ;;  %v1332_v4 = vld [vmem:[%s2468_s0 + $0x14] sm:$0x7]  ;;  %vm1133_vm3 = vcmask 100352   ;;  %vm1695_vm5 = vmor %vm392_vm0, %vm393_vm1 }
   0x3   :  { %v1337_v5 = vld [vmem:[%s2468_s0 + $0x10] sm:$0xf]  ;;  %v1346_v6 = vld [vmem:[%s2468_s0 + $0x1c] sm:$0x7]  ;;  %v1351_v7 = vld [vmem:[%s2468_s0 + $0x18] sm:$0xf] }
   0x4   :  { %v1360_v8 = vld [vmem:[%s2468_s0 + $0x24] sm:$0x7]  ;;  %v1365_v9 = vld [vmem:[%s2468_s0 + $0x20] sm:$0xf]  ;;  %v1374_v10 = vld [vmem:[%s2468_s0 + $0x2c] sm:$0x7] }
   0x5   :  { %v1379_v11 = vld [vmem:[%s2468_s0 + $0x28] sm:$0xf]  ;;  %v1388_v12 = vld [vmem:[%s2468_s0 + $0x34] sm:$0x7]  ;;  %v1393_v13 = vld [vmem:[%s2468_s0 + $0x30] sm:$0xf] }
   0x6   :  { %142 = vrot.lane.b32.xlu1 %v1318_v2, %s1290_s10  ;;  %138 = vrot.lane.b32.xlu0 %v1323_v3, %s1290_s10  ;;  %v1402_v14 = vld [vmem:[%s2468_s0 + $0x3c] sm:$0x7]  ;;  %v1407_v15 = vld [vmem:[%s2468_s0 + $0x38] sm:$0xf]  ;;  %vm1134_vm4 = vsmask.f32 2304 }
   0x7   :  { %v1416_v16 = vld [vmem:[%s2468_s0 + $0x44] sm:$0x7]  ;;  %v1421_v17 = vld [vmem:[%s2468_s0 + $0x40] sm:$0xf]  ;;  %v1430_v18 = vld [vmem:[%s2468_s0 + $0x4c] sm:$0x7] }
   0x8   :  { %v1435_v19 = vld [vmem:[%s2468_s0 + $0x48] sm:$0xf]  ;;  %v1444_v20 = vld [vmem:[%s2468_s0 + $0x54] sm:$0x7]  ;;  %v1449_v21 = vld [vmem:[%s2468_s0 + $0x50] sm:$0xf] }
   0x9   :  { %v1458_v22 = vld [vmem:[%s2468_s0 + $0x5c] sm:$0x7]  ;;  %v1463_v23 = vld [vmem:[%s2468_s0 + $0x58] sm:$0xf]  ;;  %v1472_v24 = vld [vmem:[%s2468_s0 + $0x64] sm:$0x7] }
   0xa   :  { %146 = vrot.lane.b32.xlu1 %v1332_v4, %s1290_s10  ;;  %144 = vrot.lane.b32.xlu0 %v1337_v5, %s1290_s10  ;;  %v1477_v25 = vld [vmem:[%s2468_s0 + $0x60] sm:$0xf]  ;;  %v1486_v26 = vld [vmem:[%s2468_s0 + $0x6c] sm:$0x7]  ;;  %vm1713_vm6 = vmand %vm1133_vm3, %vm1134_vm4 }
   0xb   :  { %v1491_v27 = vld [vmem:[%s2468_s0 + $0x68] sm:$0xf]  ;;  %v1500_v28 = vld [vmem:[%s2468_s0 + $0x74] sm:$0x7]  ;;  %v1505_v29 = vld [vmem:[%s2468_s0 + $0x70] sm:$0xf] }
   0xc   :  { %v1514_v30 = vld [vmem:[%s2468_s0 + $0x7c] sm:$0x7]  ;;  %v1519_v31 = vld [vmem:[%s2468_s0 + $0x78] sm:$0xf]  ;;  %v1528_v32 = vld [vmem:[%s2468_s0 + $0x84] sm:$0x7] }
   0xd   :  { %v1533_v33 = vld [vmem:[%s2468_s0 + $0x80] sm:$0xf]  ;;  %v1542_v34 = vld [vmem:[%s2468_s0 + $0x8c] sm:$0x7]  ;;  %v1547_v35 = vld [vmem:[%s2468_s0 + $0x88] sm:$0xf] }
   0xe   :  { %150 = vrot.lane.b32.xlu1 %v1346_v6, %s1290_s10  ;;  %148 = vrot.lane.b32.xlu0 %v1351_v7, %s1290_s10  ;;  %v1556_v36 = vld [vmem:[%s2468_s0 + $0x94] sm:$0x7]  ;;  %v1561_v37 = vld [vmem:[%s2468_s0 + $0x90] sm:$0xf] }
   0xf   :  { %v1570_v38 = vld [vmem:[%s2468_s0 + $0x9c] sm:$0x7]  ;;  %v1575_v39 = vld [vmem:[%s2468_s0 + $0x98] sm:$0xf]  ;;  %v1584_v40 = vld [vmem:[%s2468_s0 + $0xa4] sm:$0x7] }
  0x10   :  { %2474 = vst [vmem:[#allocation2_spill] sm:$0xff] %v1570_v38  ;;  %2475 = vst [vmem:[#allocation3_spill] sm:$0xff] %v1575_v39  ;;  %v1589_v41 = vld [vmem:[%s2468_s0 + $0xa0] sm:$0xf]  ;;  %v51_v42 = vld [vmem:[%s2468_s0 + $0xac] sm:$0x7] }
  0x11   :  { %2476 = vst [vmem:[#allocation4_spill] sm:$0xff] %v1584_v40  ;;  %2477 = vst [vmem:[#allocation5_spill] sm:$0xff] %v1589_v41  ;;  %v50_v43 = vld [vmem:[%s2468_s0 + $0xa8] sm:$0xf]  ;;  %v53_v44 = vld [vmem:[%s2468_s0 + $0xb4] sm:$0x7] }
  0x12   :  { %154 = vrot.lane.b32.xlu1 %v1360_v8, %s1290_s10  ;;  %152 = vrot.lane.b32.xlu0 %v1365_v9, %s1290_s10  ;;  %v52_v45 = vld [vmem:[%s2468_s0 + $0xb0] sm:$0xf]  ;;  %v55_v46 = vld [vmem:[%s2468_s0 + $0xbc] sm:$0x7] }
  0x13   :  { %v54_v47 = vld [vmem:[%s2468_s0 + $0xb8] sm:$0xf]  ;;  %v57_v48 = vld [vmem:[%s2468_s0 + $0xc4] sm:$0x7]  ;;  %v56_v49 = vld [vmem:[%s2468_s0 + $0xc0] sm:$0xf] }
  0x14   :  { %v59_v50 = vld [vmem:[%s2468_s0 + $0xcc] sm:$0x7]  ;;  %v58_v51 = vld [vmem:[%s2468_s0 + $0xc8] sm:$0xf]  ;;  %v61_v52 = vld [vmem:[%s2468_s0 + $0xd4] sm:$0x7] }
  0x15   :  { %v60_v53 = vld [vmem:[%s2468_s0 + $0xd0] sm:$0xf]  ;;  %v63_v54 = vld [vmem:[%s2468_s0 + $0xdc] sm:$0x7]  ;;  %v62_v55 = vld [vmem:[%s2468_s0 + $0xd8] sm:$0xf] }
  0x16   :  { %158 = vrot.lane.b32.xlu1 %v1374_v10, %s1290_s10  ;;  %156 = vrot.lane.b32.xlu0 %v1379_v11, %s1290_s10  ;;  %v65_v56 = vld [vmem:[%s2468_s0 + $0xe4] sm:$0x7]  ;;  %v64_v57 = vld [vmem:[%s2468_s0 + $0xe0] sm:$0xf] }
  0x17   :  { %v67_v58 = vld [vmem:[%s2468_s0 + $0xec] sm:$0x7]  ;;  %v66_v59 = vld [vmem:[%s2468_s0 + $0xe8] sm:$0xf] }
  0x1a   :  { %162 = vrot.lane.b32.xlu1 %v1388_v12, %s1290_s10  ;;  %160 = vrot.lane.b32.xlu0 %v1393_v13, %s1290_s10 }
  0x1e   :  { %166 = vrot.lane.b32.xlu1 %v1402_v14, %s1290_s10  ;;  %164 = vrot.lane.b32.xlu0 %v1407_v15, %s1290_s10 }
  0x22   :  { %170 = vrot.lane.b32.xlu1 %v1416_v16, %s1290_s10  ;;  %168 = vrot.lane.b32.xlu0 %v1421_v17, %s1290_s10 }
  0x26   :  { %174 = vrot.lane.b32.xlu1 %v1430_v18, %s1290_s10  ;;  %172 = vrot.lane.b32.xlu0 %v1435_v19, %s1290_s10 }
  0x2a   :  { %178 = vrot.lane.b32.xlu1 %v1444_v20, %s1290_s10  ;;  %176 = vrot.lane.b32.xlu0 %v1449_v21, %s1290_s10 }
  0x2e   :  { %182 = vrot.lane.b32.xlu1 %v1458_v22, %s1290_s10  ;;  %180 = vrot.lane.b32.xlu0 %v1463_v23, %s1290_s10 }
  0x32   :  { %186 = vrot.lane.b32.xlu1 %v1472_v24, %s1290_s10  ;;  %184 = vrot.lane.b32.xlu0 %v1477_v25, %s1290_s10 }
  0x36   :  { %190 = vrot.lane.b32.xlu1 %v1486_v26, %s1290_s10  ;;  %188 = vrot.lane.b32.xlu0 %v1491_v27, %s1290_s10 }
  0x3a   :  { %194 = vrot.lane.b32.xlu1 %v1500_v28, %s1290_s10  ;;  %192 = vrot.lane.b32.xlu0 %v1505_v29, %s1290_s10 }
  0x3e   :  { %198 = vrot.lane.b32.xlu1 %v1514_v30, %s1290_s10  ;;  %196 = vrot.lane.b32.xlu0 %v1519_v31, %s1290_s10 }
  0x42   :  { %202 = vrot.lane.b32.xlu1 %v1528_v32, %s1290_s10  ;;  %200 = vrot.lane.b32.xlu0 %v1533_v33, %s1290_s10 }
  0x46   :  { %206 = vrot.lane.b32.xlu1 %v1542_v34, %s1290_s10  ;;  %204 = vrot.lane.b32.xlu0 %v1547_v35, %s1290_s10 }
  0x4a   :  { %210 = vrot.lane.b32.xlu1 %v1556_v36, %s1290_s10  ;;  %208 = vrot.lane.b32.xlu0 %v1561_v37, %s1290_s10 }
  0x4e   :  { %214 = vrot.lane.b32.xlu1 %v1570_v38, %s1290_s10  ;;  %212 = vrot.lane.b32.xlu0 %v1575_v39, %s1290_s10 }
  0x52   :  { %218 = vrot.lane.b32.xlu1 %v1584_v40, %s1290_s10  ;;  %216 = vrot.lane.b32.xlu0 %v1589_v41, %s1290_s10 }
  0x56   :  { %222 = vrot.lane.b32.xlu1 %v51_v42, %s1290_s10  ;;  %220 = vrot.lane.b32.xlu0 %v50_v43, %s1290_s10  ;;  %v69_v42 = vld [vmem:[%s2468_s0 + $0xf4] sm:$0x7] }
  0x5a   :  { %226 = vrot.lane.b32.xlu1 %v53_v44, %s1290_s10  ;;  %224 = vrot.lane.b32.xlu0 %v52_v45, %s1290_s10 }
  0x5e   :  { %230 = vrot.lane.b32.xlu1 %v55_v46, %s1290_s10  ;;  %228 = vrot.lane.b32.xlu0 %v54_v47, %s1290_s10  ;;  %v68_v47 = vld [vmem:[%s2468_s0 + $0xf0] sm:$0xf] }
  0x62   :  { %234 = vrot.lane.b32.xlu1 %v57_v48, %s1290_s10  ;;  %232 = vrot.lane.b32.xlu0 %v56_v49, %s1290_s10 }
  0x66   :  { %238 = vrot.lane.b32.xlu1 %v59_v50, %s1290_s10  ;;  %236 = vrot.lane.b32.xlu0 %v58_v51, %s1290_s10 }
  0x6a   :  { %242 = vrot.lane.b32.xlu1 %v61_v52, %s1290_s10  ;;  %240 = vrot.lane.b32.xlu0 %v60_v53, %s1290_s10 }
  0x6e   :  { %246 = vrot.lane.b32.xlu1 %v63_v54, %s1290_s10  ;;  %244 = vrot.lane.b32.xlu0 %v62_v55, %s1290_s10 }
  0x72   :  { %250 = vrot.lane.b32.xlu1 %v65_v56, %s1290_s10  ;;  %248 = vrot.lane.b32.xlu0 %v64_v57, %s1290_s10  ;;  %v71_v56 = vld [vmem:[%s2468_s0 + $0xfc] sm:$0x7]  ;;  %v70_v57 = vld [vmem:[%s2468_s0 + $0xf8] sm:$0xf] }
  0x74   :  { %v141_v60 = vpop.permute.xlu1 %140  ;;  %v137_v61 = vpop.permute.xlu0 %136 }
  0x75   :  { %v330_v62 = vmax.bf16 %v141_v60, %v1304_v0  ;;  %v328_v63 = vmax.bf16 %v137_v61, %v1309_v1 }
  0x76   :  { %254 = vrot.lane.b32.xlu1 %v67_v58, %s1290_s10  ;;  %252 = vrot.lane.b32.xlu0 %v66_v59, %s1290_s10 }
  0x77   :  { %v415_v43 = vshrl.u32 %v330_v62, 16  ;;  %v418_v44 = vshll.u32 %v330_v62, 16  ;;  %v396_v45 = vshrl.u32 %v328_v63, 16  ;;  %v399_v46 = vshll.u32 %v328_v63, 16 }
  0x78   :  { %v143_v0 = vpop.permute.xlu1 %142  ;;  %v139_v1 = vpop.permute.xlu0 %138 }
  0x79   :  { %v417_v48 = vrot.slane %v415_v43, 4  ;;  %v420_v49 = vrot.slane %v418_v44, 5  ;;  %v398_v50 = vrot.slane %v396_v45, 4  ;;  %v401_v51 = vrot.slane %v399_v46, 5 }
  0x7a   :  { %v1676_v52 = vmax.bf16 %v143_v0, %v1318_v2  ;;  %v1679_v53 = vmax.bf16 %v139_v1, %v1323_v3  ;;  %258 = vrot.lane.b32.xlu1 %v69_v42, %s1290_s10  ;;  %256 = vrot.lane.b32.xlu0 %v68_v47, %s1290_s10 }
  0x7b   :  { %v421_v54 = vor.u32 %v420_v49, %v417_v48  ;;  %v402_v55 = vor.u32 %v401_v51, %v398_v50 }
  0x7c   :  { %v424_v2 = vshll.u32 %v1676_v52, 16  ;;  %v428_v3 = vshrl.u32 %v1676_v52, 16  ;;  %v405_v58 = vshll.u32 %v1679_v53, 16  ;;  %v409_v59 = vshrl.u32 %v1679_v53, 16  ;;  %v147_v60 = vpop.permute.xlu1 %146  ;;  %v145_v61 = vpop.permute.xlu0 %144 }
  0x7d   :  { %v422_v42 = vrot.slane %v421_v54, 4  ;;  %v403_v43 = vrot.slane %v402_v55, 4  ;;  %v1700_v45 = vmax.bf16 %v147_v60, %v1332_v4  ;;  %v332_v46 = vmax.bf16 %v145_v61, %v1337_v5 }
  0x7e   :  { %v426_v47 = vrot.slane %v424_v2, 5  ;;  %v430_v0 = vrot.slane %v428_v3, 4  ;;  %v407_v1 = vrot.slane %v405_v58, 5  ;;  %v411_v48 = vrot.slane %v409_v59, 4  ;;  %262 = vrot.lane.b32.xlu1 %v71_v56, %s1290_s10  ;;  %260 = vrot.lane.b32.xlu0 %v70_v57, %s1290_s10 }
  0x7f   :  { %v443_v49 = vshll.u32 %v1700_v45, 16  ;;  %v447_v50 = vshrl.u32 %v1700_v45, 16  ;;  %v434_v51 = vshrl.u32 %v332_v46, 16  ;;  %v437_v54 = vshll.u32 %v332_v46, 16 }
  0x80   :  { %v427_v4 = vsel %vm1695_vm5, %v422_v42, %v426_v47  ;;  %v431_v55 = vor.u32 %v430_v0, %v426_v47  ;;  %v408_v5 = vsel %vm1695_vm5, %v403_v43, %v407_v1  ;;  %v412_v2 = vor.u32 %v411_v48, %v407_v1  ;;  %v151_v3 = vpop.permute.xlu1 %150  ;;  %v149_v58 = vpop.permute.xlu0 %148  ;;  %v1140_v42 = vld [vmem:[%s2469_s1 + $0xc] sm:$0x7] }
  0x81   :  { %v1069_v59 = vmax.bf16 %v427_v4, %v330_v62  ;;  %v1067_v56 = vmax.bf16 %v408_v5, %v328_v63  ;;  %v445_v60 = vrot.slane %v443_v49, 5  ;;  %v449_v57 = vrot.slane %v447_v50, 4  ;;  %v1136_v62 = vld [vmem:[%s2469_s1 + $0x4] sm:$0x7] }
  0x82   :  { %v432_v61 = vrot.slane %v431_v55, 4  ;;  %v413_v41 = vrot.slane %v412_v2, 4  ;;  %v436_v40 = vrot.slane %v434_v51, 4  ;;  %v439_v39 = vrot.slane %v437_v54, 5 }
  0x83   :  { %1139 = vst.msk [vmem:[%s2469_s1 + $0x8] sm:$0xf] %vm1131_vm2, %v1069_v59  ;;  %1132 = vst.msk [vmem:[%s2469_s1] sm:$0xf] %vm1131_vm2, %v1067_v56  ;;  %v450_v63 = vor.u32 %v449_v57, %v445_v60  ;;  %v335_v43 = vmax.bf16 %v151_v3, %v1346_v6  ;;  %v334_v47 = vmax.bf16 %v149_v58, %v1351_v7  ;;  %v1144_v6 = vld [vmem:[%s2469_s1 + $0x14] sm:$0x7] }
  0x84   :  { %v1070_v0 = vmax.bf16 %v432_v61, %v1676_v52  ;;  %v1068_v1 = vmax.bf16 %v413_v41, %v1679_v53  ;;  %v440_v48 = vor.u32 %v439_v39, %v436_v40  ;;  %v155_v49 = vpop.permute.xlu1 %154  ;;  %v153_v50 = vpop.permute.xlu0 %152 }
  0x85   :  { %v451_v51 = vrot.slane %v450_v63, 4  ;;  %v462_v54 = vshll.u32 %v335_v43, 16  ;;  %v466_v4 = vshrl.u32 %v335_v43, 16  ;;  %v453_v55 = vshrl.u32 %v334_v47, 16 }
  0x86   :  { %v1141_v5 = vsel %vm1713_vm6, %v1070_v0, %v1140_v42  ;;  %v1137_v2 = vsel %vm1713_vm6, %v1068_v1, %v1136_v62  ;;  %v441_v7 = vrot.slane %v440_v48, 4  ;;  %v456_v52 = vshll.u32 %v334_v47, 16 }
  0x87   :  { %1142 = vst [vmem:[%s2469_s1 + $0xc] sm:$0x7] %v1141_v5  ;;  %1138 = vst [vmem:[%s2469_s1 + $0x4] sm:$0x7] %v1137_v2  ;;  %v1072_v39 = vmax.bf16 %v451_v51, %v1700_v45  ;;  %v464_v40 = vrot.slane %v462_v54, 5  ;;  %v468_v41 = vrot.slane %v466_v4, 4  ;;  %v337_v59 = vmax.bf16 %v155_v49, %v1360_v8 }
  0x88   :  { %v455_v53 = vrot.slane %v453_v55, 4  ;;  %v446_v3 = vsel %vm1695_vm5, %v441_v7, %v445_v60  ;;  %v458_v58 = vrot.slane %v456_v52, 5  ;;  %v336_v56 = vmax.bf16 %v153_v50, %v1365_v9  ;;  %v159_v57 = vpop.permute.xlu1 %158  ;;  %v157_v61 = vpop.permute.xlu0 %156 }
  0x89   :  { %v1145_v42 = vsel %vm1713_vm6, %v1072_v39, %v1144_v6  ;;  %v1071_v62 = vmax.bf16 %v446_v3, %v332_v46  ;;  %v469_v63 = vor.u32 %v468_v41, %v464_v40  ;;  %v339_v45 = vmax.bf16 %v159_v57, %v1374_v10  ;;  %v1148_v10 = vld [vmem:[%s2469_s1 + $0x1c] sm:$0x7] }
  0x8a   :  { %1146 = vst [vmem:[%s2469_s1 + $0x14] sm:$0x7] %v1145_v42  ;;  %v459_v0 = vor.u32 %v458_v58, %v455_v53  ;;  %v481_v60 = vshll.u32 %v337_v59, 16  ;;  %v485_v1 = vshrl.u32 %v337_v59, 16  ;;  %v472_v48 = vshrl.u32 %v336_v56, 16 }
  0x8b   :  { %1143 = vst.msk [vmem:[%s2469_s1 + $0x10] sm:$0xf] %vm1131_vm2, %v1071_v62  ;;  %v470_v8 = vrot.slane %v469_v63, 4  ;;  %v475_v9 = vshll.u32 %v336_v56, 16  ;;  %v500_v49 = vshll.u32 %v339_v45, 16  ;;  %v504_v46 = vshrl.u32 %v339_v45, 16 }
  0x8c   :  { %v460_v50 = vrot.slane %v459_v0, 4  ;;  %v483_v51 = vrot.slane %v481_v60, 5  ;;  %v487_v54 = vrot.slane %v485_v1, 4  ;;  %v474_v4 = vrot.slane %v472_v48, 4  ;;  %v163_v55 = vpop.permute.xlu1 %162  ;;  %v161_v5 = vpop.permute.xlu0 %160 }
  0x8d   :  { %v1074_v2 = vmax.bf16 %v470_v8, %v335_v43  ;;  %v477_v6 = vrot.slane %v475_v9, 5  ;;  %v502_v7 = vrot.slane %v500_v49, 5  ;;  %v506_v52 = vrot.slane %v504_v46, 4  ;;  %v1156_v9 = vld [vmem:[%s2469_s1 + $0x2c] sm:$0x7] }
  0x8e   :  { %v465_v39 = vsel %vm1695_vm5, %v460_v50, %v464_v40  ;;  %v488_v41 = vor.u32 %v487_v54, %v483_v51  ;;  %v338_v53 = vmax.bf16 %v157_v61, %v1379_v11  ;;  %v1770_v3 = vmax.bf16 %v163_v55, %v1388_v12  ;;  %v1152_v12 = vld [vmem:[%s2469_s1 + $0x24] sm:$0x7] }
  0x8f   :  { %v1149_v58 = vsel %vm1713_vm6, %v1074_v2, %v1148_v10  ;;  %v1073_v57 = vmax.bf16 %v465_v39, %v334_v47  ;;  %v478_v42 = vor.u32 %v477_v6, %v474_v4  ;;  %v507_v62 = vor.u32 %v506_v52, %v502_v7 }
  0x90   :  { %1150 = vst [vmem:[%s2469_s1 + $0x1c] sm:$0x7] %v1149_v58  ;;  %v489_v43 = vrot.slane %v488_v41, 4  ;;  %v491_v63 = vshrl.u32 %v338_v53, 16  ;;  %v494_v0 = vshll.u32 %v338_v53, 16  ;;  %v519_v40 = vshll.u32 %v1770_v3, 16  ;;  %v167_v60 = vpop.permute.xlu1 %166  ;;  %v165_v11 = vpop.permute.xlu0 %164 }
  0x91   :  { %1147 = vst.msk [vmem:[%s2469_s1 + $0x18] sm:$0xf] %vm1131_vm2, %v1073_v57  ;;  %v479_v47 = vrot.slane %v478_v42, 4  ;;  %v508_v61 = vrot.slane %v507_v62, 4  ;;  %v523_v1 = vshrl.u32 %v1770_v3, 16  ;;  %v340_v48 = vmax.bf16 %v161_v5, %v1393_v13 }
  0x92   :  { %v1076_v8 = vmax.bf16 %v489_v43, %v337_v59  ;;  %v493_v49 = vrot.slane %v491_v63, 4  ;;  %v496_v46 = vrot.slane %v494_v0, 5  ;;  %v521_v10 = vrot.slane %v519_v40, 5  ;;  %v1160_v40 = vld [vmem:[%s2469_s1 + $0x34] sm:$0x7] }
  0x93   :  { %v484_v50 = vsel %vm1695_vm5, %v479_v47, %v483_v51  ;;  %v1078_v54 = vmax.bf16 %v508_v61, %v339_v45  ;;  %v525_v4 = vrot.slane %v523_v1, 4  ;;  %v510_v55 = vshrl.u32 %v340_v48, 16 }
  0x94   :  { %v1153_v2 = vsel %vm1713_vm6, %v1076_v8, %v1152_v12  ;;  %v1075_v6 = vmax.bf16 %v484_v50, %v336_v56  ;;  %v497_v52 = vor.u32 %v496_v46, %v493_v49  ;;  %v513_v13 = vshll.u32 %v340_v48, 16  ;;  %v171_v59 = vpop.permute.xlu1 %170  ;;  %v169_v5 = vpop.permute.xlu0 %168 }
  0x95   :  { %1154 = vst [vmem:[%s2469_s1 + $0x24] sm:$0x7] %v1153_v2  ;;  %v1157_v39 = vsel %vm1713_vm6, %v1078_v54, %v1156_v9  ;;  %v526_v41 = vor.u32 %v525_v4, %v521_v10  ;;  %v512_v51 = vrot.slane %v510_v55, 4  ;;  %v343_v45 = vmax.bf16 %v167_v60, %v1402_v14 }
  0x96   :  { %1151 = vst.msk [vmem:[%s2469_s1 + $0x20] sm:$0xf] %vm1131_vm2, %v1075_v6  ;;  %1158 = vst [vmem:[%s2469_s1 + $0x2c] sm:$0x7] %v1157_v39  ;;  %v498_v56 = vrot.slane %v497_v52, 4  ;;  %v515_v58 = vrot.slane %v513_v13, 5  ;;  %v342_v57 = vmax.bf16 %v165_v11, %v1407_v15  ;;  %v1809_v42 = vmax.bf16 %v171_v59, %v1416_v16 }
  0x97   :  { %v527_v62 = vrot.slane %v526_v41, 4  ;;  %v538_v43 = vshll.u32 %v343_v45, 16  ;;  %v542_v63 = vshrl.u32 %v343_v45, 16  ;;  %v1812_v14 = vmax.bf16 %v169_v5, %v1421_v17  ;;  %v1164_v41 = vld [vmem:[%s2469_s1 + $0x3c] sm:$0x7] }
  0x98   :  { %v503_v0 = vsel %vm1695_vm5, %v498_v56, %v502_v7  ;;  %v516_v60 = vor.u32 %v515_v58, %v512_v51  ;;  %v529_v12 = vshrl.u32 %v342_v57, 16  ;;  %v532_v47 = vshll.u32 %v342_v57, 16  ;;  %v175_v15 = vpop.permute.xlu1 %174  ;;  %v173_v11 = vpop.permute.xlu0 %172 }
  0x99   :  { %v1077_v16 = vmax.bf16 %v503_v0, %v338_v53  ;;  %v1080_v61 = vmax.bf16 %v527_v62, %v1770_v3  ;;  %v540_v1 = vrot.slane %v538_v43, 5  ;;  %v544_v8 = vrot.slane %v542_v63, 4 }
  0x9a   :  { %v517_v9 = vrot.slane %v516_v60, 4  ;;  %v531_v17 = vrot.slane %v529_v12, 4  ;;  %v534_v49 = vrot.slane %v532_v47, 5  ;;  %v557_v46 = vshll.u32 %v1809_v42, 16 }
  0x9b   :  { %1155 = vst.msk [vmem:[%s2469_s1 + $0x28] sm:$0xf] %vm1131_vm2, %v1077_v16  ;;  %v1161_v7 = vsel %vm1713_vm6, %v1080_v61, %v1160_v40  ;;  %v545_v50 = vor.u32 %v544_v8, %v540_v1  ;;  %v561_v53 = vshrl.u32 %v1809_v42, 16  ;;  %v548_v3 = vshrl.u32 %v1812_v14, 16 }
  0x9c   :  { %1162 = vst [vmem:[%s2469_s1 + $0x34] sm:$0x7] %v1161_v7  ;;  %v522_v54 = vsel %vm1695_vm5, %v517_v9, %v521_v10  ;;  %v535_v4 = vor.u32 %v534_v49, %v531_v17  ;;  %v559_v55 = vrot.slane %v557_v46, 5  ;;  %v551_v2 = vshll.u32 %v1812_v14, 16  ;;  %v179_v6 = vpop.permute.xlu1 %178  ;;  %v177_v52 = vpop.permute.xlu0 %176 }
  0x9d   :  { %v1079_v13 = vmax.bf16 %v522_v54, %v340_v48  ;;  %v546_v59 = vrot.slane %v545_v50, 4  ;;  %v563_v5 = vrot.slane %v561_v53, 4  ;;  %v550_v39 = vrot.slane %v548_v3, 4 }
  0x9e   :  { %v536_v51 = vrot.slane %v535_v4, 4  ;;  %v553_v56 = vrot.slane %v551_v2, 5  ;;  %v347_v58 = vmax.bf16 %v175_v15, %v1430_v18  ;;  %v1840_v10 = vmax.bf16 %v173_v11, %v1435_v19 }
  0x9f   :  { %1159 = vst.msk [vmem:[%s2469_s1 + $0x30] sm:$0xf] %vm1131_vm2, %v1079_v13  ;;  %v1082_v48 = vmax.bf16 %v546_v59, %v343_v45  ;;  %v564_v62 = vor.u32 %v563_v5, %v559_v55  ;;  %v1847_v43 = vmax.bf16 %v179_v6, %v1444_v20  ;;  %v1850_v63 = vmax.bf16 %v177_v52, %v1449_v21  ;;  %v1168_v20 = vld [vmem:[%s2469_s1 + $0x44] sm:$0x7] }
  0xa0   :  { %v541_v0 = vsel %vm1695_vm5, %v536_v51, %v540_v1  ;;  %v554_v18 = vor.u32 %v553_v56, %v550_v39  ;;  %v576_v40 = vshll.u32 %v347_v58, 16  ;;  %v580_v19 = vshrl.u32 %v347_v58, 16  ;;  %v183_v60 = vpop.permute.xlu1 %182  ;;  %v181_v12 = vpop.permute.xlu0 %180 }
  0xa1   :  { %v1165_v47 = vsel %vm1713_vm6, %v1082_v48, %v1164_v41  ;;  %v1081_v15 = vmax.bf16 %v541_v0, %v342_v57  ;;  %v565_v45 = vrot.slane %v564_v62, 4  ;;  %v567_v11 = vshrl.u32 %v1840_v10, 16 }
  0xa2   :  { %1166 = vst [vmem:[%s2469_s1 + $0x3c] sm:$0x7] %v1165_v47  ;;  %v555_v21 = vrot.slane %v554_v18, 4  ;;  %v578_v16 = vrot.slane %v576_v40, 5  ;;  %v582_v61 = vrot.slane %v580_v19, 4  ;;  %v570_v1 = vshll.u32 %v1840_v10, 16 }
  0xa3   :  { %1163 = vst.msk [vmem:[%s2469_s1 + $0x38] sm:$0xf] %vm1131_vm2, %v1081_v15  ;;  %v1084_v57 = vmax.bf16 %v565_v45, %v1809_v42  ;;  %v569_v8 = vrot.slane %v567_v11, 4  ;;  %v595_v9 = vshll.u32 %v1847_v43, 16  ;;  %v599_v17 = vshrl.u32 %v1847_v43, 16 }
  0xa4   :  { %v560_v49 = vsel %vm1695_vm5, %v555_v21, %v559_v55  ;;  %v583_v46 = vor.u32 %v582_v61, %v578_v16  ;;  %v572_v7 = vrot.slane %v570_v1, 5  ;;  %v586_v50 = vshrl.u32 %v1850_v63, 16  ;;  %v187_v53 = vpop.permute.xlu1 %186  ;;  %v185_v3 = vpop.permute.xlu0 %184 }
  0xa5   :  { %v1169_v54 = vsel %vm1713_vm6, %v1084_v57, %v1168_v20  ;;  %v1083_v4 = vmax.bf16 %v560_v49, %v1812_v14  ;;  %v597_v42 = vrot.slane %v595_v9, 5  ;;  %v601_v2 = vrot.slane %v599_v17, 4  ;;  %v1172_v14 = vld [vmem:[%s2469_s1 + $0x4c] sm:$0x7] }
  0xa6   :  { %1170 = vst [vmem:[%s2469_s1 + $0x44] sm:$0x7] %v1169_v54  ;;  %v584_v6 = vrot.slane %v583_v46, 4  ;;  %v573_v52 = vor.u32 %v572_v7, %v569_v8  ;;  %v588_v55 = vrot.slane %v586_v50, 4  ;;  %v589_v13 = vshll.u32 %v1850_v63, 16 }
  0xa7   :  { %1167 = vst.msk [vmem:[%s2469_s1 + $0x40] sm:$0xf] %vm1131_vm2, %v1083_v4  ;;  %v602_v59 = vor.u32 %v601_v2, %v597_v42  ;;  %v351_v5 = vmax.bf16 %v183_v60, %v1458_v22  ;;  %v350_v39 = vmax.bf16 %v181_v12, %v1463_v23  ;;  %v1891_v41 = vmax.bf16 %v187_v53, %v1472_v24  ;;  %v1176_v24 = vld [vmem:[%s2469_s1 + $0x54] sm:$0x7]  ;;  %v1180_v4 = vld [vmem:[%s2469_s1 + $0x5c] sm:$0x7] }
  0xa8   :  { %v1086_v51 = vmax.bf16 %v584_v6, %v347_v58  ;;  %v574_v56 = vrot.slane %v573_v52, 4  ;;  %v591_v48 = vrot.slane %v589_v13, 5  ;;  %v1894_v62 = vmax.bf16 %v185_v3, %v1477_v25  ;;  %v191_v0 = vpop.permute.xlu1 %190  ;;  %v189_v18 = vpop.permute.xlu0 %188 }
  0xa9   :  { %v603_v40 = vrot.slane %v602_v59, 4  ;;  %v614_v19 = vshll.u32 %v351_v5, 16  ;;  %v618_v47 = vshrl.u32 %v351_v5, 16  ;;  %v605_v15 = vshrl.u32 %v350_v39, 16 }
  0xaa   :  { %v1173_v22 = vsel %vm1713_vm6, %v1086_v51, %v1172_v14  ;;  %v579_v23 = vsel %vm1695_vm5, %v574_v56, %v578_v16  ;;  %v592_v58 = vor.u32 %v591_v48, %v588_v55  ;;  %v608_v60 = vshll.u32 %v350_v39, 16 }
  0xab   :  { %1174 = vst [vmem:[%s2469_s1 + $0x4c] sm:$0x7] %v1173_v22  ;;  %v1085_v25 = vmax.bf16 %v579_v23, %v1840_v10  ;;  %v1088_v12 = vmax.bf16 %v603_v40, %v1847_v43  ;;  %v616_v45 = vrot.slane %v614_v19, 5  ;;  %v620_v11 = vrot.slane %v618_v47, 4 }
  0xac   :  { %v593_v20 = vrot.slane %v592_v58, 4  ;;  %v607_v21 = vrot.slane %v605_v15, 4  ;;  %v610_v61 = vrot.slane %v608_v60, 5  ;;  %v633_v16 = vshll.u32 %v1891_v41, 16  ;;  %v195_v1 = vpop.permute.xlu1 %194  ;;  %v193_v57 = vpop.permute.xlu0 %192 }
  0xad   :  { %1171 = vst.msk [vmem:[%s2469_s1 + $0x48] sm:$0xf] %vm1131_vm2, %v1085_v25  ;;  %v1177_v8 = vsel %vm1713_vm6, %v1088_v12, %v1176_v24  ;;  %v621_v10 = vor.u32 %v620_v11, %v616_v45  ;;  %v637_v43 = vshrl.u32 %v1891_v41, 16  ;;  %v624_v9 = vshrl.u32 %v1894_v62, 16 }
  0xae   :  { %1178 = vst [vmem:[%s2469_s1 + $0x54] sm:$0x7] %v1177_v8  ;;  %v598_v17 = vsel %vm1695_vm5, %v593_v20, %v597_v42  ;;  %v611_v49 = vor.u32 %v610_v61, %v607_v21  ;;  %v635_v46 = vrot.slane %v633_v16, 5  ;;  %v627_v7 = vshll.u32 %v1894_v62, 16 }
  0xaf   :  { %v1087_v50 = vmax.bf16 %v598_v17, %v1850_v63  ;;  %v622_v53 = vrot.slane %v621_v10, 4  ;;  %v639_v3 = vrot.slane %v637_v43, 4  ;;  %v626_v54 = vrot.slane %v624_v9, 4 }
  0xb0   :  { %v612_v2 = vrot.slane %v611_v49, 4  ;;  %v629_v6 = vrot.slane %v627_v7, 5  ;;  %v355_v52 = vmax.bf16 %v191_v0, %v1486_v26  ;;  %v1929_v55 = vmax.bf16 %v189_v18, %v1491_v27  ;;  %v199_v42 = vpop.permute.xlu1 %198  ;;  %v197_v13 = vpop.permute.xlu0 %196 }
  0xb1   :  { %1175 = vst.msk [vmem:[%s2469_s1 + $0x50] sm:$0xf] %vm1131_vm2, %v1087_v50  ;;  %v1090_v63 = vmax.bf16 %v622_v53, %v351_v5  ;;  %v640_v14 = vor.u32 %v639_v3, %v635_v46  ;;  %v1936_v59 = vmax.bf16 %v195_v1, %v1500_v28  ;;  %v1939_v51 = vmax.bf16 %v193_v57, %v1505_v29  ;;  %v1184_v28 = vld [vmem:[%s2469_s1 + $0x64] sm:$0x7] }
  0xb2   :  { %v617_v26 = vsel %vm1695_vm5, %v612_v2, %v616_v45  ;;  %v630_v27 = vor.u32 %v629_v6, %v626_v54  ;;  %v652_v56 = vshll.u32 %v355_v52, 16  ;;  %v656_v48 = vshrl.u32 %v355_v52, 16 }
  0xb3   :  { %v1181_v0 = vsel %vm1713_vm6, %v1090_v63, %v1180_v4  ;;  %v1089_v18 = vmax.bf16 %v617_v26, %v350_v39  ;;  %v641_v40 = vrot.slane %v640_v14, 4  ;;  %v643_v5 = vshrl.u32 %v1929_v55, 16 }
  0xb4   :  { %1182 = vst [vmem:[%s2469_s1 + $0x5c] sm:$0x7] %v1181_v0  ;;  %v631_v29 = vrot.slane %v630_v27, 4  ;;  %v654_v19 = vrot.slane %v652_v56, 5  ;;  %v658_v47 = vrot.slane %v656_v48, 4  ;;  %v646_v15 = vshll.u32 %v1929_v55, 16  ;;  %v203_v22 = vpop.permute.xlu1 %202  ;;  %v201_v23 = vpop.permute.xlu0 %200 }
  0xb5   :  { %1179 = vst.msk [vmem:[%s2469_s1 + $0x58] sm:$0xf] %vm1131_vm2, %v1089_v18  ;;  %v1092_v39 = vmax.bf16 %v641_v40, %v1891_v41  ;;  %v645_v24 = vrot.slane %v643_v5, 4  ;;  %v671_v58 = vshll.u32 %v1936_v59, 16  ;;  %v675_v60 = vshrl.u32 %v1936_v59, 16 }
  0xb6   :  { %v636_v25 = vsel %vm1695_vm5, %v631_v29, %v635_v46  ;;  %v659_v12 = vor.u32 %v658_v47, %v654_v19  ;;  %v648_v45 = vrot.slane %v646_v15, 5  ;;  %v662_v11 = vshrl.u32 %v1939_v51, 16 }
  0xb7   :  { %v1185_v20 = vsel %vm1713_vm6, %v1092_v39, %v1184_v28  ;;  %v1091_v21 = vmax.bf16 %v636_v25, %v1894_v62  ;;  %v673_v61 = vrot.slane %v671_v58, 5  ;;  %v677_v16 = vrot.slane %v675_v60, 4  ;;  %v1188_v62 = vld [vmem:[%s2469_s1 + $0x6c] sm:$0x7]  ;;  %v1196_v60 = vld [vmem:[%s2469_s1 + $0x7c] sm:$0x7] }
  0xb8   :  { %1186 = vst [vmem:[%s2469_s1 + $0x64] sm:$0x7] %v1185_v20  ;;  %v660_v41 = vrot.slane %v659_v12, 4  ;;  %v649_v1 = vor.u32 %v648_v45, %v645_v24  ;;  %v664_v57 = vrot.slane %v662_v11, 4  ;;  %v665_v8 = vshll.u32 %v1939_v51, 16  ;;  %v207_v10 = vpop.permute.xlu1 %206  ;;  %v205_v43 = vpop.permute.xlu0 %204 }
  0xb9   :  { %1183 = vst.msk [vmem:[%s2469_s1 + $0x60] sm:$0xf] %vm1131_vm2, %v1091_v21  ;;  %v678_v9 = vor.u32 %v677_v16, %v673_v61  ;;  %v359_v17 = vmax.bf16 %v199_v42, %v1514_v30  ;;  %v358_v49 = vmax.bf16 %v197_v13, %v1519_v31  ;;  %v1980_v46 = vmax.bf16 %v203_v22, %v1528_v32  ;;  %v1192_v31 = vld [vmem:[%s2469_s1 + $0x74] sm:$0x7] }
  0xba   :  { %v1094_v7 = vmax.bf16 %v660_v41, %v355_v52  ;;  %v650_v50 = vrot.slane %v649_v1, 4  ;;  %v667_v53 = vrot.slane %v665_v8, 5  ;;  %v1983_v3 = vmax.bf16 %v201_v23, %v1533_v33 }
  0xbb   :  { %v679_v54 = vrot.slane %v678_v9, 4  ;;  %v690_v4 = vshll.u32 %v359_v17, 16  ;;  %v694_v2 = vshrl.u32 %v359_v17, 16  ;;  %v681_v6 = vshrl.u32 %v358_v49, 16 }
  0xbc   :  { %v1189_v63 = vsel %vm1713_vm6, %v1094_v7, %v1188_v62  ;;  %v655_v30 = vsel %vm1695_vm5, %v650_v50, %v654_v19  ;;  %v668_v32 = vor.u32 %v667_v53, %v664_v57  ;;  %v684_v52 = vshll.u32 %v358_v49, 16  ;;  %v211_v42 = vpop.permute.xlu1 %210  ;;  %v209_v13 = vpop.permute.xlu0 %208 }
  0xbd   :  { %1190 = vst [vmem:[%s2469_s1 + $0x6c] sm:$0x7] %v1189_v63  ;;  %v1093_v33 = vmax.bf16 %v655_v30, %v1929_v55  ;;  %v1096_v14 = vmax.bf16 %v679_v54, %v1936_v59  ;;  %v692_v26 = vrot.slane %v690_v4, 5  ;;  %v696_v27 = vrot.slane %v694_v2, 4 }
  0xbe   :  { %v669_v56 = vrot.slane %v668_v32, 4  ;;  %v683_v48 = vrot.slane %v681_v6, 4  ;;  %v686_v0 = vrot.slane %v684_v52, 5  ;;  %v709_v18 = vshll.u32 %v1980_v46, 16 }
  0xbf   :  { %1187 = vst.msk [vmem:[%s2469_s1 + $0x68] sm:$0xf] %vm1131_vm2, %v1093_v33  ;;  %v1193_v40 = vsel %vm1713_vm6, %v1096_v14, %v1192_v31  ;;  %v697_v5 = vor.u32 %v696_v27, %v692_v26  ;;  %v713_v55 = vshrl.u32 %v1980_v46, 16  ;;  %v700_v59 = vshrl.u32 %v1983_v3, 16 }
  0xc0   :  { %1194 = vst [vmem:[%s2469_s1 + $0x74] sm:$0x7] %v1193_v40  ;;  %v674_v28 = vsel %vm1695_vm5, %v669_v56, %v673_v61  ;;  %v687_v29 = vor.u32 %v686_v0, %v683_v48  ;;  %v711_v19 = vrot.slane %v709_v18, 5  ;;  %v703_v47 = vshll.u32 %v1983_v3, 16  ;;  %v215_v15 = vpop.permute.xlu1 %214  ;;  %v213_v22 = vpop.permute.xlu0 %212  ;;  %v2482_v56 = vld [vmem:[#allocation2_spill] sm:$0xff]  ;;  %v2483_v0 = vld [vmem:[#allocation3_spill] sm:$0xff] }
  0xc1   :  { %v1095_v23 = vmax.bf16 %v674_v28, %v1939_v51  ;;  %v698_v39 = vrot.slane %v697_v5, 4  ;;  %v715_v24 = vrot.slane %v713_v55, 4  ;;  %v702_v58 = vrot.slane %v700_v59, 4  ;;  %v2484_v40 = vld [vmem:[#allocation4_spill] sm:$0xff] }
  0xc2   :  { %v688_v25 = vrot.slane %v687_v29, 4  ;;  %v705_v12 = vrot.slane %v703_v47, 5  ;;  %v363_v45 = vmax.bf16 %v207_v10, %v1542_v34  ;;  %v2018_v11 = vmax.bf16 %v205_v43, %v1547_v35  ;;  %v2485_v29 = vld [vmem:[#allocation5_spill] sm:$0xff] }
  0xc3   :  { %1191 = vst.msk [vmem:[%s2469_s1 + $0x70] sm:$0xf] %vm1131_vm2, %v1095_v23  ;;  %v1098_v51 = vmax.bf16 %v698_v39, %v359_v17  ;;  %v716_v20 = vor.u32 %v715_v24, %v711_v19  ;;  %v2025_v21 = vmax.bf16 %v211_v42, %v1556_v36  ;;  %v2028_v61 = vmax.bf16 %v209_v13, %v1561_v37  ;;  %v1200_v36 = vld [vmem:[%s2469_s1 + $0x84] sm:$0x7] }
  0xc4   :  { %v693_v16 = vsel %vm1695_vm5, %v688_v25, %v692_v26  ;;  %v706_v34 = vor.u32 %v705_v12, %v702_v58  ;;  %v728_v41 = vshll.u32 %v363_v45, 16  ;;  %v732_v35 = vshrl.u32 %v363_v45, 16  ;;  %v219_v1 = vpop.permute.xlu1 %218  ;;  %v217_v57 = vpop.permute.xlu0 %216  ;;  %v1208_v25 = vld [vmem:[%s2469_s1 + $0x94] sm:$0x7] }
  0xc5   :  { %v1197_v8 = vsel %vm1713_vm6, %v1098_v51, %v1196_v60  ;;  %v1097_v10 = vmax.bf16 %v693_v16, %v358_v49  ;;  %v717_v43 = vrot.slane %v716_v20, 4  ;;  %v719_v62 = vshrl.u32 %v2018_v11, 16 }
  0xc6   :  { %1198 = vst [vmem:[%s2469_s1 + $0x7c] sm:$0x7] %v1197_v8  ;;  %v707_v37 = vrot.slane %v706_v34, 4  ;;  %v730_v9 = vrot.slane %v728_v41, 5  ;;  %v734_v17 = vrot.slane %v732_v35, 4  ;;  %v722_v7 = vshll.u32 %v2018_v11, 16 }
  0xc7   :  { %1195 = vst.msk [vmem:[%s2469_s1 + $0x78] sm:$0xf] %vm1131_vm2, %v1097_v10  ;;  %v1100_v49 = vmax.bf16 %v717_v43, %v1980_v46  ;;  %v721_v50 = vrot.slane %v719_v62, 4  ;;  %v747_v53 = vshll.u32 %v2025_v21, 16  ;;  %v751_v54 = vshrl.u32 %v2025_v21, 16 }
  0xc8   :  { %v712_v4 = vsel %vm1695_vm5, %v707_v37, %v711_v19  ;;  %v735_v2 = vor.u32 %v734_v17, %v730_v9  ;;  %v724_v6 = vrot.slane %v722_v7, 5  ;;  %v738_v63 = vshrl.u32 %v2028_v61, 16  ;;  %v223_v30 = vpop.permute.xlu1 %222  ;;  %v221_v31 = vpop.permute.xlu0 %220 }
  0xc9   :  { %v1201_v32 = vsel %vm1713_vm6, %v1100_v49, %v1200_v36  ;;  %v1099_v52 = vmax.bf16 %v712_v4, %v1983_v3  ;;  %v749_v46 = vrot.slane %v747_v53, 5  ;;  %v753_v42 = vrot.slane %v751_v54, 4  ;;  %v1204_v3 = vld [vmem:[%s2469_s1 + $0x8c] sm:$0x7]  ;;  %v1212_v54 = vld [vmem:[%s2469_s1 + $0x9c] sm:$0x7] }
  0xca   :  { %1202 = vst [vmem:[%s2469_s1 + $0x84] sm:$0x7] %v1201_v32  ;;  %v736_v13 = vrot.slane %v735_v2, 4  ;;  %v725_v33 = vor.u32 %v724_v6, %v721_v50  ;;  %v740_v14 = vrot.slane %v738_v63, 4  ;;  %v741_v26 = vshll.u32 %v2028_v61, 16 }
  0xcb   :  { %1199 = vst.msk [vmem:[%s2469_s1 + $0x80] sm:$0xf] %vm1131_vm2, %v1099_v52  ;;  %v754_v27 = vor.u32 %v753_v42, %v749_v46  ;;  %v2067_v48 = vmax.bf16 %v215_v15, %v2482_v56  ;;  %v2070_v18 = vmax.bf16 %v213_v22, %v2483_v0  ;;  %v2073_v5 = vmax.bf16 %v219_v1, %v2484_v40  ;;  %v1268_v6 = vld [vmem:[%s2468_s0 + $0xac] sm:$0x7]  ;;  %v1269_v32 = vld [vmem:[%s2468_s0 + $0xa8] sm:$0xf] }
  0xcc   :  { %v1102_v55 = vmax.bf16 %v736_v13, %v363_v45  ;;  %v726_v59 = vrot.slane %v725_v33, 4  ;;  %v743_v28 = vrot.slane %v741_v26, 5  ;;  %v2076_v19 = vmax.bf16 %v217_v57, %v2485_v29  ;;  %v227_v47 = vpop.permute.xlu1 %226  ;;  %v225_v23 = vpop.permute.xlu0 %224 }
  0xcd   :  { %v755_v39 = vrot.slane %v754_v27, 4  ;;  %v766_v24 = vshll.u32 %v2067_v48, 16  ;;  %v770_v15 = vshrl.u32 %v2067_v48, 16  ;;  %v757_v58 = vshrl.u32 %v2070_v18, 16 }
  0xce   :  { %v1205_v22 = vsel %vm1713_vm6, %v1102_v55, %v1204_v3  ;;  %v731_v60 = vsel %vm1695_vm5, %v726_v59, %v730_v9  ;;  %v744_v12 = vor.u32 %v743_v28, %v740_v14  ;;  %v760_v45 = vshll.u32 %v2070_v18, 16  ;;  %v1216_v59 = vld [vmem:[%s2469_s1 + $0xa4] sm:$0x7] }
  0xcf   :  { %1206 = vst [vmem:[%s2469_s1 + $0x8c] sm:$0x7] %v1205_v22  ;;  %v1101_v51 = vmax.bf16 %v731_v60, %v2018_v11  ;;  %v1104_v20 = vmax.bf16 %v755_v39, %v2025_v21  ;;  %v768_v16 = vrot.slane %v766_v24, 5  ;;  %v772_v34 = vrot.slane %v770_v15, 4 }
  0xd0   :  { %v745_v41 = vrot.slane %v744_v12, 4  ;;  %v759_v35 = vrot.slane %v757_v58, 4  ;;  %v762_v1 = vrot.slane %v760_v45, 5  ;;  %v785_v57 = vshll.u32 %v2073_v5, 16  ;;  %v2095_v8 = vpop.permute.xlu1 %230  ;;  %v2097_v10 = vpop.permute.xlu0 %228 }
  0xd1   :  { %1203 = vst.msk [vmem:[%s2469_s1 + $0x88] sm:$0xf] %vm1131_vm2, %v1101_v51  ;;  %v1209_v11 = vsel %vm1713_vm6, %v1104_v20, %v1208_v25  ;;  %v773_v21 = vor.u32 %v772_v34, %v768_v16  ;;  %v789_v43 = vshrl.u32 %v2073_v5, 16  ;;  %v776_v62 = vshrl.u32 %v2076_v19, 16 }
  0xd2   :  { %1210 = vst [vmem:[%s2469_s1 + $0x94] sm:$0x7] %v1209_v11  ;;  %v750_v36 = vsel %vm1695_vm5, %v745_v41, %v749_v46  ;;  %v763_v37 = vor.u32 %v762_v1, %v759_v35  ;;  %v787_v9 = vrot.slane %v785_v57, 5  ;;  %v779_v17 = vshll.u32 %v2076_v19, 16  ;;  %v1272_v11 = vld [vmem:[%s2468_s0 + $0xbc] sm:$0x7] }
  0xd3   :  { %v1103_v7 = vmax.bf16 %v750_v36, %v2028_v61  ;;  %v774_v49 = vrot.slane %v773_v21, 4  ;;  %v791_v50 = vrot.slane %v789_v43, 4  ;;  %v778_v53 = vrot.slane %v776_v62, 4  ;;  %v1273_v43 = vld [vmem:[%s2468_s0 + $0xb8] sm:$0xf] }
  0xd4   :  { %v764_v4 = vrot.slane %v763_v37, 4  ;;  %v781_v2 = vrot.slane %v779_v17, 5  ;;  %v2120_v63 = vmax.bf16 %v1268_v6, %v223_v30  ;;  %v2125_v61 = vmax.bf16 %v1269_v32, %v221_v31  ;;  %v235_v52 = vpop.permute.xlu1 %234  ;;  %v233_v46 = vpop.permute.xlu0 %232  ;;  %v1270_v30 = vld [vmem:[%s2468_s0 + $0xb4] sm:$0x7]  ;;  %v1271_v31 = vld [vmem:[%s2468_s0 + $0xb0] sm:$0xf] }
  0xd5   :  { %1207 = vst.msk [vmem:[%s2469_s1 + $0x90] sm:$0xf] %vm1131_vm2, %v1103_v7  ;;  %v1106_v42 = vmax.bf16 %v774_v49, %v2067_v48  ;;  %v792_v13 = vor.u32 %v791_v50, %v787_v9  ;;  %v2135_v33 = vmax.bf16 %v1270_v30, %v227_v47  ;;  %v2140_v14 = vmax.bf16 %v1271_v31, %v225_v23  ;;  %v1274_v36 = vld [vmem:[%s2468_s0 + $0xc4] sm:$0x7]  ;;  %v1224_v32 = vld [vmem:[%s2469_s1 + $0xb4] sm:$0x7] }
  0xd6   :  { %v769_v26 = vsel %vm1695_vm5, %v764_v4, %v768_v16  ;;  %v782_v3 = vor.u32 %v781_v2, %v778_v53  ;;  %v804_v27 = vshll.u32 %v2120_v63, 16  ;;  %v808_v56 = vshrl.u32 %v2120_v63, 16 }
  0xd7   :  { %v1213_v48 = vsel %vm1713_vm6, %v1106_v42, %v1212_v54  ;;  %v1105_v0 = vmax.bf16 %v769_v26, %v2070_v18  ;;  %v793_v40 = vrot.slane %v792_v13, 4  ;;  %v795_v55 = vshrl.u32 %v2125_v61, 16 }
  0xd8   :  { %1214 = vst [vmem:[%s2469_s1 + $0x9c] sm:$0x7] %v1213_v48  ;;  %v783_v28 = vrot.slane %v782_v3, 4  ;;  %v806_v29 = vrot.slane %v804_v27, 5  ;;  %v810_v47 = vrot.slane %v808_v56, 4  ;;  %v798_v23 = vshll.u32 %v2125_v61, 16  ;;  %v2157_v39 = vpop.permute.xlu1 %238  ;;  %v2159_v24 = vpop.permute.xlu0 %236 }
  0xd9   :  { %1211 = vst.msk [vmem:[%s2469_s1 + $0x98] sm:$0xf] %vm1131_vm2, %v1105_v0  ;;  %v1108_v18 = vmax.bf16 %v793_v40, %v2073_v5  ;;  %v797_v15 = vrot.slane %v795_v55, 4  ;;  %v823_v58 = vshll.u32 %v2135_v33, 16  ;;  %v827_v22 = vshrl.u32 %v2135_v33, 16 }
  0xda   :  { %v788_v60 = vsel %vm1695_vm5, %v783_v28, %v787_v9  ;;  %v811_v25 = vor.u32 %v810_v47, %v806_v29  ;;  %v800_v12 = vrot.slane %v798_v23, 5  ;;  %v814_v45 = vshrl.u32 %v2140_v14, 16 }
  0xdb   :  { %v1217_v51 = vsel %vm1713_vm6, %v1108_v18, %v1216_v59  ;;  %v1107_v20 = vmax.bf16 %v788_v60, %v2076_v19  ;;  %v825_v16 = vrot.slane %v823_v58, 5  ;;  %v829_v34 = vrot.slane %v827_v22, 4  ;;  %v1220_v19 = vld [vmem:[%s2469_s1 + $0xac] sm:$0x7]  ;;  %v1228_v22 = vld [vmem:[%s2469_s1 + $0xbc] sm:$0x7] }
  0xdc   :  { %1218 = vst [vmem:[%s2469_s1 + $0xa4] sm:$0x7] %v1217_v51  ;;  %v812_v5 = vrot.slane %v811_v25, 4  ;;  %v801_v41 = vor.u32 %v800_v12, %v797_v15  ;;  %v816_v35 = vrot.slane %v814_v45, 4  ;;  %v817_v1 = vshll.u32 %v2140_v14, 16  ;;  %v243_v50 = vpop.permute.xlu1 %242  ;;  %v241_v53 = vpop.permute.xlu0 %240 }
  0xdd   :  { %1215 = vst.msk [vmem:[%s2469_s1 + $0xa0] sm:$0xf] %vm1131_vm2, %v1107_v20  ;;  %v830_v57 = vor.u32 %v829_v34, %v825_v16  ;;  %v2189_v21 = vmax.bf16 %v1272_v11, %v2095_v8  ;;  %v2195_v62 = vmax.bf16 %v1273_v43, %v2097_v10  ;;  %v2200_v37 = vmax.bf16 %v1274_v36, %v235_v52  ;;  %v1275_v8 = vld [vmem:[%s2468_s0 + $0xc0] sm:$0xf]  ;;  %v1276_v12 = vld [vmem:[%s2468_s0 + $0xcc] sm:$0x7] }
  0xde   :  { %v1110_v9 = vmax.bf16 %v812_v5, %v2120_v63  ;;  %v802_v17 = vrot.slane %v801_v41, 4  ;;  %v819_v7 = vrot.slane %v817_v1, 5  ;;  %v2206_v49 = vmax.bf16 %v1275_v8, %v233_v46  ;;  %v1279_v5 = vld [vmem:[%s2468_s0 + $0xd0] sm:$0xf]  ;;  %v1232_v36 = vld [vmem:[%s2469_s1 + $0xc4] sm:$0x7] }
  0xdf   :  { %v831_v10 = vrot.slane %v830_v57, 4  ;;  %v842_v54 = vshll.u32 %v2189_v21, 16  ;;  %v846_v4 = vshrl.u32 %v2189_v21, 16  ;;  %v833_v2 = vshrl.u32 %v2195_v62, 16 }
  0xe0   :  { %v1221_v6 = vsel %vm1713_vm6, %v1110_v9, %v1220_v19  ;;  %v807_v63 = vsel %vm1695_vm5, %v802_v17, %v806_v29  ;;  %v820_v52 = vor.u32 %v819_v7, %v816_v35  ;;  %v836_v46 = vshll.u32 %v2195_v62, 16  ;;  %v247_v29 = vpop.permute.xlu1 %246  ;;  %v245_v47 = vpop.permute.xlu0 %244 }
  0xe1   :  { %1222 = vst [vmem:[%s2469_s1 + $0xac] sm:$0x7] %v1221_v6  ;;  %v1109_v42 = vmax.bf16 %v807_v63, %v2125_v61  ;;  %v1112_v13 = vmax.bf16 %v831_v10, %v2135_v33  ;;  %v844_v30 = vrot.slane %v842_v54, 5  ;;  %v848_v31 = vrot.slane %v846_v4, 4 }
  0xe2   :  { %v821_v26 = vrot.slane %v820_v52, 4  ;;  %v835_v3 = vrot.slane %v833_v2, 4  ;;  %v838_v27 = vrot.slane %v836_v46, 5  ;;  %v861_v56 = vshll.u32 %v2200_v37, 16 }
  0xe3   :  { %1219 = vst.msk [vmem:[%s2469_s1 + $0xa8] sm:$0xf] %vm1131_vm2, %v1109_v42  ;;  %v1225_v48 = vsel %vm1713_vm6, %v1112_v13, %v1224_v32  ;;  %v849_v0 = vor.u32 %v848_v31, %v844_v30  ;;  %v865_v61 = vshrl.u32 %v2200_v37, 16  ;;  %v852_v33 = vshrl.u32 %v2206_v49, 16 }
  0xe4   :  { %1226 = vst [vmem:[%s2469_s1 + $0xb4] sm:$0x7] %v1225_v48  ;;  %v826_v40 = vsel %vm1695_vm5, %v821_v26, %v825_v16  ;;  %v839_v55 = vor.u32 %v838_v27, %v835_v3  ;;  %v863_v59 = vrot.slane %v861_v56, 5  ;;  %v855_v28 = vshll.u32 %v2206_v49, 16  ;;  %v1280_v27 = vld [vmem:[%s2468_s0 + $0xdc] sm:$0x7] }
  0xe5   :  { %v1111_v23 = vmax.bf16 %v826_v40, %v2140_v14  ;;  %v850_v18 = vrot.slane %v849_v0, 4  ;;  %v867_v15 = vrot.slane %v865_v61, 4  ;;  %v854_v58 = vrot.slane %v852_v33, 4  ;;  %v1277_v14 = vld [vmem:[%s2468_s0 + $0xc8] sm:$0xf] }
  0xe6   :  { %v840_v60 = vrot.slane %v839_v55, 4  ;;  %v857_v25 = vrot.slane %v855_v28, 5  ;;  %v2247_v45 = vmax.bf16 %v1276_v12, %v2157_v39  ;;  %v2253_v51 = vmax.bf16 %v1277_v14, %v2159_v24  ;;  %v1278_v39 = vld [vmem:[%s2468_s0 + $0xd4] sm:$0x7]  ;;  %v1281_v48 = vld [vmem:[%s2468_s0 + $0xd8] sm:$0xf] }
  0xe7   :  { %1223 = vst.msk [vmem:[%s2469_s1 + $0xb0] sm:$0xf] %vm1131_vm2, %v1111_v23  ;;  %v1114_v20 = vmax.bf16 %v850_v18, %v2189_v21  ;;  %v868_v16 = vor.u32 %v867_v15, %v863_v59  ;;  %v2263_v34 = vmax.bf16 %v1278_v39, %v243_v50  ;;  %v2268_v24 = vmax.bf16 %v1279_v5, %v241_v53  ;;  %v251_v50 = vpop.permute.xlu1 %250  ;;  %v249_v53 = vpop.permute.xlu0 %248  ;;  %v1282_v61 = vld [vmem:[%s2468_s0 + $0xe4] sm:$0x7]  ;;  %v1283_v28 = vld [vmem:[%s2468_s0 + $0xe0] sm:$0xf] }
  0xe8   :  { %v845_v41 = vsel %vm1695_vm5, %v840_v60, %v844_v30  ;;  %v858_v35 = vor.u32 %v857_v25, %v854_v58  ;;  %v880_v1 = vshll.u32 %v2247_v45, 16  ;;  %v884_v19 = vshrl.u32 %v2247_v45, 16  ;;  %v1240_v12 = vld [vmem:[%s2469_s1 + $0xd4] sm:$0x7] }
  0xe9   :  { %v1229_v57 = vsel %vm1713_vm6, %v1114_v20, %v1228_v22  ;;  %v1113_v11 = vmax.bf16 %v845_v41, %v2195_v62  ;;  %v869_v21 = vrot.slane %v868_v16, 4  ;;  %v871_v43 = vshrl.u32 %v2253_v51, 16 }
  0xea   :  { %1230 = vst [vmem:[%s2469_s1 + $0xbc] sm:$0x7] %v1229_v57  ;;  %v859_v9 = vrot.slane %v858_v35, 4  ;;  %v882_v17 = vrot.slane %v880_v1, 5  ;;  %v886_v7 = vrot.slane %v884_v19, 4  ;;  %v874_v8 = vshll.u32 %v2253_v51, 16 }
  0xeb   :  { %1227 = vst.msk [vmem:[%s2469_s1 + $0xb8] sm:$0xf] %vm1131_vm2, %v1113_v11  ;;  %v1116_v62 = vmax.bf16 %v869_v21, %v2200_v37  ;;  %v873_v10 = vrot.slane %v871_v43, 4  ;;  %v899_v54 = vshll.u32 %v2263_v34, 16  ;;  %v903_v4 = vshrl.u32 %v2263_v34, 16  ;;  %v255_v23 = vpop.permute.xlu1 %254  ;;  %v253_v18 = vpop.permute.xlu0 %252 }
  0xec   :  { %v864_v2 = vsel %vm1695_vm5, %v859_v9, %v863_v59  ;;  %v887_v6 = vor.u32 %v886_v7, %v882_v17  ;;  %v876_v63 = vrot.slane %v874_v8, 5  ;;  %v890_v32 = vshrl.u32 %v2268_v24, 16 }
  0xed   :  { %v1233_v52 = vsel %vm1713_vm6, %v1116_v62, %v1232_v36  ;;  %v1115_v46 = vmax.bf16 %v864_v2, %v2206_v49  ;;  %v901_v42 = vrot.slane %v899_v54, 5  ;;  %v905_v13 = vrot.slane %v903_v4, 4  ;;  %v1236_v49 = vld [vmem:[%s2469_s1 + $0xcc] sm:$0x7] }
  0xee   :  { %1234 = vst [vmem:[%s2469_s1 + $0xc4] sm:$0x7] %v1233_v52  ;;  %v888_v37 = vrot.slane %v887_v6, 4  ;;  %v877_v30 = vor.u32 %v876_v63, %v873_v10  ;;  %v892_v31 = vrot.slane %v890_v32, 4  ;;  %v893_v26 = vshll.u32 %v2268_v24, 16 }
  0xef   :  { %1231 = vst.msk [vmem:[%s2469_s1 + $0xc0] sm:$0xf] %vm1131_vm2, %v1115_v46  ;;  %v906_v3 = vor.u32 %v905_v13, %v901_v42  ;;  %v2312_v56 = vmax.bf16 %v1280_v27, %v247_v29  ;;  %v2317_v0 = vmax.bf16 %v1281_v48, %v245_v47  ;;  %v2322_v33 = vmax.bf16 %v1282_v61, %v251_v50  ;;  %v257_v7 = vpop.permute.xlu0 %256  ;;  %v1244_v10 = vld [vmem:[%s2469_s1 + $0xdc] sm:$0x7]  ;;  %v1284_v2 = vld [vmem:[%s2468_s0 + $0xec] sm:$0x7] }
  0xf0   :  { %v1118_v40 = vmax.bf16 %v888_v37, %v2247_v45  ;;  %v878_v55 = vrot.slane %v877_v30, 4  ;;  %v895_v59 = vrot.slane %v893_v26, 5  ;;  %v2328_v29 = vmax.bf16 %v1283_v28, %v249_v53  ;;  %v1285_v63 = vld [vmem:[%s2468_s0 + $0xe8] sm:$0xf]  ;;  %v1286_v46 = vld [vmem:[%s2468_s0 + $0xf4] sm:$0x7] }
  0xf1   :  { %v907_v47 = vrot.slane %v906_v3, 4  ;;  %v918_v15 = vshll.u32 %v2312_v56, 16  ;;  %v922_v58 = vshrl.u32 %v2312_v56, 16  ;;  %v909_v22 = vshrl.u32 %v2317_v0, 16  ;;  %v1287_v13 = vld [vmem:[%s2468_s0 + $0xf0] sm:$0xf] }
  0xf2   :  { %v1237_v60 = vsel %vm1713_vm6, %v1118_v40, %v1236_v49  ;;  %v883_v25 = vsel %vm1695_vm5, %v878_v55, %v882_v17  ;;  %v896_v45 = vor.u32 %v895_v59, %v892_v31  ;;  %v912_v14 = vshll.u32 %v2317_v0, 16  ;;  %v259_v17 = vpop.permute.xlu1 %258  ;;  %v1248_v61 = vld [vmem:[%s2469_s1 + $0xe4] sm:$0x7] }
  0xf3   :  { %1238 = vst [vmem:[%s2469_s1 + $0xcc] sm:$0x7] %v1237_v60  ;;  %v1117_v20 = vmax.bf16 %v883_v25, %v2253_v51  ;;  %v1120_v16 = vmax.bf16 %v907_v47, %v2263_v34  ;;  %v920_v39 = vrot.slane %v918_v15, 5  ;;  %v924_v5 = vrot.slane %v922_v58, 4 }
  0xf4   :  { %v897_v41 = vrot.slane %v896_v45, 4  ;;  %v911_v35 = vrot.slane %v909_v22, 4  ;;  %v914_v1 = vrot.slane %v912_v14, 5  ;;  %v937_v19 = vshll.u32 %v2322_v33, 16 }
  0xf5   :  { %1235 = vst.msk [vmem:[%s2469_s1 + $0xc8] sm:$0xf] %vm1131_vm2, %v1117_v20  ;;  %v1241_v57 = vsel %vm1713_vm6, %v1120_v16, %v1240_v12  ;;  %v925_v11 = vor.u32 %v924_v5, %v920_v39  ;;  %v941_v51 = vshrl.u32 %v2322_v33, 16  ;;  %v928_v34 = vshrl.u32 %v2328_v29, 16  ;;  %v261_v12 = vpop.permute.xlu0 %260 }
  0xf6   :  { %1242 = vst [vmem:[%s2469_s1 + $0xd4] sm:$0x7] %v1241_v57  ;;  %v902_v21 = vsel %vm1695_vm5, %v897_v41, %v901_v42  ;;  %v915_v43 = vor.u32 %v914_v1, %v911_v35  ;;  %v939_v36 = vrot.slane %v937_v19, 5  ;;  %v931_v9 = vshll.u32 %v2328_v29, 16  ;;  %v263_v25 = vpop.permute.xlu1 %262  ;;  %v1288_v1 = vld [vmem:[%s2468_s0 + $0xfc] sm:$0x7] }
  0xf7   :  { %v1119_v8 = vmax.bf16 %v902_v21, %v2268_v24  ;;  %v926_v50 = vrot.slane %v925_v11, 4  ;;  %v943_v53 = vrot.slane %v941_v51, 4  ;;  %v930_v62 = vrot.slane %v928_v34, 4  ;;  %v1289_v57 = vld [vmem:[%s2468_s0 + $0xf8] sm:$0xf] }
  0xf8   :  { %v916_v54 = vrot.slane %v915_v43, 4  ;;  %v933_v4 = vrot.slane %v931_v9, 5  ;;  %v387_v6 = vmax.bf16 %v1284_v2, %v255_v23  ;;  %v386_v32 = vmax.bf16 %v1285_v63, %v253_v18 }
  0xf9   :  { %1239 = vst.msk [vmem:[%s2469_s1 + $0xd0] sm:$0xf] %vm1131_vm2, %v1119_v8  ;;  %v1122_v24 = vmax.bf16 %v926_v50, %v2312_v56  ;;  %v944_v52 = vor.u32 %v943_v53, %v939_v36  ;;  %v2379_v42 = vmax.bf16 %v1286_v46, %v259_v17  ;;  %v2384_v37 = vmax.bf16 %v1287_v13, %v257_v7  ;;  %v1256_v50 = vld [vmem:[%s2469_s1 + $0xf4] sm:$0x7] }
  0xfa   :  { %v921_v30 = vsel %vm1695_vm5, %v916_v54, %v920_v39  ;;  %v934_v31 = vor.u32 %v933_v4, %v930_v62  ;;  %v956_v26 = vshll.u32 %v387_v6, 16  ;;  %v960_v49 = vshrl.u32 %v387_v6, 16 }
  0xfb   :  { %v1245_v3 = vsel %vm1713_vm6, %v1122_v24, %v1244_v10  ;;  %v1121_v27 = vmax.bf16 %v921_v30, %v2317_v0  ;;  %v945_v56 = vrot.slane %v944_v52, 4  ;;  %v947_v48 = vshrl.u32 %v386_v32, 16 }
  0xfc   :  { %1246 = vst [vmem:[%s2469_s1 + $0xdc] sm:$0x7] %v1245_v3  ;;  %v935_v40 = vrot.slane %v934_v31, 4  ;;  %v958_v55 = vrot.slane %v956_v26, 5  ;;  %v962_v59 = vrot.slane %v960_v49, 4  ;;  %v950_v28 = vshll.u32 %v386_v32, 16 }
  0xfd   :  { %1243 = vst.msk [vmem:[%s2469_s1 + $0xd8] sm:$0xf] %vm1131_vm2, %v1121_v27  ;;  %v1124_v0 = vmax.bf16 %v945_v56, %v2322_v33  ;;  %v949_v23 = vrot.slane %v947_v48, 4  ;;  %v975_v18 = vshll.u32 %v2379_v42, 16  ;;  %v979_v47 = vshrl.u32 %v2379_v42, 16 }
  0xfe   :  { %v940_v15 = vsel %vm1695_vm5, %v935_v40, %v939_v36  ;;  %v963_v58 = vor.u32 %v962_v59, %v958_v55  ;;  %v952_v22 = vrot.slane %v950_v28, 5  ;;  %v966_v60 = vshrl.u32 %v2384_v37, 16  ;;  %v1260_v31 = vld [vmem:[%s2469_s1 + $0xfc] sm:$0x7] }
  0xff   :  { %v1249_v45 = vsel %vm1713_vm6, %v1124_v0, %v1248_v61  ;;  %v1123_v14 = vmax.bf16 %v940_v15, %v2328_v29  ;;  %v977_v33 = vrot.slane %v975_v18, 5  ;;  %v981_v20 = vrot.slane %v979_v47, 4  ;;  %v1252_v29 = vld [vmem:[%s2469_s1 + $0xec] sm:$0x7] }
 0x100   :  { %1250 = vst [vmem:[%s2469_s1 + $0xe4] sm:$0x7] %v1249_v45  ;;  %v964_v16 = vrot.slane %v963_v58, 4  ;;  %v953_v39 = vor.u32 %v952_v22, %v949_v23  ;;  %v968_v5 = vrot.slane %v966_v60, 4  ;;  %v969_v41 = vshll.u32 %v2384_v37, 16 }
 0x101   :  { %1247 = vst.msk [vmem:[%s2469_s1 + $0xe0] sm:$0xf] %vm1131_vm2, %v1123_v14  ;;  %v982_v35 = vor.u32 %v981_v20, %v977_v33  ;;  %v391_v19 = vmax.bf16 %v1288_v1, %v263_v25  ;;  %v390_v11 = vmax.bf16 %v1289_v57, %v261_v12 }
 0x102   :  { %v1126_v51 = vmax.bf16 %v964_v16, %v387_v6  ;;  %v954_v34 = vrot.slane %v953_v39, 4  ;;  %v971_v21 = vrot.slane %v969_v41, 5 }
 0x103   :  { %v983_v43 = vrot.slane %v982_v35, 4  ;;  %v994_v36 = vshll.u32 %v391_v19, 16  ;;  %v998_v9 = vshrl.u32 %v391_v19, 16  ;;  %v985_v17 = vshrl.u32 %v390_v11, 16 }
 0x104   :  { %v1253_v7 = vsel %vm1713_vm6, %v1126_v51, %v1252_v29  ;;  %v959_v8 = vsel %vm1695_vm5, %v954_v34, %v958_v55  ;;  %v972_v53 = vor.u32 %v971_v21, %v968_v5  ;;  %v988_v62 = vshll.u32 %v390_v11, 16 }
 0x105   :  { %1254 = vst [vmem:[%s2469_s1 + $0xec] sm:$0x7] %v1253_v7  ;;  %v1125_v10 = vmax.bf16 %v959_v8, %v386_v32  ;;  %v1128_v54 = vmax.bf16 %v983_v43, %v2379_v42  ;;  %v996_v4 = vrot.slane %v994_v36, 5  ;;  %v1000_v2 = vrot.slane %v998_v9, 4 }
 0x106   :  { %v973_v6 = vrot.slane %v972_v53, 4  ;;  %v987_v63 = vrot.slane %v985_v17, 4  ;;  %v990_v24 = vrot.slane %v988_v62, 5 }
 0x107   :  { %1251 = vst.msk [vmem:[%s2469_s1 + $0xe8] sm:$0xf] %vm1131_vm2, %v1125_v10  ;;  %v1257_v52 = vsel %vm1713_vm6, %v1128_v54, %v1256_v50  ;;  %v1001_v46 = vor.u32 %v1000_v2, %v996_v4 }
 0x108   :  { %1258 = vst [vmem:[%s2469_s1 + $0xf4] sm:$0x7] %v1257_v52  ;;  %v978_v32 = vsel %vm1695_vm5, %v973_v6, %v977_v33  ;;  %v991_v42 = vor.u32 %v990_v24, %v987_v63 }
 0x109   :  { %v1127_v13 = vmax.bf16 %v978_v32, %v2384_v37  ;;  %v1002_v30 = vrot.slane %v1001_v46, 4 }
 0x10a   :  { %v992_v26 = vrot.slane %v991_v42, 4 }
 0x10b   :  { %1255 = vst.msk [vmem:[%s2469_s1 + $0xf0] sm:$0xf] %vm1131_vm2, %v1127_v13  ;;  %v1130_v49 = vmax.bf16 %v1002_v30, %v391_v19 }
 0x10c   :  { %v997_v3 = vsel %vm1695_vm5, %v992_v26, %v996_v4 }
 0x10d   :  { %v1261_v27 = vsel %vm1713_vm6, %v1130_v49, %v1260_v31  ;;  %v1129_v56 = vmax.bf16 %v997_v3, %v390_v11 }
 0x10e   :  { %1262 = vst [vmem:[%s2469_s1 + $0xfc] sm:$0x7] %v1261_v27 }
 0x10f   :  { %1259 = vst.msk [vmem:[%s2469_s1 + $0xf8] sm:$0xf] %vm1131_vm2, %v1129_v56 }

// kernel: sample_convnet_forward.7
= control target key start
LH: loop header
LB: loop body
LE: loop exit
PB: predicated region body
PF: predicated region fallthrough
CT: control target
= control target key end

     0   :  { %v366_v1 = vmov 0   ;;  %vm260_vm0 = vcmask 404480   ;;  %s471_s2 = inlined_call_operand.vmem [shape: bf16[256,50], index: 2, kind: input, shape index: {}]   ;;  %s472_s0 = inlined_call_operand.vmem [shape: bf16[32,256], index: 0, kind: input, shape index: {}]   ;;  %s473_s1 = inlined_call_operand.vmem [shape: f32[32,1], index: 1, kind: input, shape index: {}]   ;;  %s474_s3 = inlined_call_operand.vmem [shape: bf16[32,50], index: 3, kind: output, shape index: {}]  }
   0x1   :  { %v344_v0 = vld [vmem:[%s471_s2 + $0x78] sm:$0xff]   ;;  %343 = vset.pattern.permute.xlu1 %v366_v1  ;;  %342 = vset.pattern.permute.xlu0 %v366_v1  ;;  %v346_v3 = vld [vmem:[%s471_s2 + $0x70] sm:$0xff]   ;;  %v348_v5 = vld [vmem:[%s471_s2 + $0x68] sm:$0xff]  }
   0x2   :  { %v345_v2 = vld [vmem:[%s471_s2 + $0x38] sm:$0xff]   ;;  %297 = vmatprep.subr.bf16.mxu0 %v344_v0  ;;  %325 = vmatprep.subr.bf16.mxu1 %v344_v0  ;;  %v347_v4 = vld [vmem:[%s471_s2 + $0x30] sm:$0xff]   ;;  %v349_v6 = vld [vmem:[%s471_s2 + $0x28] sm:$0xff]  }
   0x3   :  { %298 = vmatpush3.bf16.msra.mxu0 %v345_v2  ;;  %333 = vmatpush3.bf16.msra.mxu1 %v345_v2  ;;  %v350_v7 = vld [vmem:[%s471_s2 + $0x60] sm:$0xff]   ;;  %v352_v9 = vld [vmem:[%s471_s2 + $0x58] sm:$0xff]   ;;  %v354_v11 = vld [vmem:[%s471_s2 + $0x50] sm:$0xff]  }
   0x4   :  { %299 = vmatprep.subr.bf16.mxu0 %v346_v3  ;;  %326 = vmatprep.subr.bf16.mxu1 %v346_v3  ;;  %v351_v8 = vld [vmem:[%s471_s2 + $0x20] sm:$0xff]   ;;  %v353_v10 = vld [vmem:[%s471_s2 + $0x18] sm:$0xff]   ;;  %v355_v14 = vld [vmem:[%s471_s2 + $0x10] sm:$0xff]  }
   0x5   :  { %v362_v12 = vld [vmem:[%s472_s0 + $0x4] ss:$8 sps:$4 sm:$0xff]   ;;  %v365_v13 = vld [vmem:[%s472_s0 + $0x14] ss:$8 sps:$4 sm:$0xff]   ;;  %v360_v23 = vld [vmem:[%s472_s0] ss:$8 sps:$4 sm:$0xff]  }
   0x6   :  { %v53_v15 = vld [vmem:[%s473_s1 + $0x10] sm:$0xff]  ;;  %v51_v16 = vld [vmem:[%s473_s1] sm:$0xff]  ;;  %v356_v17 = vld [vmem:[%s471_s2 + $0x48] sm:$0xff]   ;;  %223 = vmatprep.mubr.bf16.mxu0 %v362_v12  ;;  %231 = vmatprep.mubr.bf16.mxu1 %v365_v13 }
   0x7   :  { %300 = vmatpush3.bf16.msra.mxu0 %v347_v4  ;;  %334 = vmatpush3.bf16.msra.mxu1 %v347_v4  ;;  %v357_v18 = vld [vmem:[%s471_s2 + $0x8] sm:$0xff]   ;;  %v54_v19 = vld [vmem:[%s473_s1 + $0x18] sm:$0xff]  ;;  %v358_v21 = vld [vmem:[%s471_s2 + $0x40] sm:$0xff]  }
   0x8   :  { %301 = vmatprep.subr.bf16.mxu0 %v348_v5  ;;  %327 = vmatprep.subr.bf16.mxu1 %v348_v5  ;;  %v52_v20 = vld [vmem:[%s473_s1 + $0x8] sm:$0xff]  ;;  %v359_v22 = vld [vmem:[%s471_s2] sm:$0xff]   ;;  %v363_v24 = vld [vmem:[%s472_s0 + $0x10] ss:$8 sps:$4 sm:$0xff]  }
   0x9   :  { %67 = vperm.xlu1 %343, %v53_v15   ;;  %57 = vperm.xlu0 %342, %v51_v16  }
   0xb   :  { %302 = vmatpush3.bf16.msra.mxu0 %v349_v6  ;;  %335 = vmatpush3.bf16.msra.mxu1 %v349_v6 }
   0xc   :  { %303 = vmatprep.subr.bf16.mxu0 %v350_v7  ;;  %328 = vmatprep.subr.bf16.mxu1 %v350_v7 }
   0xd   :  { %72 = vperm.xlu1 %343, %v54_v19   ;;  %62 = vperm.xlu0 %342, %v52_v20  }
   0xf   :  { %304 = vmatpush3.bf16.msra.mxu0 %v351_v8  ;;  %336 = vmatpush3.bf16.msra.mxu1 %v351_v8 }
  0x10   :  { %305 = vmatprep.subr.bf16.mxu0 %v352_v9  ;;  %329 = vmatprep.subr.bf16.mxu1 %v352_v9 }
  0x13   :  { %306 = vmatpush3.bf16.msra.mxu0 %v353_v10  ;;  %337 = vmatpush3.bf16.msra.mxu1 %v353_v10 }
  0x14   :  { %307 = vmatprep.subr.bf16.mxu0 %v354_v11  ;;  %330 = vmatprep.subr.bf16.mxu1 %v354_v11 }
  0x17   :  { %308 = vmatpush3.bf16.msra.mxu0 %v355_v14  ;;  %338 = vmatpush3.bf16.msra.mxu1 %v355_v14 }
  0x18   :  { %309 = vmatprep.subr.bf16.mxu0 %v356_v17  ;;  %331 = vmatprep.subr.bf16.mxu1 %v356_v17 }
  0x1b   :  { %310 = vmatpush3.bf16.msra.mxu0 %v357_v18  ;;  %339 = vmatpush3.bf16.msra.mxu1 %v357_v18 }
  0x1c   :  { %311 = vmatprep.subr.bf16.mxu0 %v358_v21  ;;  %332 = vmatprep.subr.bf16.mxu1 %v358_v21 }
  0x1f   :  { %312 = vmatpush3.bf16.msra.mxu0 %v359_v22  ;;  %340 = vmatpush3.bf16.msra.mxu1 %v359_v22 }
  0x22   :  { %224 = vmatmul.mubr.bf16.vlgmr.msra.gmra.mxu0 %v360_v23  ;;  %232 = vmatmul.mubr.bf16.vlgmr.msra.gmra.mxu1 %v363_v24 }
  0x84   :  { %v68_v27 = vpop.permute.xlu1 %67  ;;  %v58_v28 = vpop.permute.xlu0 %57 }
  0x88   :  { %v73_v43 = vpop.permute.xlu1 %72  ;;  %v63_v44 = vpop.permute.xlu0 %62 }
  0xe2   :  { %v313_v25 = vpop.f32.mrf.mxu0  ;;  %v319_v26 = vpop.f32.mrf.mxu1 }
  0xe4   :  { %v314_v29 = vpop.f32.mrf.mxu0  ;;  %v320_v30 = vpop.f32.mrf.mxu1 }
  0xe5   :  { %v315_v31 = vadd.f32 %v314_v29, %v313_v25  ;;  %v321_v32 = vadd.f32 %v320_v30, %v319_v26 }
  0xe6   :  { %v316_v33 = vpop.f32.mrf.mxu0  ;;  %v322_v34 = vpop.f32.mrf.mxu1 }
  0xe7   :  { %v226_v35 = vadd.f32 %v315_v31, %v58_v28  ;;  %v234_v36 = vadd.f32 %v321_v32, %v68_v27 }
  0xe8   :  { %v317_v37 = vpop.f32.mrf.mxu0  ;;  %v323_v38 = vpop.f32.mrf.mxu1 }
  0xe9   :  { %v240_v39 = vmax.f32 %v226_v35, 0.0  ;;  %v242_v40 = vmax.f32 %v234_v36, 0.0  ;;  %v318_v41 = vadd.f32 %v317_v37, %v316_v33  ;;  %v324_v42 = vadd.f32 %v323_v38, %v322_v34 }
  0xeb   :  { %v293_v45 = vpack.c.bf16 %v240_v39, %v240_v39  ;;  %v295_v46 = vpack.c.bf16 %v242_v40, %v242_v40  ;;  %v229_v47 = vadd.f32 %v318_v41, %v63_v44  ;;  %v237_v48 = vadd.f32 %v324_v42, %v73_v43 }
  0xed   :  { %261 = vst.msk [vmem:[%s474_s3] sm:$0xf] %vm260_vm0, %v293_v45  ;;  %263 = vst.msk [vmem:[%s474_s3 + $0x8] sm:$0xf] %vm260_vm0, %v295_v46  ;;  %v241_v49 = vmax.f32 %v229_v47, 0.0  ;;  %v243_v50 = vmax.f32 %v237_v48, 0.0 }
  0xef   :  { %v294_v51 = vpack.c.bf16 %v241_v49, %v241_v49  ;;  %v296_v52 = vpack.c.bf16 %v243_v50, %v243_v50 }
  0xf1   :  { %262 = vst.msk [vmem:[%s474_s3 + $0x4] sm:$0xf] %vm260_vm0, %v294_v51  ;;  %264 = vst.msk [vmem:[%s474_s3 + $0xc] sm:$0xf] %vm260_vm0, %v296_v52 }

// kernel: sample_convnet_forward.8
= control target key start
LH: loop header
LB: loop body
LE: loop exit
PB: predicated region body
PF: predicated region fallthrough
CT: control target
= control target key end

     0   :  { %s1180_s10 = smov 127   ;;  %vm1096_vm0 = vcmask 25600   ;;  %s1945_s0 = inlined_call_operand.vmem [shape: bf16[32,2,5,5], index: 0, kind: input, shape index: {}]   ;;  %s1946_s1 = inlined_call_operand.vmem [shape: bf16[32,2,4,4], index: 1, kind: output, shape index: {}]  }
   0x1   :  { %v1194_v0 = vld [vmem:[%s1945_s0 + $0x8] sm:$0x7]  ;;  %v1199_v1 = vld [vmem:[%s1945_s0] sm:$0x7]  ;;  %v1208_v2 = vld [vmem:[%s1945_s0 + $0xc] sm:$0x7] }
   0x2   :  { %140 = vrot.lane.b32.xlu1 %v1194_v0, %s1180_s10  ;;  %136 = vrot.lane.b32.xlu0 %v1199_v1, %s1180_s10  ;;  %v1213_v3 = vld [vmem:[%s1945_s0 + $0x4] sm:$0x7]  ;;  %v1222_v4 = vld [vmem:[%s1945_s0 + $0x14] sm:$0x7] }
   0x3   :  { %v1227_v5 = vld [vmem:[%s1945_s0 + $0x10] sm:$0x7]  ;;  %v1236_v6 = vld [vmem:[%s1945_s0 + $0x1c] sm:$0x7]  ;;  %v1241_v7 = vld [vmem:[%s1945_s0 + $0x18] sm:$0x7] }
   0x4   :  { %v1250_v8 = vld [vmem:[%s1945_s0 + $0x24] sm:$0x7]  ;;  %v1255_v9 = vld [vmem:[%s1945_s0 + $0x20] sm:$0x7]  ;;  %v1264_v10 = vld [vmem:[%s1945_s0 + $0x2c] sm:$0x7] }
   0x5   :  { %v1269_v11 = vld [vmem:[%s1945_s0 + $0x28] sm:$0x7]  ;;  %v1278_v12 = vld [vmem:[%s1945_s0 + $0x34] sm:$0x7]  ;;  %v1283_v13 = vld [vmem:[%s1945_s0 + $0x30] sm:$0x7] }
   0x6   :  { %142 = vrot.lane.b32.xlu1 %v1208_v2, %s1180_s10  ;;  %138 = vrot.lane.b32.xlu0 %v1213_v3, %s1180_s10  ;;  %v1292_v14 = vld [vmem:[%s1945_s0 + $0x3c] sm:$0x7]  ;;  %v1297_v15 = vld [vmem:[%s1945_s0 + $0x38] sm:$0x7] }
   0x7   :  { %v1306_v16 = vld [vmem:[%s1945_s0 + $0x44] sm:$0x7]  ;;  %v1311_v17 = vld [vmem:[%s1945_s0 + $0x40] sm:$0x7]  ;;  %v1320_v18 = vld [vmem:[%s1945_s0 + $0x4c] sm:$0x7] }
   0x8   :  { %v1325_v19 = vld [vmem:[%s1945_s0 + $0x48] sm:$0x7]  ;;  %v1334_v20 = vld [vmem:[%s1945_s0 + $0x54] sm:$0x7]  ;;  %v1339_v21 = vld [vmem:[%s1945_s0 + $0x50] sm:$0x7] }
   0x9   :  { %v1348_v22 = vld [vmem:[%s1945_s0 + $0x5c] sm:$0x7]  ;;  %v1353_v23 = vld [vmem:[%s1945_s0 + $0x58] sm:$0x7]  ;;  %v1362_v24 = vld [vmem:[%s1945_s0 + $0x64] sm:$0x7] }
   0xa   :  { %146 = vrot.lane.b32.xlu1 %v1222_v4, %s1180_s10  ;;  %144 = vrot.lane.b32.xlu0 %v1227_v5, %s1180_s10  ;;  %v1367_v25 = vld [vmem:[%s1945_s0 + $0x60] sm:$0x7]  ;;  %v1376_v26 = vld [vmem:[%s1945_s0 + $0x6c] sm:$0x7] }
   0xb   :  { %v1381_v27 = vld [vmem:[%s1945_s0 + $0x68] sm:$0x7]  ;;  %v1390_v28 = vld [vmem:[%s1945_s0 + $0x74] sm:$0x7]  ;;  %v1395_v29 = vld [vmem:[%s1945_s0 + $0x70] sm:$0x7] }
   0xc   :  { %v1404_v30 = vld [vmem:[%s1945_s0 + $0x7c] sm:$0x7]  ;;  %v1409_v31 = vld [vmem:[%s1945_s0 + $0x78] sm:$0x7]  ;;  %v1418_v32 = vld [vmem:[%s1945_s0 + $0x84] sm:$0x7] }
   0xd   :  { %v1423_v33 = vld [vmem:[%s1945_s0 + $0x80] sm:$0x7]  ;;  %v1432_v34 = vld [vmem:[%s1945_s0 + $0x8c] sm:$0x7]  ;;  %v1437_v35 = vld [vmem:[%s1945_s0 + $0x88] sm:$0x7] }
   0xe   :  { %150 = vrot.lane.b32.xlu1 %v1236_v6, %s1180_s10  ;;  %148 = vrot.lane.b32.xlu0 %v1241_v7, %s1180_s10  ;;  %v1446_v36 = vld [vmem:[%s1945_s0 + $0x94] sm:$0x7]  ;;  %v1451_v37 = vld [vmem:[%s1945_s0 + $0x90] sm:$0x7] }
   0xf   :  { %v1460_v38 = vld [vmem:[%s1945_s0 + $0x9c] sm:$0x7]  ;;  %v1465_v39 = vld [vmem:[%s1945_s0 + $0x98] sm:$0x7]  ;;  %v1474_v40 = vld [vmem:[%s1945_s0 + $0xa4] sm:$0x7] }
  0x10   :  { %1958 = vst [vmem:[#allocation2_spill] sm:$0xff] %v1465_v39  ;;  %1959 = vst [vmem:[#allocation3_spill] sm:$0xff] %v1474_v40  ;;  %v1479_v41 = vld [vmem:[%s1945_s0 + $0xa0] sm:$0x7]  ;;  %v1488_v42 = vld [vmem:[%s1945_s0 + $0xac] sm:$0x7] }
  0x11   :  { %1960 = vst [vmem:[#allocation4_spill] sm:$0xff] %v1479_v41  ;;  %1961 = vst [vmem:[#allocation5_spill] sm:$0xff] %v1488_v42  ;;  %v1493_v43 = vld [vmem:[%s1945_s0 + $0xa8] sm:$0x7]  ;;  %v1502_v44 = vld [vmem:[%s1945_s0 + $0xb4] sm:$0x7] }
  0x12   :  { %154 = vrot.lane.b32.xlu1 %v1250_v8, %s1180_s10  ;;  %152 = vrot.lane.b32.xlu0 %v1255_v9, %s1180_s10  ;;  %1962 = vst [vmem:[#allocation6_spill] sm:$0xff] %v1493_v43  ;;  %1963 = vst [vmem:[#allocation7_spill] sm:$0xff] %v1502_v44  ;;  %v1507_v45 = vld [vmem:[%s1945_s0 + $0xb0] sm:$0x7]  ;;  %v1516_v46 = vld [vmem:[%s1945_s0 + $0xbc] sm:$0x7] }
  0x13   :  { %1964 = vst [vmem:[#allocation8_spill] sm:$0xff] %v1507_v45  ;;  %1965 = vst [vmem:[#allocation9_spill] sm:$0xff] %v1516_v46  ;;  %v1521_v47 = vld [vmem:[%s1945_s0 + $0xb8] sm:$0x7]  ;;  %v1530_v48 = vld [vmem:[%s1945_s0 + $0xc4] sm:$0x7] }
  0x14   :  { %1966 = vst [vmem:[#allocation10_spill] sm:$0xff] %v1521_v47  ;;  %1967 = vst [vmem:[#allocation11_spill] sm:$0xff] %v1530_v48  ;;  %v1535_v49 = vld [vmem:[%s1945_s0 + $0xc0] sm:$0x7]  ;;  %v59_v50 = vld [vmem:[%s1945_s0 + $0xcc] sm:$0x7] }
  0x15   :  { %1968 = vst [vmem:[#allocation12_spill] sm:$0xff] %v1535_v49  ;;  %v58_v51 = vld [vmem:[%s1945_s0 + $0xc8] sm:$0x7]  ;;  %v61_v52 = vld [vmem:[%s1945_s0 + $0xd4] sm:$0x7] }
  0x16   :  { %158 = vrot.lane.b32.xlu1 %v1264_v10, %s1180_s10  ;;  %156 = vrot.lane.b32.xlu0 %v1269_v11, %s1180_s10  ;;  %v60_v53 = vld [vmem:[%s1945_s0 + $0xd0] sm:$0x7]  ;;  %v63_v54 = vld [vmem:[%s1945_s0 + $0xdc] sm:$0x7] }
  0x17   :  { %v62_v55 = vld [vmem:[%s1945_s0 + $0xd8] sm:$0x7]  ;;  %v65_v56 = vld [vmem:[%s1945_s0 + $0xe4] sm:$0x7]  ;;  %v64_v57 = vld [vmem:[%s1945_s0 + $0xe0] sm:$0x7] }
  0x18   :  { %v67_v58 = vld [vmem:[%s1945_s0 + $0xec] sm:$0x7]  ;;  %v66_v59 = vld [vmem:[%s1945_s0 + $0xe8] sm:$0x7] }
  0x1a   :  { %162 = vrot.lane.b32.xlu1 %v1278_v12, %s1180_s10  ;;  %160 = vrot.lane.b32.xlu0 %v1283_v13, %s1180_s10 }
  0x1e   :  { %166 = vrot.lane.b32.xlu1 %v1292_v14, %s1180_s10  ;;  %164 = vrot.lane.b32.xlu0 %v1297_v15, %s1180_s10 }
  0x22   :  { %170 = vrot.lane.b32.xlu1 %v1306_v16, %s1180_s10  ;;  %168 = vrot.lane.b32.xlu0 %v1311_v17, %s1180_s10 }
  0x26   :  { %174 = vrot.lane.b32.xlu1 %v1320_v18, %s1180_s10  ;;  %172 = vrot.lane.b32.xlu0 %v1325_v19, %s1180_s10 }
  0x2a   :  { %178 = vrot.lane.b32.xlu1 %v1334_v20, %s1180_s10  ;;  %176 = vrot.lane.b32.xlu0 %v1339_v21, %s1180_s10 }
  0x2e   :  { %182 = vrot.lane.b32.xlu1 %v1348_v22, %s1180_s10  ;;  %180 = vrot.lane.b32.xlu0 %v1353_v23, %s1180_s10 }
  0x32   :  { %186 = vrot.lane.b32.xlu1 %v1362_v24, %s1180_s10  ;;  %184 = vrot.lane.b32.xlu0 %v1367_v25, %s1180_s10 }
  0x36   :  { %190 = vrot.lane.b32.xlu1 %v1376_v26, %s1180_s10  ;;  %188 = vrot.lane.b32.xlu0 %v1381_v27, %s1180_s10 }
  0x3a   :  { %194 = vrot.lane.b32.xlu1 %v1390_v28, %s1180_s10  ;;  %192 = vrot.lane.b32.xlu0 %v1395_v29, %s1180_s10 }
  0x3e   :  { %198 = vrot.lane.b32.xlu1 %v1404_v30, %s1180_s10  ;;  %196 = vrot.lane.b32.xlu0 %v1409_v31, %s1180_s10 }
  0x42   :  { %202 = vrot.lane.b32.xlu1 %v1418_v32, %s1180_s10  ;;  %200 = vrot.lane.b32.xlu0 %v1423_v33, %s1180_s10 }
  0x46   :  { %206 = vrot.lane.b32.xlu1 %v1432_v34, %s1180_s10  ;;  %204 = vrot.lane.b32.xlu0 %v1437_v35, %s1180_s10 }
  0x4a   :  { %210 = vrot.lane.b32.xlu1 %v1446_v36, %s1180_s10  ;;  %208 = vrot.lane.b32.xlu0 %v1451_v37, %s1180_s10 }
  0x4e   :  { %214 = vrot.lane.b32.xlu1 %v1460_v38, %s1180_s10  ;;  %212 = vrot.lane.b32.xlu0 %v1465_v39, %s1180_s10 }
  0x52   :  { %218 = vrot.lane.b32.xlu1 %v1474_v40, %s1180_s10  ;;  %216 = vrot.lane.b32.xlu0 %v1479_v41, %s1180_s10 }
  0x56   :  { %222 = vrot.lane.b32.xlu1 %v1488_v42, %s1180_s10  ;;  %220 = vrot.lane.b32.xlu0 %v1493_v43, %s1180_s10 }
  0x5a   :  { %226 = vrot.lane.b32.xlu1 %v1502_v44, %s1180_s10  ;;  %224 = vrot.lane.b32.xlu0 %v1507_v45, %s1180_s10 }
  0x5e   :  { %230 = vrot.lane.b32.xlu1 %v1516_v46, %s1180_s10  ;;  %228 = vrot.lane.b32.xlu0 %v1521_v47, %s1180_s10  ;;  %v71_v47 = vld [vmem:[%s1945_s0 + $0xfc] sm:$0x7] }
  0x62   :  { %234 = vrot.lane.b32.xlu1 %v1530_v48, %s1180_s10  ;;  %232 = vrot.lane.b32.xlu0 %v1535_v49, %s1180_s10 }
  0x66   :  { %238 = vrot.lane.b32.xlu1 %v59_v50, %s1180_s10  ;;  %236 = vrot.lane.b32.xlu0 %v58_v51, %s1180_s10  ;;  %v69_v50 = vld [vmem:[%s1945_s0 + $0xf4] sm:$0x7] }
  0x6a   :  { %242 = vrot.lane.b32.xlu1 %v61_v52, %s1180_s10  ;;  %240 = vrot.lane.b32.xlu0 %v60_v53, %s1180_s10 }
  0x6e   :  { %246 = vrot.lane.b32.xlu1 %v63_v54, %s1180_s10  ;;  %244 = vrot.lane.b32.xlu0 %v62_v55, %s1180_s10  ;;  %v68_v55 = vld [vmem:[%s1945_s0 + $0xf0] sm:$0x7] }
  0x72   :  { %250 = vrot.lane.b32.xlu1 %v65_v56, %s1180_s10  ;;  %248 = vrot.lane.b32.xlu0 %v64_v57, %s1180_s10 }
  0x74   :  { %v141_v60 = vpop.permute.xlu1 %140  ;;  %v137_v61 = vpop.permute.xlu0 %136 }
  0x75   :  { %v330_v62 = vmax.bf16 %v141_v60, %v1194_v0  ;;  %v328_v63 = vmax.bf16 %v137_v61, %v1199_v1 }
  0x76   :  { %254 = vrot.lane.b32.xlu1 %v67_v58, %s1180_s10  ;;  %252 = vrot.lane.b32.xlu0 %v66_v59, %s1180_s10 }
  0x77   :  { %v411_v51 = vshrl.u32 %v330_v62, 16  ;;  %v414_v52 = vshll.u32 %v330_v62, 16  ;;  %v393_v53 = vshrl.u32 %v328_v63, 16  ;;  %v396_v54 = vshll.u32 %v328_v63, 16 }
  0x78   :  { %v143_v56 = vpop.permute.xlu1 %142  ;;  %v139_v0 = vpop.permute.xlu0 %138 }
  0x79   :  { %v413_v57 = vrot.slane %v411_v51, 4  ;;  %v416_v1 = vrot.slane %v414_v52, 5  ;;  %v395_v60 = vrot.slane %v393_v53, 4  ;;  %v398_v58 = vrot.slane %v396_v54, 5  ;;  %v70_v51 = vld [vmem:[%s1945_s0 + $0xf8] sm:$0x7] }
  0x7a   :  { %v331_v59 = vmax.bf16 %v143_v56, %v1208_v2  ;;  %v329_v61 = vmax.bf16 %v139_v0, %v1213_v3  ;;  %258 = vrot.lane.b32.xlu1 %v69_v50, %s1180_s10  ;;  %256 = vrot.lane.b32.xlu0 %v68_v55, %s1180_s10 }
  0x7b   :  { %v417_v49 = vor.u32 %v416_v1, %v413_v57  ;;  %v399_v48 = vor.u32 %v398_v58, %v395_v60 }
  0x7c   :  { %v420_v52 = vshrl.u32 %v331_v59, 16  ;;  %v423_v53 = vshll.u32 %v331_v59, 16  ;;  %v402_v2 = vshrl.u32 %v329_v61, 16  ;;  %v405_v54 = vshll.u32 %v329_v61, 16  ;;  %v147_v3 = vpop.permute.xlu1 %146  ;;  %v145_v56 = vpop.permute.xlu0 %144 }
  0x7d   :  { %v418_v50 = vrot.slane %v417_v49, 4  ;;  %v400_v0 = vrot.slane %v399_v48, 4  ;;  %v333_v55 = vmax.bf16 %v147_v3, %v1222_v4  ;;  %v332_v57 = vmax.bf16 %v145_v56, %v1227_v5 }
  0x7e   :  { %v422_v1 = vrot.slane %v420_v52, 4  ;;  %v425_v60 = vrot.slane %v423_v53, 5  ;;  %v404_v58 = vrot.slane %v402_v2, 4  ;;  %v407_v46 = vrot.slane %v405_v54, 5  ;;  %262 = vrot.lane.b32.xlu1 %v71_v47, %s1180_s10  ;;  %260 = vrot.lane.b32.xlu0 %v70_v51, %s1180_s10 }
  0x7f   :  { %v1034_v45 = vmax.bf16 %v418_v50, %v330_v62  ;;  %v1032_v44 = vmax.bf16 %v400_v0, %v328_v63  ;;  %v438_v43 = vshrl.u32 %v333_v55, 16  ;;  %v441_v42 = vshll.u32 %v333_v55, 16 }
  0x80   :  { %v426_v41 = vor.u32 %v425_v60, %v422_v1  ;;  %v408_v40 = vor.u32 %v407_v46, %v404_v58  ;;  %v429_v49 = vshrl.u32 %v332_v57, 16  ;;  %v432_v48 = vshll.u32 %v332_v57, 16  ;;  %v151_v39 = vpop.permute.xlu1 %150  ;;  %v149_v4 = vpop.permute.xlu0 %148 }
  0x81   :  { %1099 = vst.msk [vmem:[%s1946_s1 + $0x4] sm:$0x3] %vm1096_vm0, %v1034_v45  ;;  %1097 = vst.msk [vmem:[%s1946_s1] sm:$0x3] %vm1096_vm0, %v1032_v44  ;;  %v440_v5 = vrot.slane %v438_v43, 4  ;;  %v443_v47 = vrot.slane %v441_v42, 5  ;;  %v335_v62 = vmax.bf16 %v151_v39, %v1236_v6  ;;  %v334_v46 = vmax.bf16 %v149_v4, %v1241_v7 }
  0x82   :  { %v427_v63 = vrot.slane %v426_v41, 4  ;;  %v409_v51 = vrot.slane %v408_v40, 4  ;;  %v431_v52 = vrot.slane %v429_v49, 4  ;;  %v434_v53 = vrot.slane %v432_v48, 5 }
  0x83   :  { %v444_v2 = vor.u32 %v443_v47, %v440_v5  ;;  %v456_v54 = vshrl.u32 %v335_v62, 16  ;;  %v459_v3 = vshll.u32 %v335_v62, 16  ;;  %v447_v56 = vshrl.u32 %v334_v46, 16 }
  0x84   :  { %v1035_v45 = vmax.bf16 %v427_v63, %v331_v59  ;;  %v1033_v50 = vmax.bf16 %v409_v51, %v329_v61  ;;  %v435_v0 = vor.u32 %v434_v53, %v431_v52  ;;  %v450_v1 = vshll.u32 %v334_v46, 16  ;;  %v155_v60 = vpop.permute.xlu1 %154  ;;  %v153_v44 = vpop.permute.xlu0 %152 }
  0x85   :  { %v445_v43 = vrot.slane %v444_v2, 4  ;;  %v458_v42 = vrot.slane %v456_v54, 4  ;;  %v461_v58 = vrot.slane %v459_v3, 5  ;;  %v449_v6 = vrot.slane %v447_v56, 4 }
  0x86   :  { %1100 = vst.msk [vmem:[%s1946_s1 + $0x6] sm:$0x3] %vm1096_vm0, %v1035_v45  ;;  %1098 = vst.msk [vmem:[%s1946_s1 + $0x2] sm:$0x3] %vm1096_vm0, %v1033_v50  ;;  %v436_v7 = vrot.slane %v435_v0, 4  ;;  %v452_v39 = vrot.slane %v450_v1, 5  ;;  %v337_v40 = vmax.bf16 %v155_v60, %v1250_v8  ;;  %v336_v41 = vmax.bf16 %v153_v44, %v1255_v9 }
  0x87   :  { %v1037_v59 = vmax.bf16 %v445_v43, %v333_v55  ;;  %v462_v61 = vor.u32 %v461_v58, %v458_v42 }
  0x88   :  { %v1036_v49 = vmax.bf16 %v436_v7, %v332_v57  ;;  %v453_v48 = vor.u32 %v452_v39, %v449_v6  ;;  %v474_v4 = vshrl.u32 %v337_v40, 16  ;;  %v477_v5 = vshll.u32 %v337_v40, 16  ;;  %v159_v47 = vpop.permute.xlu1 %158  ;;  %v157_v63 = vpop.permute.xlu0 %156 }
  0x89   :  { %1102 = vst.msk [vmem:[%s1946_s1 + $0xa] sm:$0x3] %vm1096_vm0, %v1037_v59  ;;  %v463_v51 = vrot.slane %v462_v61, 4  ;;  %v465_v52 = vshrl.u32 %v336_v41, 16  ;;  %v468_v53 = vshll.u32 %v336_v41, 16  ;;  %v339_v8 = vmax.bf16 %v159_v47, %v1264_v10 }
  0x8a   :  { %1101 = vst.msk [vmem:[%s1946_s1 + $0x8] sm:$0x3] %vm1096_vm0, %v1036_v49  ;;  %v454_v9 = vrot.slane %v453_v48, 4  ;;  %v476_v55 = vrot.slane %v474_v4, 4  ;;  %v479_v57 = vrot.slane %v477_v5, 5  ;;  %v338_v2 = vmax.bf16 %v157_v63, %v1269_v11 }
  0x8b   :  { %v1039_v54 = vmax.bf16 %v463_v51, %v335_v62  ;;  %v467_v3 = vrot.slane %v465_v52, 4  ;;  %v470_v56 = vrot.slane %v468_v53, 5  ;;  %v492_v45 = vshrl.u32 %v339_v8, 16 }
  0x8c   :  { %v1038_v50 = vmax.bf16 %v454_v9, %v334_v46  ;;  %v480_v0 = vor.u32 %v479_v57, %v476_v55  ;;  %v495_v1 = vshll.u32 %v339_v8, 16  ;;  %v483_v60 = vshrl.u32 %v338_v2, 16  ;;  %v163_v44 = vpop.permute.xlu1 %162  ;;  %v161_v10 = vpop.permute.xlu0 %160 }
  0x8d   :  { %1104 = vst.msk [vmem:[%s1946_s1 + $0xe] sm:$0x3] %vm1096_vm0, %v1039_v54  ;;  %v471_v43 = vor.u32 %v470_v56, %v467_v3  ;;  %v494_v42 = vrot.slane %v492_v45, 4  ;;  %v486_v58 = vshll.u32 %v338_v2, 16  ;;  %v341_v11 = vmax.bf16 %v163_v44, %v1278_v12 }
  0x8e   :  { %1103 = vst.msk [vmem:[%s1946_s1 + $0xc] sm:$0x3] %vm1096_vm0, %v1038_v50  ;;  %v481_v62 = vrot.slane %v480_v0, 4  ;;  %v497_v46 = vrot.slane %v495_v1, 5  ;;  %v485_v6 = vrot.slane %v483_v60, 4  ;;  %v340_v7 = vmax.bf16 %v161_v10, %v1283_v13 }
  0x8f   :  { %v472_v39 = vrot.slane %v471_v43, 4  ;;  %v488_v59 = vrot.slane %v486_v58, 5  ;;  %v510_v61 = vshrl.u32 %v341_v11, 16  ;;  %v513_v49 = vshll.u32 %v341_v11, 16 }
  0x90   :  { %v1041_v48 = vmax.bf16 %v481_v62, %v337_v40  ;;  %v498_v4 = vor.u32 %v497_v46, %v494_v42  ;;  %v501_v5 = vshrl.u32 %v340_v7, 16  ;;  %v504_v47 = vshll.u32 %v340_v7, 16  ;;  %v167_v63 = vpop.permute.xlu1 %166  ;;  %v165_v12 = vpop.permute.xlu0 %164 }
  0x91   :  { %v1040_v51 = vmax.bf16 %v472_v39, %v336_v41  ;;  %v489_v52 = vor.u32 %v488_v59, %v485_v6  ;;  %v512_v53 = vrot.slane %v510_v61, 4  ;;  %v515_v9 = vrot.slane %v513_v49, 5 }
  0x92   :  { %1106 = vst.msk [vmem:[%s1946_s1 + $0x12] sm:$0x3] %vm1096_vm0, %v1041_v48  ;;  %v499_v13 = vrot.slane %v498_v4, 4  ;;  %v503_v55 = vrot.slane %v501_v5, 4  ;;  %v506_v57 = vrot.slane %v504_v47, 5  ;;  %v343_v54 = vmax.bf16 %v167_v63, %v1292_v14 }
  0x93   :  { %1105 = vst.msk [vmem:[%s1946_s1 + $0x10] sm:$0x3] %vm1096_vm0, %v1040_v51  ;;  %v490_v40 = vrot.slane %v489_v52, 4  ;;  %v516_v41 = vor.u32 %v515_v9, %v512_v53  ;;  %v342_v3 = vmax.bf16 %v165_v12, %v1297_v15 }
  0x94   :  { %v1043_v56 = vmax.bf16 %v499_v13, %v339_v8  ;;  %v507_v45 = vor.u32 %v506_v57, %v503_v55  ;;  %v528_v50 = vshrl.u32 %v343_v54, 16  ;;  %v531_v0 = vshll.u32 %v343_v54, 16  ;;  %v171_v1 = vpop.permute.xlu1 %170  ;;  %v169_v60 = vpop.permute.xlu0 %168 }
  0x95   :  { %v1042_v44 = vmax.bf16 %v490_v40, %v338_v2  ;;  %v517_v10 = vrot.slane %v516_v41, 4  ;;  %v519_v43 = vshrl.u32 %v342_v3, 16  ;;  %v522_v42 = vshll.u32 %v342_v3, 16 }
  0x96   :  { %1108 = vst.msk [vmem:[%s1946_s1 + $0x16] sm:$0x3] %vm1096_vm0, %v1043_v56  ;;  %v508_v14 = vrot.slane %v507_v45, 4  ;;  %v530_v58 = vrot.slane %v528_v50, 4  ;;  %v533_v62 = vrot.slane %v531_v0, 5  ;;  %v345_v15 = vmax.bf16 %v171_v1, %v1306_v16 }
  0x97   :  { %1107 = vst.msk [vmem:[%s1946_s1 + $0x14] sm:$0x3] %vm1096_vm0, %v1042_v44  ;;  %v1045_v8 = vmax.bf16 %v517_v10, %v341_v11  ;;  %v521_v2 = vrot.slane %v519_v43, 4  ;;  %v524_v46 = vrot.slane %v522_v42, 5  ;;  %v344_v6 = vmax.bf16 %v169_v60, %v1311_v17 }
  0x98   :  { %v1044_v39 = vmax.bf16 %v508_v14, %v340_v7  ;;  %v534_v59 = vor.u32 %v533_v62, %v530_v58  ;;  %v546_v61 = vshrl.u32 %v345_v15, 16  ;;  %v549_v49 = vshll.u32 %v345_v15, 16  ;;  %v175_v48 = vpop.permute.xlu1 %174  ;;  %v173_v4 = vpop.permute.xlu0 %172 }
  0x99   :  { %1110 = vst.msk [vmem:[%s1946_s1 + $0x1a] sm:$0x3] %vm1096_vm0, %v1045_v8  ;;  %v525_v16 = vor.u32 %v524_v46, %v521_v2  ;;  %v537_v5 = vshrl.u32 %v344_v6, 16  ;;  %v540_v47 = vshll.u32 %v344_v6, 16  ;;  %v347_v11 = vmax.bf16 %v175_v48, %v1320_v18 }
  0x9a   :  { %1109 = vst.msk [vmem:[%s1946_s1 + $0x18] sm:$0x3] %vm1096_vm0, %v1044_v39  ;;  %v535_v17 = vrot.slane %v534_v59, 4  ;;  %v548_v7 = vrot.slane %v546_v61, 4  ;;  %v551_v63 = vrot.slane %v549_v49, 5  ;;  %v346_v12 = vmax.bf16 %v173_v4, %v1325_v19 }
  0x9b   :  { %v526_v51 = vrot.slane %v525_v16, 4  ;;  %v539_v52 = vrot.slane %v537_v5, 4  ;;  %v542_v53 = vrot.slane %v540_v47, 5  ;;  %v564_v9 = vshrl.u32 %v347_v11, 16 }
  0x9c   :  { %v1047_v13 = vmax.bf16 %v535_v17, %v343_v54  ;;  %v552_v55 = vor.u32 %v551_v63, %v548_v7  ;;  %v567_v57 = vshll.u32 %v347_v11, 16  ;;  %v555_v40 = vshrl.u32 %v346_v12, 16  ;;  %v179_v41 = vpop.permute.xlu1 %178  ;;  %v177_v18 = vpop.permute.xlu0 %176 }
  0x9d   :  { %v1046_v56 = vmax.bf16 %v526_v51, %v342_v3  ;;  %v543_v45 = vor.u32 %v542_v53, %v539_v52  ;;  %v566_v50 = vrot.slane %v564_v9, 4  ;;  %v558_v0 = vshll.u32 %v346_v12, 16 }
  0x9e   :  { %1112 = vst.msk [vmem:[%s1946_s1 + $0x1e] sm:$0x3] %vm1096_vm0, %v1047_v13  ;;  %v553_v19 = vrot.slane %v552_v55, 4  ;;  %v569_v1 = vrot.slane %v567_v57, 5  ;;  %v557_v60 = vrot.slane %v555_v40, 4  ;;  %v349_v44 = vmax.bf16 %v179_v41, %v1334_v20 }
  0x9f   :  { %1111 = vst.msk [vmem:[%s1946_s1 + $0x1c] sm:$0x3] %vm1096_vm0, %v1046_v56  ;;  %v544_v54 = vrot.slane %v543_v45, 4  ;;  %v560_v3 = vrot.slane %v558_v0, 5  ;;  %v348_v10 = vmax.bf16 %v177_v18, %v1339_v21 }
  0xa0   :  { %v1049_v43 = vmax.bf16 %v553_v19, %v345_v15  ;;  %v570_v42 = vor.u32 %v569_v1, %v566_v50  ;;  %v582_v14 = vshrl.u32 %v349_v44, 16  ;;  %v585_v58 = vshll.u32 %v349_v44, 16  ;;  %v183_v62 = vpop.permute.xlu1 %182  ;;  %v181_v8 = vpop.permute.xlu0 %180 }
  0xa1   :  { %v1048_v2 = vmax.bf16 %v544_v54, %v344_v6  ;;  %v561_v46 = vor.u32 %v560_v3, %v557_v60  ;;  %v573_v39 = vshrl.u32 %v348_v10, 16  ;;  %v576_v59 = vshll.u32 %v348_v10, 16 }
  0xa2   :  { %1114 = vst.msk [vmem:[%s1946_s1 + $0x22] sm:$0x3] %vm1096_vm0, %v1049_v43  ;;  %v571_v20 = vrot.slane %v570_v42, 4  ;;  %v584_v61 = vrot.slane %v582_v14, 4  ;;  %v587_v49 = vrot.slane %v585_v58, 5  ;;  %v351_v21 = vmax.bf16 %v183_v62, %v1348_v22 }
  0xa3   :  { %1113 = vst.msk [vmem:[%s1946_s1 + $0x20] sm:$0x3] %vm1096_vm0, %v1048_v2  ;;  %v562_v15 = vrot.slane %v561_v46, 4  ;;  %v575_v6 = vrot.slane %v573_v39, 4  ;;  %v578_v48 = vrot.slane %v576_v59, 5  ;;  %v350_v4 = vmax.bf16 %v181_v8, %v1353_v23 }
  0xa4   :  { %v1051_v16 = vmax.bf16 %v571_v20, %v347_v11  ;;  %v588_v5 = vor.u32 %v587_v49, %v584_v61  ;;  %v600_v47 = vshrl.u32 %v351_v21, 16  ;;  %v603_v17 = vshll.u32 %v351_v21, 16  ;;  %v187_v7 = vpop.permute.xlu1 %186  ;;  %v185_v63 = vpop.permute.xlu0 %184 }
  0xa5   :  { %v1050_v51 = vmax.bf16 %v562_v15, %v346_v12  ;;  %v579_v52 = vor.u32 %v578_v48, %v575_v6  ;;  %v591_v53 = vshrl.u32 %v350_v4, 16  ;;  %v594_v22 = vshll.u32 %v350_v4, 16 }
  0xa6   :  { %1116 = vst.msk [vmem:[%s1946_s1 + $0x26] sm:$0x3] %vm1096_vm0, %v1051_v16  ;;  %v589_v9 = vrot.slane %v588_v5, 4  ;;  %v602_v13 = vrot.slane %v600_v47, 4  ;;  %v605_v55 = vrot.slane %v603_v17, 5  ;;  %v353_v23 = vmax.bf16 %v187_v7, %v1362_v24 }
  0xa7   :  { %1115 = vst.msk [vmem:[%s1946_s1 + $0x24] sm:$0x3] %vm1096_vm0, %v1050_v51  ;;  %v580_v11 = vrot.slane %v579_v52, 4  ;;  %v593_v12 = vrot.slane %v591_v53, 4  ;;  %v596_v57 = vrot.slane %v594_v22, 5  ;;  %v352_v40 = vmax.bf16 %v185_v63, %v1367_v25 }
  0xa8   :  { %v1053_v41 = vmax.bf16 %v589_v9, %v349_v44  ;;  %v606_v18 = vor.u32 %v605_v55, %v602_v13  ;;  %v618_v56 = vshrl.u32 %v353_v23, 16  ;;  %v621_v45 = vshll.u32 %v353_v23, 16  ;;  %v191_v50 = vpop.permute.xlu1 %190  ;;  %v189_v0 = vpop.permute.xlu0 %188 }
  0xa9   :  { %v1052_v19 = vmax.bf16 %v580_v11, %v348_v10  ;;  %v597_v1 = vor.u32 %v596_v57, %v593_v12  ;;  %v609_v60 = vshrl.u32 %v352_v40, 16  ;;  %v612_v24 = vshll.u32 %v352_v40, 16 }
  0xaa   :  { %1118 = vst.msk [vmem:[%s1946_s1 + $0x2a] sm:$0x3] %vm1096_vm0, %v1053_v41  ;;  %v607_v54 = vrot.slane %v606_v18, 4  ;;  %v620_v3 = vrot.slane %v618_v56, 4  ;;  %v623_v43 = vrot.slane %v621_v45, 5  ;;  %v355_v25 = vmax.bf16 %v191_v50, %v1376_v26 }
  0xab   :  { %1117 = vst.msk [vmem:[%s1946_s1 + $0x28] sm:$0x3] %vm1096_vm0, %v1052_v19  ;;  %v598_v44 = vrot.slane %v597_v1, 4  ;;  %v611_v10 = vrot.slane %v609_v60, 4  ;;  %v614_v42 = vrot.slane %v612_v24, 5  ;;  %v354_v14 = vmax.bf16 %v189_v0, %v1381_v27 }
  0xac   :  { %v1055_v58 = vmax.bf16 %v607_v54, %v351_v21  ;;  %v624_v62 = vor.u32 %v623_v43, %v620_v3  ;;  %v636_v8 = vshrl.u32 %v355_v25, 16  ;;  %v639_v2 = vshll.u32 %v355_v25, 16  ;;  %v195_v46 = vpop.permute.xlu1 %194  ;;  %v193_v39 = vpop.permute.xlu0 %192 }
  0xad   :  { %v1054_v59 = vmax.bf16 %v598_v44, %v350_v4  ;;  %v615_v20 = vor.u32 %v614_v42, %v611_v10  ;;  %v627_v61 = vshrl.u32 %v354_v14, 16  ;;  %v630_v26 = vshll.u32 %v354_v14, 16 }
  0xae   :  { %1120 = vst.msk [vmem:[%s1946_s1 + $0x2e] sm:$0x3] %vm1096_vm0, %v1055_v58  ;;  %v625_v49 = vrot.slane %v624_v62, 4  ;;  %v638_v15 = vrot.slane %v636_v8, 4  ;;  %v641_v6 = vrot.slane %v639_v2, 5  ;;  %v357_v27 = vmax.bf16 %v195_v46, %v1390_v28 }
  0xaf   :  { %1119 = vst.msk [vmem:[%s1946_s1 + $0x2c] sm:$0x3] %vm1096_vm0, %v1054_v59  ;;  %v616_v21 = vrot.slane %v615_v20, 4  ;;  %v629_v48 = vrot.slane %v627_v61, 4  ;;  %v632_v4 = vrot.slane %v630_v26, 5  ;;  %v356_v16 = vmax.bf16 %v193_v39, %v1395_v29 }
  0xb0   :  { %v1057_v5 = vmax.bf16 %v625_v49, %v353_v23  ;;  %v642_v47 = vor.u32 %v641_v6, %v638_v15  ;;  %v654_v17 = vshrl.u32 %v357_v27, 16  ;;  %v657_v7 = vshll.u32 %v357_v27, 16  ;;  %v199_v63 = vpop.permute.xlu1 %198  ;;  %v197_v51 = vpop.permute.xlu0 %196 }
  0xb1   :  { %v1056_v52 = vmax.bf16 %v616_v21, %v352_v40  ;;  %v633_v53 = vor.u32 %v632_v4, %v629_v48  ;;  %v645_v22 = vshrl.u32 %v356_v16, 16  ;;  %v648_v28 = vshll.u32 %v356_v16, 16 }
  0xb2   :  { %1122 = vst.msk [vmem:[%s1946_s1 + $0x32] sm:$0x3] %vm1096_vm0, %v1057_v5  ;;  %v643_v9 = vrot.slane %v642_v47, 4  ;;  %v656_v13 = vrot.slane %v654_v17, 4  ;;  %v659_v55 = vrot.slane %v657_v7, 5  ;;  %v359_v29 = vmax.bf16 %v199_v63, %v1404_v30 }
  0xb3   :  { %1121 = vst.msk [vmem:[%s1946_s1 + $0x30] sm:$0x3] %vm1096_vm0, %v1056_v52  ;;  %v634_v23 = vrot.slane %v633_v53, 4  ;;  %v647_v11 = vrot.slane %v645_v22, 4  ;;  %v650_v12 = vrot.slane %v648_v28, 5  ;;  %v358_v57 = vmax.bf16 %v197_v51, %v1409_v31 }
  0xb4   :  { %v1059_v40 = vmax.bf16 %v643_v9, %v355_v25  ;;  %v660_v41 = vor.u32 %v659_v55, %v656_v13  ;;  %v672_v18 = vshrl.u32 %v359_v29, 16  ;;  %v675_v56 = vshll.u32 %v359_v29, 16  ;;  %v203_v45 = vpop.permute.xlu1 %202  ;;  %v201_v50 = vpop.permute.xlu0 %200 }
  0xb5   :  { %v1058_v0 = vmax.bf16 %v634_v23, %v354_v14  ;;  %v651_v19 = vor.u32 %v650_v12, %v647_v11  ;;  %v663_v1 = vshrl.u32 %v358_v57, 16  ;;  %v666_v30 = vshll.u32 %v358_v57, 16 }
  0xb6   :  { %1124 = vst.msk [vmem:[%s1946_s1 + $0x36] sm:$0x3] %vm1096_vm0, %v1059_v40  ;;  %v661_v60 = vrot.slane %v660_v41, 4  ;;  %v674_v24 = vrot.slane %v672_v18, 4  ;;  %v677_v54 = vrot.slane %v675_v56, 5  ;;  %v361_v31 = vmax.bf16 %v203_v45, %v1418_v32 }
  0xb7   :  { %1123 = vst.msk [vmem:[%s1946_s1 + $0x34] sm:$0x3] %vm1096_vm0, %v1058_v0  ;;  %v652_v3 = vrot.slane %v651_v19, 4  ;;  %v665_v43 = vrot.slane %v663_v1, 4  ;;  %v668_v25 = vrot.slane %v666_v30, 5  ;;  %v360_v44 = vmax.bf16 %v201_v50, %v1423_v33  ;;  %v1969_v1 = vld [vmem:[#allocation2_spill] sm:$0xff] }
  0xb8   :  { %v1061_v10 = vmax.bf16 %v661_v60, %v357_v27  ;;  %v678_v42 = vor.u32 %v677_v54, %v674_v24  ;;  %v690_v14 = vshrl.u32 %v361_v31, 16  ;;  %v693_v58 = vshll.u32 %v361_v31, 16  ;;  %v207_v62 = vpop.permute.xlu1 %206  ;;  %v205_v8 = vpop.permute.xlu0 %204 }
  0xb9   :  { %v1060_v2 = vmax.bf16 %v652_v3, %v356_v16  ;;  %v669_v46 = vor.u32 %v668_v25, %v665_v43  ;;  %v681_v39 = vshrl.u32 %v360_v44, 16  ;;  %v684_v32 = vshll.u32 %v360_v44, 16 }
  0xba   :  { %1126 = vst.msk [vmem:[%s1946_s1 + $0x3a] sm:$0x3] %vm1096_vm0, %v1061_v10  ;;  %v679_v59 = vrot.slane %v678_v42, 4  ;;  %v692_v20 = vrot.slane %v690_v14, 4  ;;  %v695_v61 = vrot.slane %v693_v58, 5  ;;  %v363_v33 = vmax.bf16 %v207_v62, %v1432_v34  ;;  %v1970_v62 = vld [vmem:[#allocation3_spill] sm:$0xff] }
  0xbb   :  { %1125 = vst.msk [vmem:[%s1946_s1 + $0x38] sm:$0x3] %vm1096_vm0, %v1060_v2  ;;  %v670_v26 = vrot.slane %v669_v46, 4  ;;  %v683_v49 = vrot.slane %v681_v39, 4  ;;  %v686_v15 = vrot.slane %v684_v32, 5  ;;  %v362_v6 = vmax.bf16 %v205_v8, %v1437_v35  ;;  %v1971_v32 = vld [vmem:[#allocation4_spill] sm:$0xff] }
  0xbc   :  { %v1063_v27 = vmax.bf16 %v679_v59, %v359_v29  ;;  %v696_v21 = vor.u32 %v695_v61, %v692_v20  ;;  %v708_v48 = vshrl.u32 %v363_v33, 16  ;;  %v711_v4 = vshll.u32 %v363_v33, 16  ;;  %v211_v16 = vpop.permute.xlu1 %210  ;;  %v209_v5 = vpop.permute.xlu0 %208 }
  0xbd   :  { %v1062_v47 = vmax.bf16 %v670_v26, %v358_v57  ;;  %v687_v17 = vor.u32 %v686_v15, %v683_v49  ;;  %v699_v7 = vshrl.u32 %v362_v6, 16  ;;  %v702_v34 = vshll.u32 %v362_v6, 16 }
  0xbe   :  { %1128 = vst.msk [vmem:[%s1946_s1 + $0x3e] sm:$0x3] %vm1096_vm0, %v1063_v27  ;;  %v697_v63 = vrot.slane %v696_v21, 4  ;;  %v710_v51 = vrot.slane %v708_v48, 4  ;;  %v713_v52 = vrot.slane %v711_v4, 5  ;;  %v365_v35 = vmax.bf16 %v211_v16, %v1446_v36 }
  0xbf   :  { %1127 = vst.msk [vmem:[%s1946_s1 + $0x3c] sm:$0x3] %vm1096_vm0, %v1062_v47  ;;  %v688_v53 = vrot.slane %v687_v17, 4  ;;  %v701_v22 = vrot.slane %v699_v7, 4  ;;  %v704_v28 = vrot.slane %v702_v34, 5  ;;  %v364_v9 = vmax.bf16 %v209_v5, %v1451_v37  ;;  %v1972_v47 = vld [vmem:[#allocation5_spill] sm:$0xff] }
  0xc0   :  { %v1065_v13 = vmax.bf16 %v697_v63, %v361_v31  ;;  %v714_v55 = vor.u32 %v713_v52, %v710_v51  ;;  %v726_v29 = vshrl.u32 %v365_v35, 16  ;;  %v729_v23 = vshll.u32 %v365_v35, 16  ;;  %v215_v11 = vpop.permute.xlu1 %214  ;;  %v213_v12 = vpop.permute.xlu0 %212  ;;  %v1973_v51 = vld [vmem:[#allocation6_spill] sm:$0xff] }
  0xc1   :  { %v1064_v57 = vmax.bf16 %v688_v53, %v360_v44  ;;  %v705_v40 = vor.u32 %v704_v28, %v701_v22  ;;  %v717_v41 = vshrl.u32 %v364_v9, 16  ;;  %v720_v36 = vshll.u32 %v364_v9, 16 }
  0xc2   :  { %1130 = vst.msk [vmem:[%s1946_s1 + $0x42] sm:$0x3] %vm1096_vm0, %v1065_v13  ;;  %v715_v18 = vrot.slane %v714_v55, 4  ;;  %v728_v56 = vrot.slane %v726_v29, 4  ;;  %v731_v45 = vrot.slane %v729_v23, 5  ;;  %v367_v37 = vmax.bf16 %v215_v11, %v1460_v38 }
  0xc3   :  { %1129 = vst.msk [vmem:[%s1946_s1 + $0x40] sm:$0x3] %vm1096_vm0, %v1064_v57  ;;  %v706_v50 = vrot.slane %v705_v40, 4  ;;  %v719_v0 = vrot.slane %v717_v41, 4  ;;  %v722_v19 = vrot.slane %v720_v36, 5  ;;  %v366_v30 = vmax.bf16 %v213_v12, %v1969_v1  ;;  %v1974_v41 = vld [vmem:[#allocation7_spill] sm:$0xff] }
  0xc4   :  { %v1067_v60 = vmax.bf16 %v715_v18, %v363_v33  ;;  %v732_v24 = vor.u32 %v731_v45, %v728_v56  ;;  %v744_v54 = vshrl.u32 %v367_v37, 16  ;;  %v747_v31 = vshll.u32 %v367_v37, 16  ;;  %v219_v3 = vpop.permute.xlu1 %218  ;;  %v217_v43 = vpop.permute.xlu0 %216 }
  0xc5   :  { %v1066_v25 = vmax.bf16 %v706_v50, %v362_v6  ;;  %v723_v44 = vor.u32 %v722_v19, %v719_v0  ;;  %v735_v10 = vshrl.u32 %v366_v30, 16  ;;  %v738_v38 = vshll.u32 %v366_v30, 16 }
  0xc6   :  { %1132 = vst.msk [vmem:[%s1946_s1 + $0x46] sm:$0x3] %vm1096_vm0, %v1067_v60  ;;  %v733_v42 = vrot.slane %v732_v24, 4  ;;  %v746_v14 = vrot.slane %v744_v54, 4  ;;  %v749_v58 = vrot.slane %v747_v31, 5  ;;  %v369_v8 = vmax.bf16 %v219_v3, %v1970_v62 }
  0xc7   :  { %1131 = vst.msk [vmem:[%s1946_s1 + $0x44] sm:$0x3] %vm1096_vm0, %v1066_v25  ;;  %v724_v2 = vrot.slane %v723_v44, 4  ;;  %v737_v46 = vrot.slane %v735_v10, 4  ;;  %v740_v39 = vrot.slane %v738_v38, 5  ;;  %v368_v59 = vmax.bf16 %v217_v43, %v1971_v32  ;;  %v1976_v38 = vld [vmem:[#allocation9_spill] sm:$0xff] }
  0xc8   :  { %v1069_v20 = vmax.bf16 %v733_v42, %v365_v35  ;;  %v750_v61 = vor.u32 %v749_v58, %v746_v14  ;;  %v762_v33 = vshrl.u32 %v369_v8, 16  ;;  %v765_v26 = vshll.u32 %v369_v8, 16  ;;  %v223_v49 = vpop.permute.xlu1 %222  ;;  %v221_v15 = vpop.permute.xlu0 %220 }
  0xc9   :  { %v1068_v6 = vmax.bf16 %v724_v2, %v364_v9  ;;  %v741_v27 = vor.u32 %v740_v39, %v737_v46  ;;  %v753_v21 = vshrl.u32 %v368_v59, 16  ;;  %v756_v48 = vshll.u32 %v368_v59, 16 }
  0xca   :  { %1134 = vst.msk [vmem:[%s1946_s1 + $0x4a] sm:$0x3] %vm1096_vm0, %v1069_v20  ;;  %v751_v4 = vrot.slane %v750_v61, 4  ;;  %v764_v16 = vrot.slane %v762_v33, 4  ;;  %v767_v5 = vrot.slane %v765_v26, 5  ;;  %v371_v17 = vmax.bf16 %v223_v49, %v1972_v47 }
  0xcb   :  { %1133 = vst.msk [vmem:[%s1946_s1 + $0x48] sm:$0x3] %vm1096_vm0, %v1068_v6  ;;  %v742_v7 = vrot.slane %v741_v27, 4  ;;  %v755_v34 = vrot.slane %v753_v21, 4  ;;  %v758_v63 = vrot.slane %v756_v48, 5  ;;  %v370_v52 = vmax.bf16 %v221_v15, %v1973_v51  ;;  %v1978_v48 = vld [vmem:[#allocation11_spill] sm:$0xff] }
  0xcc   :  { %v1071_v35 = vmax.bf16 %v751_v4, %v367_v37  ;;  %v768_v53 = vor.u32 %v767_v5, %v764_v16  ;;  %v780_v22 = vshrl.u32 %v371_v17, 16  ;;  %v783_v28 = vshll.u32 %v371_v17, 16  ;;  %v227_v9 = vpop.permute.xlu1 %226  ;;  %v225_v13 = vpop.permute.xlu0 %224  ;;  %v1975_v37 = vld [vmem:[#allocation8_spill] sm:$0xff] }
  0xcd   :  { %v1070_v55 = vmax.bf16 %v742_v7, %v366_v30  ;;  %v759_v29 = vor.u32 %v758_v63, %v755_v34  ;;  %v771_v23 = vshrl.u32 %v370_v52, 16  ;;  %v774_v11 = vshll.u32 %v370_v52, 16 }
  0xce   :  { %1136 = vst.msk [vmem:[%s1946_s1 + $0x4e] sm:$0x3] %vm1096_vm0, %v1071_v35  ;;  %v769_v12 = vrot.slane %v768_v53, 4  ;;  %v782_v57 = vrot.slane %v780_v22, 4  ;;  %v785_v40 = vrot.slane %v783_v28, 5  ;;  %v373_v36 = vmax.bf16 %v227_v9, %v1974_v41 }
  0xcf   :  { %1135 = vst.msk [vmem:[%s1946_s1 + $0x4c] sm:$0x3] %vm1096_vm0, %v1070_v55  ;;  %v760_v18 = vrot.slane %v759_v29, 4  ;;  %v773_v56 = vrot.slane %v771_v23, 4  ;;  %v776_v45 = vrot.slane %v774_v11, 5  ;;  %v372_v50 = vmax.bf16 %v225_v13, %v1975_v37 }
  0xd0   :  { %v1073_v0 = vmax.bf16 %v769_v12, %v369_v8  ;;  %v786_v19 = vor.u32 %v785_v40, %v782_v57  ;;  %v798_v1 = vshrl.u32 %v373_v36, 16  ;;  %v801_v30 = vshll.u32 %v373_v36, 16  ;;  %v231_v60 = vpop.permute.xlu1 %230  ;;  %v229_v24 = vpop.permute.xlu0 %228  ;;  %v1977_v8 = vld [vmem:[#allocation10_spill] sm:$0xff]  ;;  %v1166_v11 = vld [vmem:[%s1945_s0 + $0xcc] sm:$0x7] }
  0xd1   :  { %v1072_v54 = vmax.bf16 %v760_v18, %v368_v59  ;;  %v777_v31 = vor.u32 %v776_v45, %v773_v56  ;;  %v789_v3 = vshrl.u32 %v372_v50, 16  ;;  %v792_v43 = vshll.u32 %v372_v50, 16 }
  0xd2   :  { %1138 = vst.msk [vmem:[%s1946_s1 + $0x52] sm:$0x3] %vm1096_vm0, %v1073_v0  ;;  %v787_v25 = vrot.slane %v786_v19, 4  ;;  %v800_v44 = vrot.slane %v798_v1, 4  ;;  %v803_v10 = vrot.slane %v801_v30, 5  ;;  %v375_v42 = vmax.bf16 %v231_v60, %v1976_v38 }
  0xd3   :  { %1137 = vst.msk [vmem:[%s1946_s1 + $0x50] sm:$0x3] %vm1096_vm0, %v1072_v54  ;;  %v778_v14 = vrot.slane %v777_v31, 4  ;;  %v791_v58 = vrot.slane %v789_v3, 4  ;;  %v794_v62 = vrot.slane %v792_v43, 5  ;;  %v374_v2 = vmax.bf16 %v229_v24, %v1977_v8 }
  0xd4   :  { %v1075_v46 = vmax.bf16 %v787_v25, %v371_v17  ;;  %v804_v39 = vor.u32 %v803_v10, %v800_v44  ;;  %v816_v32 = vshrl.u32 %v375_v42, 16  ;;  %v819_v59 = vshll.u32 %v375_v42, 16  ;;  %v235_v20 = vpop.permute.xlu1 %234  ;;  %v233_v61 = vpop.permute.xlu0 %232  ;;  %v1979_v17 = vld [vmem:[#allocation12_spill] sm:$0xff] }
  0xd5   :  { %v1074_v33 = vmax.bf16 %v778_v14, %v370_v52  ;;  %v795_v26 = vor.u32 %v794_v62, %v791_v58  ;;  %v807_v49 = vshrl.u32 %v374_v2, 16  ;;  %v810_v15 = vshll.u32 %v374_v2, 16  ;;  %v1168_v43 = vld [vmem:[%s1945_s0 + $0xd4] sm:$0x7] }
  0xd6   :  { %1140 = vst.msk [vmem:[%s1946_s1 + $0x56] sm:$0x3] %vm1096_vm0, %v1075_v46  ;;  %v805_v6 = vrot.slane %v804_v39, 4  ;;  %v818_v27 = vrot.slane %v816_v32, 4  ;;  %v821_v21 = vrot.slane %v819_v59, 5  ;;  %v377_v4 = vmax.bf16 %v235_v20, %v1978_v48 }
  0xd7   :  { %1139 = vst.msk [vmem:[%s1946_s1 + $0x54] sm:$0x3] %vm1096_vm0, %v1074_v33  ;;  %v796_v16 = vrot.slane %v795_v26, 4  ;;  %v809_v5 = vrot.slane %v807_v49, 4  ;;  %v812_v47 = vrot.slane %v810_v15, 5  ;;  %v376_v7 = vmax.bf16 %v233_v61, %v1979_v17 }
  0xd8   :  { %v1077_v34 = vmax.bf16 %v805_v6, %v373_v36  ;;  %v822_v63 = vor.u32 %v821_v21, %v818_v27  ;;  %v834_v51 = vshrl.u32 %v377_v4, 16  ;;  %v837_v52 = vshll.u32 %v377_v4, 16  ;;  %v239_v35 = vpop.permute.xlu1 %238  ;;  %v237_v53 = vpop.permute.xlu0 %236  ;;  %v1167_v36 = vld [vmem:[%s1945_s0 + $0xc8] sm:$0x7]  ;;  %v1170_v15 = vld [vmem:[%s1945_s0 + $0xdc] sm:$0x7] }
  0xd9   :  { %v1076_v22 = vmax.bf16 %v796_v16, %v372_v50  ;;  %v813_v28 = vor.u32 %v812_v47, %v809_v5  ;;  %v825_v9 = vshrl.u32 %v376_v7, 16  ;;  %v828_v13 = vshll.u32 %v376_v7, 16 }
  0xda   :  { %1142 = vst.msk [vmem:[%s1946_s1 + $0x5a] sm:$0x3] %vm1096_vm0, %v1077_v34  ;;  %v823_v55 = vrot.slane %v822_v63, 4  ;;  %v836_v29 = vrot.slane %v834_v51, 4  ;;  %v839_v23 = vrot.slane %v837_v52, 5  ;;  %v379_v12 = vmax.bf16 %v1166_v11, %v239_v35 }
  0xdb   :  { %1141 = vst.msk [vmem:[%s1946_s1 + $0x58] sm:$0x3] %vm1096_vm0, %v1076_v22  ;;  %v814_v57 = vrot.slane %v813_v28, 4  ;;  %v827_v40 = vrot.slane %v825_v9, 4  ;;  %v830_v41 = vrot.slane %v828_v13, 5  ;;  %v378_v18 = vmax.bf16 %v1167_v36, %v237_v53 }
  0xdc   :  { %v1079_v56 = vmax.bf16 %v823_v55, %v375_v42  ;;  %v840_v45 = vor.u32 %v839_v23, %v836_v29  ;;  %v852_v37 = vshrl.u32 %v379_v12, 16  ;;  %v855_v50 = vshll.u32 %v379_v12, 16  ;;  %v243_v0 = vpop.permute.xlu1 %242  ;;  %v241_v19 = vpop.permute.xlu0 %240  ;;  %v1169_v42 = vld [vmem:[%s1945_s0 + $0xd0] sm:$0x7]  ;;  %v1172_v13 = vld [vmem:[%s1945_s0 + $0xe4] sm:$0x7] }
  0xdd   :  { %v1078_v1 = vmax.bf16 %v814_v57, %v374_v2  ;;  %v831_v30 = vor.u32 %v830_v41, %v827_v40  ;;  %v843_v60 = vshrl.u32 %v378_v18, 16  ;;  %v846_v24 = vshll.u32 %v378_v18, 16 }
  0xde   :  { %1144 = vst.msk [vmem:[%s1946_s1 + $0x5e] sm:$0x3] %vm1096_vm0, %v1079_v56  ;;  %v841_v54 = vrot.slane %v840_v45, 4  ;;  %v854_v31 = vrot.slane %v852_v37, 4  ;;  %v857_v3 = vrot.slane %v855_v50, 5  ;;  %v381_v25 = vmax.bf16 %v1168_v43, %v243_v0 }
  0xdf   :  { %1143 = vst.msk [vmem:[%s1946_s1 + $0x5c] sm:$0x3] %vm1096_vm0, %v1078_v1  ;;  %v832_v44 = vrot.slane %v831_v30, 4  ;;  %v845_v10 = vrot.slane %v843_v60, 4  ;;  %v848_v38 = vrot.slane %v846_v24, 5  ;;  %v380_v14 = vmax.bf16 %v1169_v42, %v241_v19 }
  0xe0   :  { %v1081_v58 = vmax.bf16 %v841_v54, %v377_v4  ;;  %v858_v62 = vor.u32 %v857_v3, %v854_v31  ;;  %v870_v8 = vshrl.u32 %v381_v25, 16  ;;  %v873_v2 = vshll.u32 %v381_v25, 16  ;;  %v247_v46 = vpop.permute.xlu1 %246  ;;  %v245_v39 = vpop.permute.xlu0 %244  ;;  %v1171_v4 = vld [vmem:[%s1945_s0 + $0xd8] sm:$0x7]  ;;  %v1174_v24 = vld [vmem:[%s1945_s0 + $0xec] sm:$0x7] }
  0xe1   :  { %v1080_v32 = vmax.bf16 %v832_v44, %v376_v7  ;;  %v849_v59 = vor.u32 %v848_v38, %v845_v10  ;;  %v861_v20 = vshrl.u32 %v380_v14, 16  ;;  %v864_v61 = vshll.u32 %v380_v14, 16 }
  0xe2   :  { %1146 = vst.msk [vmem:[%s1946_s1 + $0x62] sm:$0x3] %vm1096_vm0, %v1081_v58  ;;  %v859_v33 = vrot.slane %v858_v62, 4  ;;  %v872_v26 = vrot.slane %v870_v8, 4  ;;  %v875_v49 = vrot.slane %v873_v2, 5  ;;  %v383_v6 = vmax.bf16 %v1170_v15, %v247_v46 }
  0xe3   :  { %1145 = vst.msk [vmem:[%s1946_s1 + $0x60] sm:$0x3] %vm1096_vm0, %v1080_v32  ;;  %v850_v27 = vrot.slane %v849_v59, 4  ;;  %v863_v21 = vrot.slane %v861_v20, 4  ;;  %v866_v48 = vrot.slane %v864_v61, 5  ;;  %v382_v16 = vmax.bf16 %v1171_v4, %v245_v39 }
  0xe4   :  { %v1083_v5 = vmax.bf16 %v859_v33, %v379_v12  ;;  %v876_v47 = vor.u32 %v875_v49, %v872_v26  ;;  %v888_v17 = vshrl.u32 %v383_v6, 16  ;;  %v891_v7 = vshll.u32 %v383_v6, 16  ;;  %v251_v34 = vpop.permute.xlu1 %250  ;;  %v249_v63 = vpop.permute.xlu0 %248  ;;  %v1173_v12 = vld [vmem:[%s1945_s0 + $0xe0] sm:$0x7]  ;;  %v1176_v61 = vld [vmem:[%s1945_s0 + $0xf4] sm:$0x7] }
  0xe5   :  { %v1082_v51 = vmax.bf16 %v850_v27, %v378_v18  ;;  %v867_v52 = vor.u32 %v866_v48, %v863_v21  ;;  %v879_v35 = vshrl.u32 %v382_v16, 16  ;;  %v882_v53 = vshll.u32 %v382_v16, 16 }
  0xe6   :  { %1148 = vst.msk [vmem:[%s1946_s1 + $0x66] sm:$0x3] %vm1096_vm0, %v1083_v5  ;;  %v877_v22 = vrot.slane %v876_v47, 4  ;;  %v890_v28 = vrot.slane %v888_v17, 4  ;;  %v893_v9 = vrot.slane %v891_v7, 5  ;;  %v385_v55 = vmax.bf16 %v1172_v13, %v251_v34 }
  0xe7   :  { %1147 = vst.msk [vmem:[%s1946_s1 + $0x64] sm:$0x3] %vm1096_vm0, %v1082_v51  ;;  %v868_v29 = vrot.slane %v867_v52, 4  ;;  %v881_v23 = vrot.slane %v879_v35, 4  ;;  %v884_v11 = vrot.slane %v882_v53, 5  ;;  %v384_v57 = vmax.bf16 %v1173_v12, %v249_v63 }
  0xe8   :  { %v1085_v40 = vmax.bf16 %v877_v22, %v381_v25  ;;  %v894_v41 = vor.u32 %v893_v9, %v890_v28  ;;  %v906_v36 = vshrl.u32 %v385_v55, 16  ;;  %v909_v18 = vshll.u32 %v385_v55, 16  ;;  %v255_v56 = vpop.permute.xlu1 %254  ;;  %v253_v45 = vpop.permute.xlu0 %252  ;;  %v1175_v25 = vld [vmem:[%s1945_s0 + $0xe8] sm:$0x7]  ;;  %v1178_v53 = vld [vmem:[%s1945_s0 + $0xfc] sm:$0x7] }
  0xe9   :  { %v1084_v37 = vmax.bf16 %v868_v29, %v380_v14  ;;  %v885_v50 = vor.u32 %v884_v11, %v881_v23  ;;  %v897_v0 = vshrl.u32 %v384_v57, 16  ;;  %v900_v19 = vshll.u32 %v384_v57, 16 }
  0xea   :  { %1150 = vst.msk [vmem:[%s1946_s1 + $0x6a] sm:$0x3] %vm1096_vm0, %v1085_v40  ;;  %v895_v1 = vrot.slane %v894_v41, 4  ;;  %v908_v30 = vrot.slane %v906_v36, 4  ;;  %v911_v60 = vrot.slane %v909_v18, 5  ;;  %v387_v54 = vmax.bf16 %v1174_v24, %v255_v56 }
  0xeb   :  { %1149 = vst.msk [vmem:[%s1946_s1 + $0x68] sm:$0x3] %vm1096_vm0, %v1084_v37  ;;  %v886_v31 = vrot.slane %v885_v50, 4  ;;  %v899_v3 = vrot.slane %v897_v0, 4  ;;  %v902_v43 = vrot.slane %v900_v19, 5  ;;  %v386_v44 = vmax.bf16 %v1175_v25, %v253_v45 }
  0xec   :  { %v1087_v10 = vmax.bf16 %v895_v1, %v383_v6  ;;  %v912_v38 = vor.u32 %v911_v60, %v908_v30  ;;  %v924_v42 = vshrl.u32 %v387_v54, 16  ;;  %v927_v14 = vshll.u32 %v387_v54, 16  ;;  %v259_v58 = vpop.permute.xlu1 %258  ;;  %v257_v62 = vpop.permute.xlu0 %256  ;;  %v1177_v6 = vld [vmem:[%s1945_s0 + $0xf0] sm:$0x7] }
  0xed   :  { %v1086_v8 = vmax.bf16 %v886_v31, %v382_v16  ;;  %v903_v2 = vor.u32 %v902_v43, %v899_v3  ;;  %v915_v46 = vshrl.u32 %v386_v44, 16  ;;  %v918_v39 = vshll.u32 %v386_v44, 16 }
  0xee   :  { %1152 = vst.msk [vmem:[%s1946_s1 + $0x6e] sm:$0x3] %vm1096_vm0, %v1087_v10  ;;  %v913_v32 = vrot.slane %v912_v38, 4  ;;  %v926_v59 = vrot.slane %v924_v42, 4  ;;  %v929_v20 = vrot.slane %v927_v14, 5  ;;  %v389_v33 = vmax.bf16 %v1176_v61, %v259_v58 }
  0xef   :  { %1151 = vst.msk [vmem:[%s1946_s1 + $0x6c] sm:$0x3] %vm1096_vm0, %v1086_v8  ;;  %v904_v26 = vrot.slane %v903_v2, 4  ;;  %v917_v49 = vrot.slane %v915_v46, 4  ;;  %v920_v15 = vrot.slane %v918_v39, 5  ;;  %v388_v27 = vmax.bf16 %v1177_v6, %v257_v62 }
  0xf0   :  { %v1089_v21 = vmax.bf16 %v913_v32, %v385_v55  ;;  %v930_v48 = vor.u32 %v929_v20, %v926_v59  ;;  %v942_v4 = vshrl.u32 %v389_v33, 16  ;;  %v945_v16 = vshll.u32 %v389_v33, 16  ;;  %v263_v5 = vpop.permute.xlu1 %262  ;;  %v261_v47 = vpop.permute.xlu0 %260  ;;  %v1179_v55 = vld [vmem:[%s1945_s0 + $0xf8] sm:$0x7] }
  0xf1   :  { %v1088_v17 = vmax.bf16 %v904_v26, %v384_v57  ;;  %v921_v7 = vor.u32 %v920_v15, %v917_v49  ;;  %v933_v34 = vshrl.u32 %v388_v27, 16  ;;  %v936_v63 = vshll.u32 %v388_v27, 16 }
  0xf2   :  { %1154 = vst.msk [vmem:[%s1946_s1 + $0x72] sm:$0x3] %vm1096_vm0, %v1089_v21  ;;  %v931_v51 = vrot.slane %v930_v48, 4  ;;  %v944_v52 = vrot.slane %v942_v4, 4  ;;  %v947_v35 = vrot.slane %v945_v16, 5  ;;  %v391_v22 = vmax.bf16 %v1178_v53, %v263_v5 }
  0xf3   :  { %1153 = vst.msk [vmem:[%s1946_s1 + $0x70] sm:$0x3] %vm1096_vm0, %v1088_v17  ;;  %v922_v28 = vrot.slane %v921_v7, 4  ;;  %v935_v9 = vrot.slane %v933_v34, 4  ;;  %v938_v13 = vrot.slane %v936_v63, 5  ;;  %v390_v29 = vmax.bf16 %v1179_v55, %v261_v47 }
  0xf4   :  { %v1091_v23 = vmax.bf16 %v931_v51, %v387_v54  ;;  %v948_v11 = vor.u32 %v947_v35, %v944_v52  ;;  %v960_v12 = vshrl.u32 %v391_v22, 16  ;;  %v963_v57 = vshll.u32 %v391_v22, 16 }
  0xf5   :  { %v1090_v40 = vmax.bf16 %v922_v28, %v386_v44  ;;  %v939_v41 = vor.u32 %v938_v13, %v935_v9  ;;  %v951_v36 = vshrl.u32 %v390_v29, 16  ;;  %v954_v18 = vshll.u32 %v390_v29, 16 }
  0xf6   :  { %1156 = vst.msk [vmem:[%s1946_s1 + $0x76] sm:$0x3] %vm1096_vm0, %v1091_v23  ;;  %v949_v56 = vrot.slane %v948_v11, 4  ;;  %v962_v45 = vrot.slane %v960_v12, 4  ;;  %v965_v37 = vrot.slane %v963_v57, 5 }
  0xf7   :  { %1155 = vst.msk [vmem:[%s1946_s1 + $0x74] sm:$0x3] %vm1096_vm0, %v1090_v40  ;;  %v940_v50 = vrot.slane %v939_v41, 4  ;;  %v953_v0 = vrot.slane %v951_v36, 4  ;;  %v956_v19 = vrot.slane %v954_v18, 5 }
  0xf8   :  { %v1093_v1 = vmax.bf16 %v949_v56, %v389_v33  ;;  %v966_v30 = vor.u32 %v965_v37, %v962_v45 }
  0xf9   :  { %v1092_v60 = vmax.bf16 %v940_v50, %v388_v27  ;;  %v957_v24 = vor.u32 %v956_v19, %v953_v0 }
  0xfa   :  { %1158 = vst.msk [vmem:[%s1946_s1 + $0x7a] sm:$0x3] %vm1096_vm0, %v1093_v1  ;;  %v967_v54 = vrot.slane %v966_v30, 4 }
  0xfb   :  { %1157 = vst.msk [vmem:[%s1946_s1 + $0x78] sm:$0x3] %vm1096_vm0, %v1092_v60  ;;  %v958_v31 = vrot.slane %v957_v24, 4 }
  0xfc   :  { %v1095_v3 = vmax.bf16 %v967_v54, %v391_v22 }
  0xfd   :  { %v1094_v43 = vmax.bf16 %v958_v31, %v390_v29 }
  0xfe   :  { %1160 = vst.msk [vmem:[%s1946_s1 + $0x7e] sm:$0x3] %vm1096_vm0, %v1095_v3 }
  0xff   :  { %1159 = vst.msk [vmem:[%s1946_s1 + $0x7c] sm:$0x3] %vm1096_vm0, %v1094_v43 }

// kernel: sample_convnet_forward.9
= control target key start
LH: loop header
LB: loop body
LE: loop exit
PB: predicated region body
PF: predicated region fallthrough
CT: control target
= control target key end

     0   :  { %v684_v1 = vmov 0   ;;  %v685_v47 = vmov 0.0   ;;  %vm686_vm0 = vmmov 0   ;;  %vm472_vm1 = vcmask 261120   ;;  %s864_s4 = inlined_call_operand.vmem [shape: bf16[512,2], index: 4, kind: input, shape index: {}]   ;;  %s865_s0 = inlined_call_operand.vmem [shape: bf16[32,512], index: 0, kind: input, shape index: {}]   ;;  %s866_s1 = inlined_call_operand.vmem [shape: f32[32,1], index: 1, kind: input, shape index: {}]   ;;  %s867_s3 = inlined_call_operand.vmem [shape: f32[10,1], index: 3, kind: input, shape index: {}]   ;;  %s868_s2 = inlined_call_operand.vmem [shape: bf16[10,32], index: 2, kind: input, shape index: {}]   ;;  %s869_s5 = inlined_call_operand.vmem [shape: f32[10,2], index: 5, kind: output, shape index: {}]  }
   0x1   :  { %v639_v0 = vld [vmem:[%s864_s4 + $0x78] sm:$0xff]   ;;  %638 = vset.pattern.permute.xlu1 %v684_v1  ;;  %637 = vset.pattern.permute.xlu0 %v684_v1  ;;  %v643_v5 = vld [vmem:[%s864_s4 + $0x70] sm:$0xff]   ;;  %v647_v9 = vld [vmem:[%s864_s4 + $0x68] sm:$0xff]   ;;  %vm517_vm2 = vcmask 15360   ;;  %vm519_vm3 = vcmask 9216  }
   0x2   :  { %v640_v2 = vld [vmem:[%s864_s4 + $0xf8] sm:$0xff]   ;;  %567 = vmatprep.subr.bf16.mxu0 %v639_v0  ;;  %v644_v6 = vld [vmem:[%s864_s4 + $0xf0] sm:$0xff]   ;;  %v648_v10 = vld [vmem:[%s864_s4 + $0xe8] sm:$0xff]  }
   0x3   :  { %v641_v3 = vld [vmem:[%s864_s4 + $0x38] sm:$0xff]   ;;  %595 = vmatprep.subr.bf16.mxu1 %v640_v2  ;;  %v645_v7 = vld [vmem:[%s864_s4 + $0x30] sm:$0xff]   ;;  %v649_v11 = vld [vmem:[%s864_s4 + $0x28] sm:$0xff]  }
   0x4   :  { %v642_v4 = vld [vmem:[%s864_s4 + $0xb8] sm:$0xff]   ;;  %568 = vmatpush3.bf16.msra.mxu0 %v641_v3  ;;  %v646_v8 = vld [vmem:[%s864_s4 + $0xb0] sm:$0xff]   ;;  %v650_v12 = vld [vmem:[%s864_s4 + $0xa8] sm:$0xff]  }
   0x5   :  { %596 = vmatpush3.bf16.msra.mxu1 %v642_v4  ;;  %569 = vmatprep.subr.bf16.mxu0 %v643_v5  ;;  %v651_v13 = vld [vmem:[%s864_s4 + $0x60] sm:$0xff]   ;;  %v655_v17 = vld [vmem:[%s864_s4 + $0x58] sm:$0xff]   ;;  %v659_v21 = vld [vmem:[%s864_s4 + $0x50] sm:$0xff]  }
   0x6   :  { %597 = vmatprep.subr.bf16.mxu1 %v644_v6  ;;  %v652_v14 = vld [vmem:[%s864_s4 + $0xe0] sm:$0xff]   ;;  %v656_v18 = vld [vmem:[%s864_s4 + $0xd8] sm:$0xff]   ;;  %v660_v22 = vld [vmem:[%s864_s4 + $0xd0] sm:$0xff]  }
   0x7   :  { %v653_v15 = vld [vmem:[%s864_s4 + $0x20] sm:$0xff]   ;;  %v657_v19 = vld [vmem:[%s864_s4 + $0x18] sm:$0xff]   ;;  %v661_v23 = vld [vmem:[%s864_s4 + $0x10] sm:$0xff]  }
   0x8   :  { %570 = vmatpush3.bf16.msra.mxu0 %v645_v7  ;;  %v654_v16 = vld [vmem:[%s864_s4 + $0xa0] sm:$0xff]   ;;  %v658_v20 = vld [vmem:[%s864_s4 + $0x98] sm:$0xff]   ;;  %v662_v24 = vld [vmem:[%s864_s4 + $0x90] sm:$0xff]  }
   0x9   :  { %598 = vmatpush3.bf16.msra.mxu1 %v646_v8  ;;  %571 = vmatprep.subr.bf16.mxu0 %v647_v9  ;;  %v663_v25 = vld [vmem:[%s864_s4 + $0x48] sm:$0xff]   ;;  %v667_v29 = vld [vmem:[%s864_s4 + $0x40] sm:$0xff]   ;;  %v95_v39 = vld [vmem:[%s866_s1 + $0x10] sm:$0xff] }
   0xa   :  { %599 = vmatprep.subr.bf16.mxu1 %v648_v10  ;;  %v664_v26 = vld [vmem:[%s864_s4 + $0xc8] sm:$0xff]   ;;  %v668_v30 = vld [vmem:[%s864_s4 + $0xc0] sm:$0xff]   ;;  %109 = vperm.xlu0 %637, %v95_v39   ;;  %v96_v41 = vld [vmem:[%s866_s1 + $0x18] sm:$0xff] }
   0xb   :  { %v665_v27 = vld [vmem:[%s864_s4 + $0x8] sm:$0xff]   ;;  %v669_v31 = vld [vmem:[%s864_s4] sm:$0xff]  }
   0xc   :  { %572 = vmatpush3.bf16.msra.mxu0 %v649_v11  ;;  %v666_v28 = vld [vmem:[%s864_s4 + $0x88] sm:$0xff]   ;;  %v670_v32 = vld [vmem:[%s864_s4 + $0x80] sm:$0xff]  }
   0xd   :  { %600 = vmatpush3.bf16.msra.mxu1 %v650_v12  ;;  %573 = vmatprep.subr.bf16.mxu0 %v651_v13  ;;  %v671_v33 = vld [vmem:[%s865_s0] ss:$16 sps:$4 sm:$0xff]   ;;  %v673_v34 = vld [vmem:[%s865_s0 + $0x4] ss:$16 sps:$4 sm:$0xff]   ;;  %v674_v35 = vld [vmem:[%s865_s0 + $0x8] ss:$16 sps:$4 sm:$0xff]  }
   0xe   :  { %601 = vmatprep.subr.bf16.mxu1 %v652_v14  ;;  %v676_v36 = vld [vmem:[%s865_s0 + $0xc] ss:$16 sps:$4 sm:$0xff]   ;;  %381 = vmatprep.mubr.bf16.mxu0 %v673_v34  ;;  %v677_v37 = vld [vmem:[%s865_s0 + $0x24] ss:$16 sps:$4 sm:$0xff]   ;;  %v681_v42 = vld [vmem:[%s865_s0 + $0x20] ss:$16 sps:$4 sm:$0xff]  }
   0xf   :  { %430 = vmatprep.mubr.bf16.mxu1 %v676_v36  ;;  %v679_v38 = vld [vmem:[%s865_s0 + $0x2c] ss:$16 sps:$4 sm:$0xff]   ;;  %v93_v40 = vld [vmem:[%s866_s1] sm:$0xff]  ;;  %v682_v44 = vld [vmem:[%s865_s0 + $0x28] ss:$16 sps:$4 sm:$0xff]   ;;  %114 = vperm.xlu0 %637, %v96_v41  }
  0x10   :  { %574 = vmatpush3.bf16.msra.mxu0 %v653_v15  ;;  %99 = vperm.xlu1 %638, %v93_v40   ;;  %v94_v43 = vld [vmem:[%s866_s1 + $0x8] sm:$0xff]  ;;  %v455_v45 = vld [vmem:[%s867_s3] sm:$0xff] }
  0x11   :  { %602 = vmatpush3.bf16.msra.mxu1 %v654_v16  ;;  %575 = vmatprep.subr.bf16.mxu0 %v655_v17  ;;  %v456_v46 = vld [vmem:[%s867_s3 + $0x8] sm:$0x3] }
  0x12   :  { %603 = vmatprep.subr.bf16.mxu1 %v656_v18 }
  0x13   :  { %459 = vperm.xlu0 %637, %v455_v45  }
  0x14   :  { %576 = vmatpush3.bf16.msra.mxu0 %v657_v19  ;;  %104 = vperm.xlu1 %638, %v94_v43  }
  0x15   :  { %604 = vmatpush3.bf16.msra.mxu1 %v658_v20  ;;  %577 = vmatprep.subr.bf16.mxu0 %v659_v21 }
  0x16   :  { %605 = vmatprep.subr.bf16.mxu1 %v660_v22 }
  0x18   :  { %578 = vmatpush3.bf16.msra.mxu0 %v661_v23  ;;  %464 = vperm.xlu1 %638, %v456_v46  }
  0x19   :  { %606 = vmatpush3.bf16.msra.mxu1 %v662_v24  ;;  %579 = vmatprep.subr.bf16.mxu0 %v663_v25 }
  0x1a   :  { %607 = vmatprep.subr.bf16.mxu1 %v664_v26  ;;  %v683_v26 = vld [vmem:[%s868_s2] sm:$0x1f]  }
  0x1c   :  { %580 = vmatpush3.bf16.msra.mxu0 %v665_v27 }
  0x1d   :  { %608 = vmatpush3.bf16.msra.mxu1 %v666_v28  ;;  %581 = vmatprep.subr.bf16.mxu0 %v667_v29 }
  0x1e   :  { %609 = vmatprep.subr.bf16.mxu1 %v668_v30 }
  0x20   :  { %582 = vmatpush3.bf16.msra.mxu0 %v669_v31 }
  0x21   :  { %610 = vmatpush3.bf16.msra.mxu1 %v670_v32  ;;  %626 = vmatprep.subr.bf16.mxu0 %v685_v47 }
  0x23   :  { %382 = vmatmul.mubr.bf16.vlgmr.msra.gmra.mxu0 %v671_v33 }
  0x24   :  { %431 = vmatmul.mubr.bf16.vlgmr.msra.gmra.mxu1 %v674_v35  ;;  %389 = vmatprep.mubr.bf16.mxu0 %v677_v37 }
  0x25   :  { %438 = vmatprep.mubr.bf16.mxu1 %v679_v38 }
  0x2b   :  { %390 = vmatmul.mubr.bf16.gmra.mxu0 %v681_v42 }
  0x2c   :  { %439 = vmatmul.mubr.bf16.gmra.mxu1 %v682_v44  ;;  %630 = vmatprep.mubr.msk.bf16.mxu0 %vm686_vm0, %v685_v47 }
  0x85   :  { %v110_v59 = vpop.permute.xlu0 %109 }
  0x8a   :  { %v115_v11 = vpop.permute.xlu0 %114 }
  0x8b   :  { %v100_v54 = vpop.permute.xlu1 %99 }
  0x8e   :  { %v460_v27 = vpop.permute.xlu0 %459 }
  0x8f   :  { %v105_v1 = vpop.permute.xlu1 %104 }
  0x93   :  { %v465_v31 = vpop.permute.xlu1 %464 }
  0xe3   :  { %v583_v48 = vpop.f32.mrf.mxu0 }
  0xe4   :  { %v611_v49 = vpop.f32.mrf.mxu1 }
  0xe5   :  { %v584_v50 = vpop.f32.mrf.mxu0 }
  0xe6   :  { %v612_v51 = vpop.f32.mrf.mxu1  ;;  %v585_v0 = vadd.f32 %v584_v50, %v583_v48 }
  0xe7   :  { %v586_v52 = vpop.f32.mrf.mxu0  ;;  %v613_v16 = vadd.f32 %v612_v51, %v611_v49 }
  0xe8   :  { %v614_v53 = vpop.f32.mrf.mxu1  ;;  %v384_v10 = vadd.f32 %v585_v0, %v100_v54 }
  0xe9   :  { %v587_v55 = vpop.f32.mrf.mxu0 }
  0xea   :  { %v615_v56 = vpop.f32.mrf.mxu1  ;;  %v588_v61 = vadd.f32 %v587_v55, %v586_v52  ;;  %v433_v19 = vadd.f32 %v613_v16, %v384_v10 }
  0xeb   :  { %v589_v57 = vpop.f32.mrf.mxu0  ;;  %v616_v12 = vadd.f32 %v615_v56, %v614_v53 }
  0xec   :  { %v617_v58 = vpop.f32.mrf.mxu1  ;;  %v387_v6 = vadd.f32 %v588_v61, %v105_v1  ;;  %v447_v24 = vmax.f32 %v433_v19, 0.0 }
  0xed   :  { %v590_v60 = vpop.f32.mrf.mxu0 }
  0xee   :  { %v591_v62 = vadd.f32 %v590_v60, %v589_v57  ;;  %v618_v63 = vpop.f32.mrf.mxu1  ;;  %v436_v17 = vadd.f32 %v616_v12, %v387_v6 }
  0xef   :  { %v592_v2 = vpop.f32.mrf.mxu0  ;;  %v619_v7 = vadd.f32 %v618_v63, %v617_v58 }
  0xf0   :  { %v392_v3 = vadd.f32 %v591_v62, %v110_v59  ;;  %v620_v4 = vpop.f32.mrf.mxu1  ;;  %v448_v22 = vmax.f32 %v436_v17, 0.0 }
  0xf1   :  { %v593_v5 = vpop.f32.mrf.mxu0 }
  0xf2   :  { %v594_v8 = vadd.f32 %v593_v5, %v592_v2  ;;  %v621_v9 = vpop.f32.mrf.mxu1  ;;  %v441_v13 = vadd.f32 %v619_v7, %v392_v3  ;;  %v453_v25 = vpack.c.bf16 %v448_v22, %v447_v24 }
  0xf3   :  { %v622_v15 = vadd.f32 %v621_v9, %v620_v4 }
  0xf4   :  { %v395_v14 = vadd.f32 %v594_v8, %v115_v11  ;;  %v449_v20 = vmax.f32 %v441_v13, 0.0 }
  0xf6   :  { %v444_v18 = vadd.f32 %v622_v15, %v395_v14 }
  0xf8   :  { %v450_v21 = vmax.f32 %v444_v18, 0.0 }
  0xfa   :  { %v454_v23 = vpack.c.bf16 %v450_v21, %v449_v20 }
  0xfc   :  { %627 = vmatpush3.bf16.msra.mxu0 %v454_v23 }
  0xfd   :  { %628 = vmatprep.subr.bf16.mxu0 %v685_v47 }
 0x100   :  { %629 = vmatpush3.bf16.msra.mxu0 %v453_v25 }
 0x103   :  { %631 = vmatmul.mubr.msk.bf16.vlgmr.msra.gmra.mxu0 %vm472_vm1, %v683_v26 }
 0x1c3   :  { %v510_v28 = vpop.f32.mrf.mxu0 }
 0x1c4   :  { %v511_v29 = vadd.f32 %v510_v28, %v460_v27 }
 0x1c5   :  { %v632_v30 = vpop.f32.mrf.mxu0 }
 0x1c6   :  { %518 = vst.msk [vmem:[%s869_s5] sm:$0xff] %vm517_vm2, %v511_v29 }
 0x1c7   :  { %v513_v32 = vpop.f32.mrf.mxu0 }
 0x1c8   :  { %v514_v33 = vadd.f32 %v513_v32, %v465_v31 }
 0x1c9   :  { %v633_v34 = vpop.f32.mrf.mxu0 }
 0x1ca   :  { %520 = vst.msk [vmem:[%s869_s5 + $0x8] sm:$0x3] %vm519_vm3, %v514_v33 }

</bundles_post_ra>
